<compile_context>
chip_gen: v7x
topology: tpu7x:2x2x1
jax: 0.10.0
libtpu: 0.0.40
codegen_flags: <defaults>
</compile_context>

<pallas_src>
import numpy as np
import jax
import jax.numpy as jnp
from jax import lax
from jax.experimental import pallas as pl
from jax.experimental.pallas import tpu as pltpu

BN_EPS = 1e-5


def _round_up(x, m):
    return ((x + m - 1) // m) * m


# ----------------------- fused conv + BN + ReLU (+pool) -------------------- #

def conv_bn_relu_layer(x_nhwc, w_hwio, b, gamma, beta, *, padding, pool):
    del b  # exactly cancelled by training-mode batch-stat BN (see header note)
    N, H, W, Cin = x_nhwc.shape
    Cout = w_hwio.shape[-1]
    if padding:
        x_nhwc = jnp.pad(
            x_nhwc, ((0, 0), (padding, padding), (padding, padding), (0, 0)))
    Hp, Wp = x_nhwc.shape[1], x_nhwc.shape[2]
    Ho, Wo = Hp - 2, Wp - 2
    L = Ho * Wp                              # over-wide conv rows (cols >= Wo are junk)
    Mext = L + (Wp + 1 if pool else 0)       # extra rows so pool shifts stay in-bounds
    Rpad = _round_up(Mext + 2 * Wp + 2, 8)   # flat input rows incl. conv tap reach
    m_valid = N * Ho * Wo                    # BN batch-stat count
    inv_cnt = 1.0 / float(m_valid)

    # Flatten (free reshape) + zero-pad rows so every tap slice is in-bounds.
    x_flat = x_nhwc.reshape(N, Hp * Wp, Cin)
    x_flat = jnp.pad(x_flat, ((0, 0), (0, Rpad - Hp * Wp), (0, 0)))
    w9 = w_hwio.reshape(9, Cin, Cout).astype(jnp.bfloat16)
    g2 = gamma.reshape(1, Cout).astype(jnp.float32)
    bt2 = beta.reshape(1, Cout).astype(jnp.float32)

    # One-hot selection matrix compacting the over-wide slab to output positions
    # (pool: 2x2 window top-left corners; no pool: valid columns).  Static.
    if pool:
        Hq, Wq = Ho // 2, Wo // 2
        rows = np.arange(Hq * Wq)
        tops = (rows // Wq) * (2 * Wp) + (rows % Wq) * 2
    else:
        Hq, Wq = Ho, Wo
        rows = np.arange(Hq * Wq)
        tops = (rows // Wq) * Wp + (rows % Wq)
    n_out = Hq * Wq
    sel_np = np.zeros((n_out, L), np.float32)
    sel_np[rows, tops] = 1.0
    sel = jnp.asarray(sel_np)

    def kernel(x_ref, w_ref, g_ref, bt_ref, s_ref, o_ref, y_sc, sum_sc, sq_sc):
        p = pl.program_id(0)     # 0: conv + stats, 1: BN apply (+pool) + store
        n = pl.program_id(1)     # batch index

        @pl.when((p == 0) & (n == 0))
        def _init():
            sum_sc[...] = jnp.zeros((1, Cout), jnp.float32)
            sq_sc[...] = jnp.zeros((1, Cout), jnp.float32)

        @pl.when(p == 0)
        def _conv():
            acc = jnp.zeros((Mext, Cout), jnp.float32)
            for k in range(9):                       # static unroll over taps
                d = (k // 3) * Wp + (k % 3)          # static sublane offset
                xa = x_ref[pl.ds(d, Mext), :].astype(jnp.bfloat16)
                acc = acc + jnp.dot(xa, w_ref[k],
                                    preferred_element_type=jnp.float32)
            y_sc[n] = acc
            r = lax.broadcasted_iota(jnp.int32, (Mext, 1), 0)
            valid = ((r % Wp) < Wo) & (r < L)        # mask junk cols / tail rows
            am = jnp.where(valid, acc, 0.0)
            sum_sc[...] += jnp.sum(am, axis=0, keepdims=True)
            sq_sc[...] += jnp.sum(am * am, axis=0, keepdims=True)

        @pl.when(p == 1)
        def _apply():
            mean = sum_sc[...] * inv_cnt
            var = jnp.maximum(sq_sc[...] * inv_cnt - mean * mean, 0.0)
            inv = lax.rsqrt(var + BN_EPS)
            scale = g_ref[...] * inv
            shift = bt_ref[...] - mean * scale
            a = jnp.maximum(y_sc[n] * scale + shift, 0.0)     # (Mext, Cout)
            if pool:
                # 2x2 / stride-2 max-pool via three statically shifted maxima.
                m = jnp.maximum(jnp.maximum(a[0:L], a[1:L + 1]),
                                jnp.maximum(a[Wp:L + Wp], a[Wp + 1:L + Wp + 1]))
            else:
                m = a[0:L]
            # Compact to the n_out output positions with a one-hot MXU matmul;
            # keeps the store one dense block and avoids strided ref reads.
            o_ref[...] = jnp.dot(s_ref[...], m,
                                 preferred_element_type=jnp.float32)

    out = pl.pallas_call(
        kernel,
        out_shape=jax.ShapeDtypeStruct((N, n_out, Cout), jnp.float32),
        grid=(2, N),
        in_specs=[
            # phase 1 never reads x; pin it to block 0 to skip the re-fetch.
            pl.BlockSpec((None, Rpad, Cin), lambda p, n: ((1 - p) * n, 0, 0)),
            pl.BlockSpec((9, Cin, Cout), lambda p, n: (0, 0, 0)),
            pl.BlockSpec((1, Cout), lambda p, n: (0, 0)),
            pl.BlockSpec((1, Cout), lambda p, n: (0, 0)),
            pl.BlockSpec((n_out, L), lambda p, n: (0, 0)),
        ],
        out_specs=pl.BlockSpec((None, n_out, Cout), lambda p, n: (p * n, 0, 0)),
        scratch_shapes=[
            pltpu.VMEM((N, Mext, Cout), jnp.float32),   # per-image conv slab
            pltpu.VMEM((1, Cout), jnp.float32),         # sum(y)
            pltpu.VMEM((1, Cout), jnp.float32),         # sum(y*y)
        ],
        compiler_params=pltpu.CompilerParams(
            dimension_semantics=("arbitrary", "arbitrary")),
    )(x_flat, w9, g2, bt2, sel)

    return out.reshape(N, Hq, Wq, Cout)


# ----------------------------- model ---------------------------------------- #

def init_params(key):
    params = {}
    cins = [3, 64, 64, 64]
    for i, cin in enumerate(cins, start=1):
        key, kw, kb, kg, kbt = jax.random.split(key, 5)
        fan_in = cin * 9
        bound = 1.0 / (fan_in ** 0.5)
        w = jax.random.uniform(kw, (3, 3, cin, 64), jnp.float32, -bound, bound)
        b = jax.random.uniform(kb, (64,), jnp.float32, -bound, bound)
        gamma = 1.0 + 0.1 * jax.random.normal(kg, (64,), jnp.float32)
        beta = 0.1 * jax.random.normal(kbt, (64,), jnp.float32)
        params[f"l{i}"] = (w, b, gamma, beta)
    return params


@jax.jit
def cnn_encoder(x_nchw, params):
    x = jnp.transpose(x_nchw, (0, 2, 3, 1)).astype(jnp.float32)   # NCHW -> NHWC
    x = conv_bn_relu_layer(x, *params["l1"], padding=0, pool=True)
    x = conv_bn_relu_layer(x, *params["l2"], padding=0, pool=True)
    x = conv_bn_relu_layer(x, *params["l3"], padding=1, pool=False)
    x = conv_bn_relu_layer(x, *params["l4"], padding=1, pool=False)
    return jnp.transpose(x, (0, 3, 1, 2))                          # back to NCHW


# ----------------------------- reference (plain JAX) ------------------------ #

def _ref_layer(x, w, b, gamma, beta, padding, pool):
    y = lax.conv_general_dilated(
        x, w, window_strides=(1, 1),
        padding=[(padding, padding), (padding, padding)],
        dimension_numbers=("NHWC", "HWIO", "NHWC"),
        precision=lax.Precision.HIGHEST)
    y = y + b
    mean = jnp.mean(y, axis=(0, 1, 2), keepdims=True)
    var = jnp.mean(jnp.square(y - mean), axis=(0, 1, 2), keepdims=True)
    y = (y - mean) / jnp.sqrt(var + BN_EPS) * gamma + beta
    y = jnp.maximum(y, 0.0)
    if pool:
        y = lax.reduce_window(y, -jnp.inf, lax.max,
                              (1, 2, 2, 1), (1, 2, 2, 1), "VALID")
    return y


def cnn_encoder_ref(x_nchw, params):
    x = jnp.transpose(x_nchw, (0, 2, 3, 1)).astype(jnp.float32)
    x = _ref_layer(x, *params["l1"], 0, True)
    x = _ref_layer(x, *params["l2"], 0, True)
    x = _ref_layer(x, *params["l3"], 1, False)
    x = _ref_layer(x, *params["l4"], 1, False)
    return jnp.transpose(x, (0, 3, 1, 2))


# ----------------------------- main ------------------------------------------ #

if __name__ == "__main__":
    key = jax.random.PRNGKey(0)
    kx, kp = jax.random.split(key)
    x = jax.random.normal(kx, (2, 3, 16, 16), jnp.float32)
    params = init_params(kp)

    out = jax.block_until_ready(cnn_encoder(x, params))
    assert out.shape == (2, 64, 2, 2), out.shape

    ref = jax.block_until_ready(cnn_encoder_ref(x, params))
    # bf16 MXU inputs (f32 accumulation) across 4 stacked conv+BN layers:
    # tolerance loosened relative to an all-f32 run.
    err = float(jnp.max(jnp.abs(out - ref)))
    assert jnp.allclose(out, ref, atol=1e-1, rtol=1e-1), err

    print("KERNEL_OK")
</pallas_src>

<mosaic_0001>
module attributes {stable_mosaic.version = 11 : i64} {
  func.func @kernel(%arg0: i32, %arg1: i32, %arg2: memref<1x280x3xf32, #tpu.memory_space<vmem>>, %arg3: memref<9x3x64xbf16, #tpu.memory_space<vmem>>, %arg4: memref<1x64xf32, #tpu.memory_space<vmem>>, %arg5: memref<1x64xf32, #tpu.memory_space<vmem>>, %arg6: memref<49x224xf32, #tpu.memory_space<vmem>>, %arg7: memref<1x49x64xf32, #tpu.memory_space<vmem>>, %arg8: memref<2x241x64xf32, #tpu.memory_space<vmem>>, %arg9: memref<1x64xf32, #tpu.memory_space<vmem>>, %arg10: memref<1x64xf32, #tpu.memory_space<vmem>>) attributes {dimension_semantics = [#tpu.dimension_semantics<arbitrary>, #tpu.dimension_semantics<arbitrary>], iteration_bounds = array<i64: 2, 2>, scalar_prefetch = 0 : i64, scratch_operands = 3 : i64, tpu.core_type = #tpu.core_type<tc>, window_params = [{transform_indices = @transform_0, window_bounds = array<i64: 1, 280, 3>}, {pipeline_mode = #tpu.pipeline_mode<synchronous>, transform_indices = @transform_1, window_bounds = array<i64: 9, 3, 64>}, {pipeline_mode = #tpu.pipeline_mode<synchronous>, transform_indices = @transform_2, window_bounds = array<i64: 1, 64>}, {pipeline_mode = #tpu.pipeline_mode<synchronous>, transform_indices = @transform_3, window_bounds = array<i64: 1, 64>}, {pipeline_mode = #tpu.pipeline_mode<synchronous>, transform_indices = @transform_4, window_bounds = array<i64: 49, 224>}, {transform_indices = @transform_5, window_bounds = array<i64: 1, 49, 64>}]} {
    %c0_i32 = arith.constant 0 : i32
    %0 = arith.cmpi eq, %arg0, %c0_i32 : i32
    %c0_i32_0 = arith.constant 0 : i32
    %1 = arith.cmpi eq, %arg1, %c0_i32_0 : i32
    %2 = arith.andi %0, %1 : i1
    %3 = arith.extui %2 : i1 to i32
    %c0_i32_1 = arith.constant 0 : i32
    %4 = arith.cmpi ne, %3, %c0_i32_1 : i32
    scf.if %4 {
      %cst = arith.constant 0.000000e+00 : f32
      %11 = vector.broadcast %cst : f32 to vector<1x64xf32>
      %c0 = arith.constant 0 : index
      %c0_5 = arith.constant 0 : index
      %12 = vector.load %arg9[%c0, %c0_5] : memref<1x64xf32, #tpu.memory_space<vmem>>, vector<1x64xf32>
      tpu.vector_store %arg9[%c0, %c0_5], %11 {strides = array<i32>} : memref<1x64xf32, #tpu.memory_space<vmem>>, vector<1x64xf32>,
      %cst_6 = arith.constant 0.000000e+00 : f32
      %13 = vector.broadcast %cst_6 : f32 to vector<1x64xf32>
      %c0_7 = arith.constant 0 : index
      %c0_8 = arith.constant 0 : index
      %14 = vector.load %arg10[%c0_7, %c0_8] : memref<1x64xf32, #tpu.memory_space<vmem>>, vector<1x64xf32>
      tpu.vector_store %arg10[%c0_7, %c0_8], %13 {strides = array<i32>} : memref<1x64xf32, #tpu.memory_space<vmem>>, vector<1x64xf32>,
    } else {
    }
    %c0_i32_2 = arith.constant 0 : i32
    %5 = arith.cmpi eq, %arg0, %c0_i32_2 : i32
    %6 = arith.extui %5 : i1 to i32
    %c0_i32_3 = arith.constant 0 : i32
    %7 = arith.cmpi ne, %6, %c0_i32_3 : i32
    scf.if %7 {
      %cst = arith.constant 0.000000e+00 : f32
      %11 = vector.broadcast %cst : f32 to vector<241x64xf32>
      %c0 = arith.constant 0 : index
      %c0_5 = arith.constant 0 : index
      %c0_6 = arith.constant 0 : index
      %12 = vector.load %arg2[%c0, %c0_5, %c0_6] : memref<1x280x3xf32, #tpu.memory_space<vmem>>, vector<1x241x3xf32>
      %13 = vector.shape_cast %12 : vector<1x241x3xf32> to vector<241x3xf32>
      %14 = arith.truncf %13 : vector<241x3xf32> to vector<241x3xbf16>
      %c0_7 = arith.constant 0 : index
      %c0_8 = arith.constant 0 : index
      %c0_9 = arith.constant 0 : index
      %15 = vector.load %arg3[%c0_7, %c0_8, %c0_9] : memref<9x3x64xbf16, #tpu.memory_space<vmem>>, vector<1x3x64xbf16>
      %16 = vector.shape_cast %15 : vector<1x3x64xbf16> to vector<3x64xbf16>
      %cst_10 = arith.constant dense<0.000000e+00> : vector<241x64xf32>
      %17 = tpu.matmul %14, %16, %cst_10 {dimension_numbers = #tpu.dot_dimension_numbers<[1], [0], [0], [1], [0, 0, 1, 1], [], []>} : vector<241x3xbf16>, vector<3x64xbf16>, vector<241x64xf32> -> vector<241x64xf32>
      %18 = arith.addf %11, %17 : vector<241x64xf32>
      %c0_11 = arith.constant 0 : index
      %c1 = arith.constant 1 : index
      %c0_12 = arith.constant 0 : index
      %19 = vector.load %arg2[%c0_11, %c1, %c0_12] : memref<1x280x3xf32, #tpu.memory_space<vmem>>, vector<1x241x3xf32>
      %20 = vector.shape_cast %19 : vector<1x241x3xf32> to vector<241x3xf32>
      %21 = arith.truncf %20 : vector<241x3xf32> to vector<241x3xbf16>
      %c1_13 = arith.constant 1 : index
      %c0_14 = arith.constant 0 : index
      %c0_15 = arith.constant 0 : index
      %22 = vector.load %arg3[%c1_13, %c0_14, %c0_15] : memref<9x3x64xbf16, #tpu.memory_space<vmem>>, vector<1x3x64xbf16>
      %23 = vector.shape_cast %22 : vector<1x3x64xbf16> to vector<3x64xbf16>
      %cst_16 = arith.constant dense<0.000000e+00> : vector<241x64xf32>
      %24 = tpu.matmul %21, %23, %cst_16 {dimension_numbers = #tpu.dot_dimension_numbers<[1], [0], [0], [1], [0, 0, 1, 1], [], []>} : vector<241x3xbf16>, vector<3x64xbf16>, vector<241x64xf32> -> vector<241x64xf32>
      %25 = arith.addf %18, %24 : vector<241x64xf32>
      %c0_17 = arith.constant 0 : index
      %c2 = arith.constant 2 : index
      %c0_18 = arith.constant 0 : index
      %26 = vector.load %arg2[%c0_17, %c2, %c0_18] : memref<1x280x3xf32, #tpu.memory_space<vmem>>, vector<1x241x3xf32>
      %27 = vector.shape_cast %26 : vector<1x241x3xf32> to vector<241x3xf32>
      %28 = arith.truncf %27 : vector<241x3xf32> to vector<241x3xbf16>
      %c2_19 = arith.constant 2 : index
      %c0_20 = arith.constant 0 : index
      %c0_21 = arith.constant 0 : index
      %29 = vector.load %arg3[%c2_19, %c0_20, %c0_21] : memref<9x3x64xbf16, #tpu.memory_space<vmem>>, vector<1x3x64xbf16>
      %30 = vector.shape_cast %29 : vector<1x3x64xbf16> to vector<3x64xbf16>
      %cst_22 = arith.constant dense<0.000000e+00> : vector<241x64xf32>
      %31 = tpu.matmul %28, %30, %cst_22 {dimension_numbers = #tpu.dot_dimension_numbers<[1], [0], [0], [1], [0, 0, 1, 1], [], []>} : vector<241x3xbf16>, vector<3x64xbf16>, vector<241x64xf32> -> vector<241x64xf32>
      %32 = arith.addf %25, %31 : vector<241x64xf32>
      %c0_23 = arith.constant 0 : index
      %c16 = arith.constant 16 : index
      %c0_24 = arith.constant 0 : index
      %33 = vector.load %arg2[%c0_23, %c16, %c0_24] : memref<1x280x3xf32, #tpu.memory_space<vmem>>, vector<1x241x3xf32>
      %34 = vector.shape_cast %33 : vector<1x241x3xf32> to vector<241x3xf32>
      %35 = arith.truncf %34 : vector<241x3xf32> to vector<241x3xbf16>
      %c3 = arith.constant 3 : index
      %c0_25 = arith.constant 0 : index
      %c0_26 = arith.constant 0 : index
      %36 = vector.load %arg3[%c3, %c0_25, %c0_26] : memref<9x3x64xbf16, #tpu.memory_space<vmem>>, vector<1x3x64xbf16>
      %37 = vector.shape_cast %36 : vector<1x3x64xbf16> to vector<3x64xbf16>
      %cst_27 = arith.constant dense<0.000000e+00> : vector<241x64xf32>
      %38 = tpu.matmul %35, %37, %cst_27 {dimension_numbers = #tpu.dot_dimension_numbers<[1], [0], [0], [1], [0, 0, 1, 1], [], []>} : vector<241x3xbf16>, vector<3x64xbf16>, vector<241x64xf32> -> vector<241x64xf32>
      %39 = arith.addf %32, %38 : vector<241x64xf32>
      %c0_28 = arith.constant 0 : index
      %c17 = arith.constant 17 : index
      %c0_29 = arith.constant 0 : index
      %40 = vector.load %arg2[%c0_28, %c17, %c0_29] : memref<1x280x3xf32, #tpu.memory_space<vmem>>, vector<1x241x3xf32>
      %41 = vector.shape_cast %40 : vector<1x241x3xf32> to vector<241x3xf32>
      %42 = arith.truncf %41 : vector<241x3xf32> to vector<241x3xbf16>
      %c4 = arith.constant 4 : index
      %c0_30 = arith.constant 0 : index
      %c0_31 = arith.constant 0 : index
      %43 = vector.load %arg3[%c4, %c0_30, %c0_31] : memref<9x3x64xbf16, #tpu.memory_space<vmem>>, vector<1x3x64xbf16>
      %44 = vector.shape_cast %43 : vector<1x3x64xbf16> to vector<3x64xbf16>
      %cst_32 = arith.constant dense<0.000000e+00> : vector<241x64xf32>
      %45 = tpu.matmul %42, %44, %cst_32 {dimension_numbers = #tpu.dot_dimension_numbers<[1], [0], [0], [1], [0, 0, 1, 1], [], []>} : vector<241x3xbf16>, vector<3x64xbf16>, vector<241x64xf32> -> vector<241x64xf32>
      %46 = arith.addf %39, %45 : vector<241x64xf32>
      %c0_33 = arith.constant 0 : index
      %c18 = arith.constant 18 : index
      %c0_34 = arith.constant 0 : index
      %47 = vector.load %arg2[%c0_33, %c18, %c0_34] : memref<1x280x3xf32, #tpu.memory_space<vmem>>, vector<1x241x3xf32>
      %48 = vector.shape_cast %47 : vector<1x241x3xf32> to vector<241x3xf32>
      %49 = arith.truncf %48 : vector<241x3xf32> to vector<241x3xbf16>
      %c5 = arith.constant 5 : index
      %c0_35 = arith.constant 0 : index
      %c0_36 = arith.constant 0 : index
      %50 = vector.load %arg3[%c5, %c0_35, %c0_36] : memref<9x3x64xbf16, #tpu.memory_space<vmem>>, vector<1x3x64xbf16>
      %51 = vector.shape_cast %50 : vector<1x3x64xbf16> to vector<3x64xbf16>
      %cst_37 = arith.constant dense<0.000000e+00> : vector<241x64xf32>
      %52 = tpu.matmul %49, %51, %cst_37 {dimension_numbers = #tpu.dot_dimension_numbers<[1], [0], [0], [1], [0, 0, 1, 1], [], []>} : vector<241x3xbf16>, vector<3x64xbf16>, vector<241x64xf32> -> vector<241x64xf32>
      %53 = arith.addf %46, %52 : vector<241x64xf32>
      %c0_38 = arith.constant 0 : index
      %c32 = arith.constant 32 : index
      %c0_39 = arith.constant 0 : index
      %54 = vector.load %arg2[%c0_38, %c32, %c0_39] : memref<1x280x3xf32, #tpu.memory_space<vmem>>, vector<1x241x3xf32>
      %55 = vector.shape_cast %54 : vector<1x241x3xf32> to vector<241x3xf32>
      %56 = arith.truncf %55 : vector<241x3xf32> to vector<241x3xbf16>
      %c6 = arith.constant 6 : index
      %c0_40 = arith.constant 0 : index
      %c0_41 = arith.constant 0 : index
      %57 = vector.load %arg3[%c6, %c0_40, %c0_41] : memref<9x3x64xbf16, #tpu.memory_space<vmem>>, vector<1x3x64xbf16>
      %58 = vector.shape_cast %57 : vector<1x3x64xbf16> to vector<3x64xbf16>
      %cst_42 = arith.constant dense<0.000000e+00> : vector<241x64xf32>
      %59 = tpu.matmul %56, %58, %cst_42 {dimension_numbers = #tpu.dot_dimension_numbers<[1], [0], [0], [1], [0, 0, 1, 1], [], []>} : vector<241x3xbf16>, vector<3x64xbf16>, vector<241x64xf32> -> vector<241x64xf32>
      %60 = arith.addf %53, %59 : vector<241x64xf32>
      %c0_43 = arith.constant 0 : index
      %c33 = arith.constant 33 : index
      %c0_44 = arith.constant 0 : index
      %61 = vector.load %arg2[%c0_43, %c33, %c0_44] : memref<1x280x3xf32, #tpu.memory_space<vmem>>, vector<1x241x3xf32>
      %62 = vector.shape_cast %61 : vector<1x241x3xf32> to vector<241x3xf32>
      %63 = arith.truncf %62 : vector<241x3xf32> to vector<241x3xbf16>
      %c7 = arith.constant 7 : index
      %c0_45 = arith.constant 0 : index
      %c0_46 = arith.constant 0 : index
      %64 = vector.load %arg3[%c7, %c0_45, %c0_46] : memref<9x3x64xbf16, #tpu.memory_space<vmem>>, vector<1x3x64xbf16>
      %65 = vector.shape_cast %64 : vector<1x3x64xbf16> to vector<3x64xbf16>
      %cst_47 = arith.constant dense<0.000000e+00> : vector<241x64xf32>
      %66 = tpu.matmul %63, %65, %cst_47 {dimension_numbers = #tpu.dot_dimension_numbers<[1], [0], [0], [1], [0, 0, 1, 1], [], []>} : vector<241x3xbf16>, vector<3x64xbf16>, vector<241x64xf32> -> vector<241x64xf32>
      %67 = arith.addf %60, %66 : vector<241x64xf32>
      %c0_48 = arith.constant 0 : index
      %c34 = arith.constant 34 : index
      %c0_49 = arith.constant 0 : index
      %68 = vector.load %arg2[%c0_48, %c34, %c0_49] : memref<1x280x3xf32, #tpu.memory_space<vmem>>, vector<1x241x3xf32>
      %69 = vector.shape_cast %68 : vector<1x241x3xf32> to vector<241x3xf32>
      %70 = arith.truncf %69 : vector<241x3xf32> to vector<241x3xbf16>
      %c8 = arith.constant 8 : index
      %c0_50 = arith.constant 0 : index
      %c0_51 = arith.constant 0 : index
      %71 = vector.load %arg3[%c8, %c0_50, %c0_51] : memref<9x3x64xbf16, #tpu.memory_space<vmem>>, vector<1x3x64xbf16>
      %72 = vector.shape_cast %71 : vector<1x3x64xbf16> to vector<3x64xbf16>
      %cst_52 = arith.constant dense<0.000000e+00> : vector<241x64xf32>
      %73 = tpu.matmul %70, %72, %cst_52 {dimension_numbers = #tpu.dot_dimension_numbers<[1], [0], [0], [1], [0, 0, 1, 1], [], []>} : vector<241x3xbf16>, vector<3x64xbf16>, vector<241x64xf32> -> vector<241x64xf32>
      %74 = arith.addf %67, %73 : vector<241x64xf32>
      %75 = arith.index_cast %arg1 : i32 to index
      %c0_53 = arith.constant 0 : index
      %c0_54 = arith.constant 0 : index
      %76 = vector.load %arg8[%75, %c0_53, %c0_54] : memref<2x241x64xf32, #tpu.memory_space<vmem>>, vector<1x241x64xf32>
      %77 = vector.shape_cast %76 : vector<1x241x64xf32> to vector<241x64xf32>
      %78 = vector.shape_cast %74 : vector<241x64xf32> to vector<1x241x64xf32>
      tpu.vector_store %arg8[%75, %c0_53, %c0_54], %78 {strides = array<i32>} : memref<2x241x64xf32, #tpu.memory_space<vmem>>, vector<1x241x64xf32>,
      %79 = tpu.iota {dimensions = array<i32: 0>} : vector<241x1xi32>
      %c16_i32 = arith.constant 16 : i32
      %c0_i32_55 = arith.constant 0 : i32
      %80 = arith.cmpi eq, %c16_i32, %c0_i32_55 : i32
      %c1_i32_56 = arith.constant 1 : i32
      %81 = arith.select %80, %c1_i32_56, %c16_i32 : i32
      %82 = vector.broadcast %81 : i32 to vector<241x1xi32>
      %83 = arith.remsi %79, %82 : vector<241x1xi32>
      %c0_i32_57 = arith.constant 0 : i32
      %84 = vector.broadcast %c0_i32_57 : i32 to vector<241x1xi32>
      %85 = arith.cmpi ne, %83, %84 : vector<241x1xi32>
      %c0_i32_58 = arith.constant 0 : i32
      %86 = vector.broadcast %c0_i32_58 : i32 to vector<241x1xi32>
      %87 = arith.cmpi slt, %83, %86 : vector<241x1xi32>
      %c0_i32_59 = arith.constant 0 : i32
      %88 = arith.cmpi slt, %81, %c0_i32_59 : i32
      %89 = vector.broadcast %88 : i1 to vector<241x1xi1>
      %90 = vector.broadcast %89 : vector<241x1xi1> to vector<241x1xi1>
      %91 = arith.xori %87, %90 : vector<241x1xi1>
      %92 = arith.andi %91, %85 : vector<241x1xi1>
      %93 = vector.broadcast %81 : i32 to vector<241x1xi32>
      %94 = arith.addi %83, %93 : vector<241x1xi32>
      %95 = arith.select %92, %94, %83 : vector<241x1xi1>, vector<241x1xi32>
      %c14_i32 = arith.constant 14 : i32
      %96 = vector.broadcast %c14_i32 : i32 to vector<241x1xi32>
      %97 = arith.cmpi slt, %95, %96 : vector<241x1xi32>
      %c224_i32 = arith.constant 224 : i32
      %98 = vector.broadcast %c224_i32 : i32 to vector<241x1xi32>
      %99 = arith.cmpi slt, %79, %98 : vector<241x1xi32>
      %100 = arith.andi %97, %99 : vector<241x1xi1>
      %cst_60 = arith.constant 0.000000e+00 : f32
      %101 = vector.shape_cast %100 : vector<241x1xi1> to vector<241x1xi1>
      %102 = vector.broadcast %101 : vector<241x1xi1> to vector<241x64xi1>
      %103 = vector.broadcast %cst_60 : f32 to vector<241x64xf32>
      %104 = arith.select %102, %74, %103 : vector<241x64xi1>, vector<241x64xf32>
      %c0_61 = arith.constant 0 : index
      %c0_62 = arith.constant 0 : index
      %105 = vector.load %arg9[%c0_61, %c0_62] : memref<1x64xf32, #tpu.memory_space<vmem>>, vector<1x64xf32>
      %cst_63 = arith.constant dense<0.000000e+00> : vector<64xf32>
      %106 = vector.multi_reduction <add>, %104, %cst_63 [0] : vector<241x64xf32> to vector<64xf32>
      %107 = vector.shape_cast %106 : vector<64xf32> to vector<1x64xf32>
      %108 = arith.addf %105, %107 : vector<1x64xf32>
      %c0_64 = arith.constant 0 : index
      %c0_65 = arith.constant 0 : index
      %109 = vector.load %arg9[%c0_64, %c0_65] : memref<1x64xf32, #tpu.memory_space<vmem>>, vector<1x64xf32>
      tpu.vector_store %arg9[%c0_64, %c0_65], %108 {strides = array<i32>} : memref<1x64xf32, #tpu.memory_space<vmem>>, vector<1x64xf32>,
      %c0_66 = arith.constant 0 : index
      %c0_67 = arith.constant 0 : index
      %110 = vector.load %arg10[%c0_66, %c0_67] : memref<1x64xf32, #tpu.memory_space<vmem>>, vector<1x64xf32>
      %111 = arith.mulf %104, %104 : vector<241x64xf32>
      %cst_68 = arith.constant dense<0.000000e+00> : vector<64xf32>
      %112 = vector.multi_reduction <add>, %111, %cst_68 [0] : vector<241x64xf32> to vector<64xf32>
      %113 = vector.shape_cast %112 : vector<64xf32> to vector<1x64xf32>
      %114 = arith.addf %110, %113 : vector<1x64xf32>
      %c0_69 = arith.constant 0 : index
      %c0_70 = arith.constant 0 : index
      %115 = vector.load %arg10[%c0_69, %c0_70] : memref<1x64xf32, #tpu.memory_space<vmem>>, vector<1x64xf32>
      tpu.vector_store %arg10[%c0_69, %c0_70], %114 {strides = array<i32>} : memref<1x64xf32, #tpu.memory_space<vmem>>, vector<1x64xf32>,
    } else {
    }
    %c1_i32 = arith.constant 1 : i32
    %8 = arith.cmpi eq, %arg0, %c1_i32 : i32
    %9 = arith.extui %8 : i1 to i32
    %c0_i32_4 = arith.constant 0 : i32
    %10 = arith.cmpi ne, %9, %c0_i32_4 : i32
    scf.if %10 {
      %c0 = arith.constant 0 : index
      %c0_5 = arith.constant 0 : index
      %11 = vector.load %arg9[%c0, %c0_5] : memref<1x64xf32, #tpu.memory_space<vmem>>, vector<1x64xf32>
      %cst = arith.constant 0.00255102036 : f32
      %12 = vector.broadcast %cst : f32 to vector<1x64xf32>
      %13 = arith.mulf %11, %12 : vector<1x64xf32>
      %c0_6 = arith.constant 0 : index
      %c0_7 = arith.constant 0 : index
      %14 = vector.load %arg10[%c0_6, %c0_7] : memref<1x64xf32, #tpu.memory_space<vmem>>, vector<1x64xf32>
      %cst_8 = arith.constant 0.00255102036 : f32
      %15 = vector.broadcast %cst_8 : f32 to vector<1x64xf32>
      %16 = arith.mulf %14, %15 : vector<1x64xf32>
      %17 = arith.mulf %13, %13 : vector<1x64xf32>
      %18 = arith.subf %16, %17 : vector<1x64xf32>
      %cst_9 = arith.constant 0.000000e+00 : f32
      %19 = vector.broadcast %cst_9 : f32 to vector<1x64xf32>
      %20 = arith.maximumf %18, %19 : vector<1x64xf32>
      %cst_10 = arith.constant 9.99999974E-6 : f32
      %21 = vector.broadcast %cst_10 : f32 to vector<1x64xf32>
      %22 = arith.addf %20, %21 : vector<1x64xf32>
      %23 = math.rsqrt %22 : vector<1x64xf32>
      %c0_11 = arith.constant 0 : index
      %c0_12 = arith.constant 0 : index
      %24 = vector.load %arg4[%c0_11, %c0_12] : memref<1x64xf32, #tpu.memory_space<vmem>>, vector<1x64xf32>
      %25 = arith.mulf %24, %23 : vector<1x64xf32>
      %c0_13 = arith.constant 0 : index
      %c0_14 = arith.constant 0 : index
      %26 = vector.load %arg5[%c0_13, %c0_14] : memref<1x64xf32, #tpu.memory_space<vmem>>, vector<1x64xf32>
      %27 = arith.mulf %13, %25 : vector<1x64xf32>
      %28 = arith.subf %26, %27 : vector<1x64xf32>
      %29 = arith.index_cast %arg1 : i32 to index
      %c0_15 = arith.constant 0 : index
      %c0_16 = arith.constant 0 : index
      %30 = vector.load %arg8[%29, %c0_15, %c0_16] : memref<2x241x64xf32, #tpu.memory_space<vmem>>, vector<1x241x64xf32>
      %31 = vector.shape_cast %30 : vector<1x241x64xf32> to vector<241x64xf32>
      %32 = vector.broadcast %25 : vector<1x64xf32> to vector<241x64xf32>
      %33 = arith.mulf %31, %32 : vector<241x64xf32>
      %34 = vector.broadcast %28 : vector<1x64xf32> to vector<241x64xf32>
      %35 = arith.addf %33, %34 : vector<241x64xf32>
      %cst_17 = arith.constant 0.000000e+00 : f32
      %36 = vector.broadcast %cst_17 : f32 to vector<241x64xf32>
      %37 = arith.maximumf %35, %36 : vector<241x64xf32>
      %38 = vector.extract_strided_slice %37 {offsets = [0, 0], sizes = [224, 64], strides = [1, 1]} : vector<241x64xf32> to vector<224x64xf32>
      %39 = vector.extract_strided_slice %37 {offsets = [1, 0], sizes = [224, 64], strides = [1, 1]} : vector<241x64xf32> to vector<224x64xf32>
      %40 = arith.maximumf %38, %39 : vector<224x64xf32>
      %41 = vector.extract_strided_slice %37 {offsets = [16, 0], sizes = [224, 64], strides = [1, 1]} : vector<241x64xf32> to vector<224x64xf32>
      %42 = vector.extract_strided_slice %37 {offsets = [17, 0], sizes = [224, 64], strides = [1, 1]} : vector<241x64xf32> to vector<224x64xf32>
      %43 = arith.maximumf %41, %42 : vector<224x64xf32>
      %44 = arith.maximumf %40, %43 : vector<224x64xf32>
      %c0_18 = arith.constant 0 : index
      %c0_19 = arith.constant 0 : index
      %45 = vector.load %arg6[%c0_18, %c0_19] : memref<49x224xf32, #tpu.memory_space<vmem>>, vector<49x224xf32>
      %cst_20 = arith.constant dense<0.000000e+00> : vector<49x64xf32>
      %46 = tpu.matmul %45, %44, %cst_20 {dimension_numbers = #tpu.dot_dimension_numbers<[1], [0], [0], [1], [0, 0, 1, 1], [], []>} : vector<49x224xf32>, vector<224x64xf32>, vector<49x64xf32> -> vector<49x64xf32>
      %c0_21 = arith.constant 0 : index
      %c0_22 = arith.constant 0 : index
      %c0_23 = arith.constant 0 : index
      %47 = vector.load %arg7[%c0_21, %c0_22, %c0_23] : memref<1x49x64xf32, #tpu.memory_space<vmem>>, vector<1x49x64xf32>
      %48 = vector.shape_cast %47 : vector<1x49x64xf32> to vector<49x64xf32>
      %49 = vector.shape_cast %46 : vector<49x64xf32> to vector<1x49x64xf32>
      tpu.vector_store %arg7[%c0_21, %c0_22, %c0_23], %49 {strides = array<i32>} : memref<1x49x64xf32, #tpu.memory_space<vmem>>, vector<1x49x64xf32>,
    } else {
    }
    return
  }
  func.func @transform_0(%arg0: i32, %arg1: i32) -> (i32, i32, i32) {
    %c1_i32 = arith.constant 1 : i32
    %0 = arith.subi %c1_i32, %arg0 : i32
    %1 = arith.muli %0, %arg1 : i32
    %c0_i32 = arith.constant 0 : i32
    %c0_i32_0 = arith.constant 0 : i32
    %c0_i32_1 = arith.constant 0 : i32
    return %1, %c0_i32, %c0_i32_0 : i32, i32, i32
  }
  func.func @transform_1(%arg0: i32, %arg1: i32) -> (i32, i32, i32) {
    %c0_i32 = arith.constant 0 : i32
    %c0_i32_0 = arith.constant 0 : i32
    %c0_i32_1 = arith.constant 0 : i32
    %c0_i32_2 = arith.constant 0 : i32
    return %c0_i32, %c0_i32_0, %c0_i32_1 : i32, i32, i32
  }
  func.func @transform_2(%arg0: i32, %arg1: i32) -> (i32, i32) {
    %c0_i32 = arith.constant 0 : i32
    %c0_i32_0 = arith.constant 0 : i32
    %c0_i32_1 = arith.constant 0 : i32
    return %c0_i32, %c0_i32_0 : i32, i32
  }
  func.func @transform_3(%arg0: i32, %arg1: i32) -> (i32, i32) {
    %c0_i32 = arith.constant 0 : i32
    %c0_i32_0 = arith.constant 0 : i32
    %c0_i32_1 = arith.constant 0 : i32
    return %c0_i32, %c0_i32_0 : i32, i32
  }
  func.func @transform_4(%arg0: i32, %arg1: i32) -> (i32, i32) {
    %c0_i32 = arith.constant 0 : i32
    %c0_i32_0 = arith.constant 0 : i32
    %c0_i32_1 = arith.constant 0 : i32
    return %c0_i32, %c0_i32_0 : i32, i32
  }
  func.func @transform_5(%arg0: i32, %arg1: i32) -> (i32, i32, i32) {
    %0 = arith.muli %arg0, %arg1 : i32
    %c0_i32 = arith.constant 0 : i32
    %c0_i32_0 = arith.constant 0 : i32
    %c0_i32_1 = arith.constant 0 : i32
    return %0, %c0_i32, %c0_i32_0 : i32, i32, i32
  }
}

module attributes {stable_mosaic.version = 11 : i64} {
  func.func @kernel(%arg0: i32, %arg1: i32, %arg2: memref<1x64x64xf32, #tpu.memory_space<vmem>>, %arg3: memref<9x64x64xbf16, #tpu.memory_space<vmem>>, %arg4: memref<1x64xf32, #tpu.memory_space<vmem>>, %arg5: memref<1x64xf32, #tpu.memory_space<vmem>>, %arg6: memref<4x35xf32, #tpu.memory_space<vmem>>, %arg7: memref<1x4x64xf32, #tpu.memory_space<vmem>>, %arg8: memref<2x43x64xf32, #tpu.memory_space<vmem>>, %arg9: memref<1x64xf32, #tpu.memory_space<vmem>>, %arg10: memref<1x64xf32, #tpu.memory_space<vmem>>) attributes {dimension_semantics = [#tpu.dimension_semantics<arbitrary>, #tpu.dimension_semantics<arbitrary>], iteration_bounds = array<i64: 2, 2>, scalar_prefetch = 0 : i64, scratch_operands = 3 : i64, tpu.core_type = #tpu.core_type<tc>, window_params = [{transform_indices = @transform_0, window_bounds = array<i64: 1, 64, 64>}, {pipeline_mode = #tpu.pipeline_mode<synchronous>, transform_indices = @transform_1, window_bounds = array<i64: 9, 64, 64>}, {pipeline_mode = #tpu.pipeline_mode<synchronous>, transform_indices = @transform_2, window_bounds = array<i64: 1, 64>}, {pipeline_mode = #tpu.pipeline_mode<synchronous>, transform_indices = @transform_3, window_bounds = array<i64: 1, 64>}, {pipeline_mode = #tpu.pipeline_mode<synchronous>, transform_indices = @transform_4, window_bounds = array<i64: 4, 35>}, {transform_indices = @transform_5, window_bounds = array<i64: 1, 4, 64>}]} {
    %c0_i32 = arith.constant 0 : i32
    %0 = arith.cmpi eq, %arg0, %c0_i32 : i32
    %c0_i32_0 = arith.constant 0 : i32
    %1 = arith.cmpi eq, %arg1, %c0_i32_0 : i32
    %2 = arith.andi %0, %1 : i1
    %3 = arith.extui %2 : i1 to i32
    %c0_i32_1 = arith.constant 0 : i32
    %4 = arith.cmpi ne, %3, %c0_i32_1 : i32
    scf.if %4 {
      %cst = arith.constant 0.000000e+00 : f32
      %11 = vector.broadcast %cst : f32 to vector<1x64xf32>
      %c0 = arith.constant 0 : index
      %c0_5 = arith.constant 0 : index
      %12 = vector.load %arg9[%c0, %c0_5] : memref<1x64xf32, #tpu.memory_space<vmem>>, vector<1x64xf32>
      tpu.vector_store %arg9[%c0, %c0_5], %11 {strides = array<i32>} : memref<1x64xf32, #tpu.memory_space<vmem>>, vector<1x64xf32>,
      %cst_6 = arith.constant 0.000000e+00 : f32
      %13 = vector.broadcast %cst_6 : f32 to vector<1x64xf32>
      %c0_7 = arith.constant 0 : index
      %c0_8 = arith.constant 0 : index
      %14 = vector.load %arg10[%c0_7, %c0_8] : memref<1x64xf32, #tpu.memory_space<vmem>>, vector<1x64xf32>
      tpu.vector_store %arg10[%c0_7, %c0_8], %13 {strides = array<i32>} : memref<1x64xf32, #tpu.memory_space<vmem>>, vector<1x64xf32>,
    } else {
    }
    %c0_i32_2 = arith.constant 0 : i32
    %5 = arith.cmpi eq, %arg0, %c0_i32_2 : i32
    %6 = arith.extui %5 : i1 to i32
    %c0_i32_3 = arith.constant 0 : i32
    %7 = arith.cmpi ne, %6, %c0_i32_3 : i32
    scf.if %7 {
      %cst = arith.constant 0.000000e+00 : f32
      %11 = vector.broadcast %cst : f32 to vector<43x64xf32>
      %c0 = arith.constant 0 : index
      %c0_5 = arith.constant 0 : index
      %c0_6 = arith.constant 0 : index
      %12 = vector.load %arg2[%c0, %c0_5, %c0_6] : memref<1x64x64xf32, #tpu.memory_space<vmem>>, vector<1x43x64xf32>
      %13 = vector.shape_cast %12 : vector<1x43x64xf32> to vector<43x64xf32>
      %14 = arith.truncf %13 : vector<43x64xf32> to vector<43x64xbf16>
      %c0_7 = arith.constant 0 : index
      %c0_8 = arith.constant 0 : index
      %c0_9 = arith.constant 0 : index
      %15 = vector.load %arg3[%c0_7, %c0_8, %c0_9] : memref<9x64x64xbf16, #tpu.memory_space<vmem>>, vector<1x64x64xbf16>
      %16 = vector.shape_cast %15 : vector<1x64x64xbf16> to vector<64x64xbf16>
      %cst_10 = arith.constant dense<0.000000e+00> : vector<43x64xf32>
      %17 = tpu.matmul %14, %16, %cst_10 {dimension_numbers = #tpu.dot_dimension_numbers<[1], [0], [0], [1], [0, 0, 1, 1], [], []>} : vector<43x64xbf16>, vector<64x64xbf16>, vector<43x64xf32> -> vector<43x64xf32>
      %18 = arith.addf %11, %17 : vector<43x64xf32>
      %c0_11 = arith.constant 0 : index
      %c1 = arith.constant 1 : index
      %c0_12 = arith.constant 0 : index
      %19 = vector.load %arg2[%c0_11, %c1, %c0_12] : memref<1x64x64xf32, #tpu.memory_space<vmem>>, vector<1x43x64xf32>
      %20 = vector.shape_cast %19 : vector<1x43x64xf32> to vector<43x64xf32>
      %21 = arith.truncf %20 : vector<43x64xf32> to vector<43x64xbf16>
      %c1_13 = arith.constant 1 : index
      %c0_14 = arith.constant 0 : index
      %c0_15 = arith.constant 0 : index
      %22 = vector.load %arg3[%c1_13, %c0_14, %c0_15] : memref<9x64x64xbf16, #tpu.memory_space<vmem>>, vector<1x64x64xbf16>
      %23 = vector.shape_cast %22 : vector<1x64x64xbf16> to vector<64x64xbf16>
      %cst_16 = arith.constant dense<0.000000e+00> : vector<43x64xf32>
      %24 = tpu.matmul %21, %23, %cst_16 {dimension_numbers = #tpu.dot_dimension_numbers<[1], [0], [0], [1], [0, 0, 1, 1], [], []>} : vector<43x64xbf16>, vector<64x64xbf16>, vector<43x64xf32> -> vector<43x64xf32>
      %25 = arith.addf %18, %24 : vector<43x64xf32>
      %c0_17 = arith.constant 0 : index
      %c2 = arith.constant 2 : index
      %c0_18 = arith.constant 0 : index
      %26 = vector.load %arg2[%c0_17, %c2, %c0_18] : memref<1x64x64xf32, #tpu.memory_space<vmem>>, vector<1x43x64xf32>
      %27 = vector.shape_cast %26 : vector<1x43x64xf32> to vector<43x64xf32>
      %28 = arith.truncf %27 : vector<43x64xf32> to vector<43x64xbf16>
      %c2_19 = arith.constant 2 : index
      %c0_20 = arith.constant 0 : index
      %c0_21 = arith.constant 0 : index
      %29 = vector.load %arg3[%c2_19, %c0_20, %c0_21] : memref<9x64x64xbf16, #tpu.memory_space<vmem>>, vector<1x64x64xbf16>
      %30 = vector.shape_cast %29 : vector<1x64x64xbf16> to vector<64x64xbf16>
      %cst_22 = arith.constant dense<0.000000e+00> : vector<43x64xf32>
      %31 = tpu.matmul %28, %30, %cst_22 {dimension_numbers = #tpu.dot_dimension_numbers<[1], [0], [0], [1], [0, 0, 1, 1], [], []>} : vector<43x64xbf16>, vector<64x64xbf16>, vector<43x64xf32> -> vector<43x64xf32>
      %32 = arith.addf %25, %31 : vector<43x64xf32>
      %c0_23 = arith.constant 0 : index
      %c7 = arith.constant 7 : index
      %c0_24 = arith.constant 0 : index
      %33 = vector.load %arg2[%c0_23, %c7, %c0_24] : memref<1x64x64xf32, #tpu.memory_space<vmem>>, vector<1x43x64xf32>
      %34 = vector.shape_cast %33 : vector<1x43x64xf32> to vector<43x64xf32>
      %35 = arith.truncf %34 : vector<43x64xf32> to vector<43x64xbf16>
      %c3 = arith.constant 3 : index
      %c0_25 = arith.constant 0 : index
      %c0_26 = arith.constant 0 : index
      %36 = vector.load %arg3[%c3, %c0_25, %c0_26] : memref<9x64x64xbf16, #tpu.memory_space<vmem>>, vector<1x64x64xbf16>
      %37 = vector.shape_cast %36 : vector<1x64x64xbf16> to vector<64x64xbf16>
      %cst_27 = arith.constant dense<0.000000e+00> : vector<43x64xf32>
      %38 = tpu.matmul %35, %37, %cst_27 {dimension_numbers = #tpu.dot_dimension_numbers<[1], [0], [0], [1], [0, 0, 1, 1], [], []>} : vector<43x64xbf16>, vector<64x64xbf16>, vector<43x64xf32> -> vector<43x64xf32>
      %39 = arith.addf %32, %38 : vector<43x64xf32>
      %c0_28 = arith.constant 0 : index
      %c8 = arith.constant 8 : index
      %c0_29 = arith.constant 0 : index
      %40 = vector.load %arg2[%c0_28, %c8, %c0_29] : memref<1x64x64xf32, #tpu.memory_space<vmem>>, vector<1x43x64xf32>
      %41 = vector.shape_cast %40 : vector<1x43x64xf32> to vector<43x64xf32>
      %42 = arith.truncf %41 : vector<43x64xf32> to vector<43x64xbf16>
      %c4 = arith.constant 4 : index
      %c0_30 = arith.constant 0 : index
      %c0_31 = arith.constant 0 : index
      %43 = vector.load %arg3[%c4, %c0_30, %c0_31] : memref<9x64x64xbf16, #tpu.memory_space<vmem>>, vector<1x64x64xbf16>
      %44 = vector.shape_cast %43 : vector<1x64x64xbf16> to vector<64x64xbf16>
      %cst_32 = arith.constant dense<0.000000e+00> : vector<43x64xf32>
      %45 = tpu.matmul %42, %44, %cst_32 {dimension_numbers = #tpu.dot_dimension_numbers<[1], [0], [0], [1], [0, 0, 1, 1], [], []>} : vector<43x64xbf16>, vector<64x64xbf16>, vector<43x64xf32> -> vector<43x64xf32>
      %46 = arith.addf %39, %45 : vector<43x64xf32>
      %c0_33 = arith.constant 0 : index
      %c9 = arith.constant 9 : index
      %c0_34 = arith.constant 0 : index
      %47 = vector.load %arg2[%c0_33, %c9, %c0_34] : memref<1x64x64xf32, #tpu.memory_space<vmem>>, vector<1x43x64xf32>
      %48 = vector.shape_cast %47 : vector<1x43x64xf32> to vector<43x64xf32>
      %49 = arith.truncf %48 : vector<43x64xf32> to vector<43x64xbf16>
      %c5 = arith.constant 5 : index
      %c0_35 = arith.constant 0 : index
      %c0_36 = arith.constant 0 : index
      %50 = vector.load %arg3[%c5, %c0_35, %c0_36] : memref<9x64x64xbf16, #tpu.memory_space<vmem>>, vector<1x64x64xbf16>
      %51 = vector.shape_cast %50 : vector<1x64x64xbf16> to vector<64x64xbf16>
      %cst_37 = arith.constant dense<0.000000e+00> : vector<43x64xf32>
      %52 = tpu.matmul %49, %51, %cst_37 {dimension_numbers = #tpu.dot_dimension_numbers<[1], [0], [0], [1], [0, 0, 1, 1], [], []>} : vector<43x64xbf16>, vector<64x64xbf16>, vector<43x64xf32> -> vector<43x64xf32>
      %53 = arith.addf %46, %52 : vector<43x64xf32>
      %c0_38 = arith.constant 0 : index
      %c14 = arith.constant 14 : index
      %c0_39 = arith.constant 0 : index
      %54 = vector.load %arg2[%c0_38, %c14, %c0_39] : memref<1x64x64xf32, #tpu.memory_space<vmem>>, vector<1x43x64xf32>
      %55 = vector.shape_cast %54 : vector<1x43x64xf32> to vector<43x64xf32>
      %56 = arith.truncf %55 : vector<43x64xf32> to vector<43x64xbf16>
      %c6 = arith.constant 6 : index
      %c0_40 = arith.constant 0 : index
      %c0_41 = arith.constant 0 : index
      %57 = vector.load %arg3[%c6, %c0_40, %c0_41] : memref<9x64x64xbf16, #tpu.memory_space<vmem>>, vector<1x64x64xbf16>
      %58 = vector.shape_cast %57 : vector<1x64x64xbf16> to vector<64x64xbf16>
      %cst_42 = arith.constant dense<0.000000e+00> : vector<43x64xf32>
      %59 = tpu.matmul %56, %58, %cst_42 {dimension_numbers = #tpu.dot_dimension_numbers<[1], [0], [0], [1], [0, 0, 1, 1], [], []>} : vector<43x64xbf16>, vector<64x64xbf16>, vector<43x64xf32> -> vector<43x64xf32>
      %60 = arith.addf %53, %59 : vector<43x64xf32>
      %c0_43 = arith.constant 0 : index
      %c15 = arith.constant 15 : index
      %c0_44 = arith.constant 0 : index
      %61 = vector.load %arg2[%c0_43, %c15, %c0_44] : memref<1x64x64xf32, #tpu.memory_space<vmem>>, vector<1x43x64xf32>
      %62 = vector.shape_cast %61 : vector<1x43x64xf32> to vector<43x64xf32>
      %63 = arith.truncf %62 : vector<43x64xf32> to vector<43x64xbf16>
      %c7_45 = arith.constant 7 : index
      %c0_46 = arith.constant 0 : index
      %c0_47 = arith.constant 0 : index
      %64 = vector.load %arg3[%c7_45, %c0_46, %c0_47] : memref<9x64x64xbf16, #tpu.memory_space<vmem>>, vector<1x64x64xbf16>
      %65 = vector.shape_cast %64 : vector<1x64x64xbf16> to vector<64x64xbf16>
      %cst_48 = arith.constant dense<0.000000e+00> : vector<43x64xf32>
      %66 = tpu.matmul %63, %65, %cst_48 {dimension_numbers = #tpu.dot_dimension_numbers<[1], [0], [0], [1], [0, 0, 1, 1], [], []>} : vector<43x64xbf16>, vector<64x64xbf16>, vector<43x64xf32> -> vector<43x64xf32>
      %67 = arith.addf %60, %66 : vector<43x64xf32>
      %c0_49 = arith.constant 0 : index
      %c16 = arith.constant 16 : index
      %c0_50 = arith.constant 0 : index
      %68 = vector.load %arg2[%c0_49, %c16, %c0_50] : memref<1x64x64xf32, #tpu.memory_space<vmem>>, vector<1x43x64xf32>
      %69 = vector.shape_cast %68 : vector<1x43x64xf32> to vector<43x64xf32>
      %70 = arith.truncf %69 : vector<43x64xf32> to vector<43x64xbf16>
      %c8_51 = arith.constant 8 : index
      %c0_52 = arith.constant 0 : index
      %c0_53 = arith.constant 0 : index
      %71 = vector.load %arg3[%c8_51, %c0_52, %c0_53] : memref<9x64x64xbf16, #tpu.memory_space<vmem>>, vector<1x64x64xbf16>
      %72 = vector.shape_cast %71 : vector<1x64x64xbf16> to vector<64x64xbf16>
      %cst_54 = arith.constant dense<0.000000e+00> : vector<43x64xf32>
      %73 = tpu.matmul %70, %72, %cst_54 {dimension_numbers = #tpu.dot_dimension_numbers<[1], [0], [0], [1], [0, 0, 1, 1], [], []>} : vector<43x64xbf16>, vector<64x64xbf16>, vector<43x64xf32> -> vector<43x64xf32>
      %74 = arith.addf %67, %73 : vector<43x64xf32>
      %75 = arith.index_cast %arg1 : i32 to index
      %c0_55 = arith.constant 0 : index
      %c0_56 = arith.constant 0 : index
      %76 = vector.load %arg8[%75, %c0_55, %c0_56] : memref<2x43x64xf32, #tpu.memory_space<vmem>>, vector<1x43x64xf32>
      %77 = vector.shape_cast %76 : vector<1x43x64xf32> to vector<43x64xf32>
      %78 = vector.shape_cast %74 : vector<43x64xf32> to vector<1x43x64xf32>
      tpu.vector_store %arg8[%75, %c0_55, %c0_56], %78 {strides = array<i32>} : memref<2x43x64xf32, #tpu.memory_space<vmem>>, vector<1x43x64xf32>,
      %79 = tpu.iota {dimensions = array<i32: 0>} : vector<43x1xi32>
      %c7_i32 = arith.constant 7 : i32
      %c0_i32_57 = arith.constant 0 : i32
      %80 = arith.cmpi eq, %c7_i32, %c0_i32_57 : i32
      %c1_i32_58 = arith.constant 1 : i32
      %81 = arith.select %80, %c1_i32_58, %c7_i32 : i32
      %82 = vector.broadcast %81 : i32 to vector<43x1xi32>
      %83 = arith.remsi %79, %82 : vector<43x1xi32>
      %c0_i32_59 = arith.constant 0 : i32
      %84 = vector.broadcast %c0_i32_59 : i32 to vector<43x1xi32>
      %85 = arith.cmpi ne, %83, %84 : vector<43x1xi32>
      %c0_i32_60 = arith.constant 0 : i32
      %86 = vector.broadcast %c0_i32_60 : i32 to vector<43x1xi32>
      %87 = arith.cmpi slt, %83, %86 : vector<43x1xi32>
      %c0_i32_61 = arith.constant 0 : i32
      %88 = arith.cmpi slt, %81, %c0_i32_61 : i32
      %89 = vector.broadcast %88 : i1 to vector<43x1xi1>
      %90 = vector.broadcast %89 : vector<43x1xi1> to vector<43x1xi1>
      %91 = arith.xori %87, %90 : vector<43x1xi1>
      %92 = arith.andi %91, %85 : vector<43x1xi1>
      %93 = vector.broadcast %81 : i32 to vector<43x1xi32>
      %94 = arith.addi %83, %93 : vector<43x1xi32>
      %95 = arith.select %92, %94, %83 : vector<43x1xi1>, vector<43x1xi32>
      %c5_i32 = arith.constant 5 : i32
      %96 = vector.broadcast %c5_i32 : i32 to vector<43x1xi32>
      %97 = arith.cmpi slt, %95, %96 : vector<43x1xi32>
      %c35_i32 = arith.constant 35 : i32
      %98 = vector.broadcast %c35_i32 : i32 to vector<43x1xi32>
      %99 = arith.cmpi slt, %79, %98 : vector<43x1xi32>
      %100 = arith.andi %97, %99 : vector<43x1xi1>
      %cst_62 = arith.constant 0.000000e+00 : f32
      %101 = vector.shape_cast %100 : vector<43x1xi1> to vector<43x1xi1>
      %102 = vector.broadcast %101 : vector<43x1xi1> to vector<43x64xi1>
      %103 = vector.broadcast %cst_62 : f32 to vector<43x64xf32>
      %104 = arith.select %102, %74, %103 : vector<43x64xi1>, vector<43x64xf32>
      %c0_63 = arith.constant 0 : index
      %c0_64 = arith.constant 0 : index
      %105 = vector.load %arg9[%c0_63, %c0_64] : memref<1x64xf32, #tpu.memory_space<vmem>>, vector<1x64xf32>
      %cst_65 = arith.constant dense<0.000000e+00> : vector<64xf32>
      %106 = vector.multi_reduction <add>, %104, %cst_65 [0] : vector<43x64xf32> to vector<64xf32>
      %107 = vector.shape_cast %106 : vector<64xf32> to vector<1x64xf32>
      %108 = arith.addf %105, %107 : vector<1x64xf32>
      %c0_66 = arith.constant 0 : index
      %c0_67 = arith.constant 0 : index
      %109 = vector.load %arg9[%c0_66, %c0_67] : memref<1x64xf32, #tpu.memory_space<vmem>>, vector<1x64xf32>
      tpu.vector_store %arg9[%c0_66, %c0_67], %108 {strides = array<i32>} : memref<1x64xf32, #tpu.memory_space<vmem>>, vector<1x64xf32>,
      %c0_68 = arith.constant 0 : index
      %c0_69 = arith.constant 0 : index
      %110 = vector.load %arg10[%c0_68, %c0_69] : memref<1x64xf32, #tpu.memory_space<vmem>>, vector<1x64xf32>
      %111 = arith.mulf %104, %104 : vector<43x64xf32>
      %cst_70 = arith.constant dense<0.000000e+00> : vector<64xf32>
      %112 = vector.multi_reduction <add>, %111, %cst_70 [0] : vector<43x64xf32> to vector<64xf32>
      %113 = vector.shape_cast %112 : vector<64xf32> to vector<1x64xf32>
      %114 = arith.addf %110, %113 : vector<1x64xf32>
      %c0_71 = arith.constant 0 : index
      %c0_72 = arith.constant 0 : index
      %115 = vector.load %arg10[%c0_71, %c0_72] : memref<1x64xf32, #tpu.memory_space<vmem>>, vector<1x64xf32>
      tpu.vector_store %arg10[%c0_71, %c0_72], %114 {strides = array<i32>} : memref<1x64xf32, #tpu.memory_space<vmem>>, vector<1x64xf32>,
    } else {
    }
    %c1_i32 = arith.constant 1 : i32
    %8 = arith.cmpi eq, %arg0, %c1_i32 : i32
    %9 = arith.extui %8 : i1 to i32
    %c0_i32_4 = arith.constant 0 : i32
    %10 = arith.cmpi ne, %9, %c0_i32_4 : i32
    scf.if %10 {
      %c0 = arith.constant 0 : index
      %c0_5 = arith.constant 0 : index
      %11 = vector.load %arg9[%c0, %c0_5] : memref<1x64xf32, #tpu.memory_space<vmem>>, vector<1x64xf32>
      %cst = arith.constant 2.000000e-02 : f32
      %12 = vector.broadcast %cst : f32 to vector<1x64xf32>
      %13 = arith.mulf %11, %12 : vector<1x64xf32>
      %c0_6 = arith.constant 0 : index
      %c0_7 = arith.constant 0 : index
      %14 = vector.load %arg10[%c0_6, %c0_7] : memref<1x64xf32, #tpu.memory_space<vmem>>, vector<1x64xf32>
      %cst_8 = arith.constant 2.000000e-02 : f32
      %15 = vector.broadcast %cst_8 : f32 to vector<1x64xf32>
      %16 = arith.mulf %14, %15 : vector<1x64xf32>
      %17 = arith.mulf %13, %13 : vector<1x64xf32>
      %18 = arith.subf %16, %17 : vector<1x64xf32>
      %cst_9 = arith.constant 0.000000e+00 : f32
      %19 = vector.broadcast %cst_9 : f32 to vector<1x64xf32>
      %20 = arith.maximumf %18, %19 : vector<1x64xf32>
      %cst_10 = arith.constant 9.99999974E-6 : f32
      %21 = vector.broadcast %cst_10 : f32 to vector<1x64xf32>
      %22 = arith.addf %20, %21 : vector<1x64xf32>
      %23 = math.rsqrt %22 : vector<1x64xf32>
      %c0_11 = arith.constant 0 : index
      %c0_12 = arith.constant 0 : index
      %24 = vector.load %arg4[%c0_11, %c0_12] : memref<1x64xf32, #tpu.memory_space<vmem>>, vector<1x64xf32>
      %25 = arith.mulf %24, %23 : vector<1x64xf32>
      %c0_13 = arith.constant 0 : index
      %c0_14 = arith.constant 0 : index
      %26 = vector.load %arg5[%c0_13, %c0_14] : memref<1x64xf32, #tpu.memory_space<vmem>>, vector<1x64xf32>
      %27 = arith.mulf %13, %25 : vector<1x64xf32>
      %28 = arith.subf %26, %27 : vector<1x64xf32>
      %29 = arith.index_cast %arg1 : i32 to index
      %c0_15 = arith.constant 0 : index
      %c0_16 = arith.constant 0 : index
      %30 = vector.load %arg8[%29, %c0_15, %c0_16] : memref<2x43x64xf32, #tpu.memory_space<vmem>>, vector<1x43x64xf32>
      %31 = vector.shape_cast %30 : vector<1x43x64xf32> to vector<43x64xf32>
      %32 = vector.broadcast %25 : vector<1x64xf32> to vector<43x64xf32>
      %33 = arith.mulf %31, %32 : vector<43x64xf32>
      %34 = vector.broadcast %28 : vector<1x64xf32> to vector<43x64xf32>
      %35 = arith.addf %33, %34 : vector<43x64xf32>
      %cst_17 = arith.constant 0.000000e+00 : f32
      %36 = vector.broadcast %cst_17 : f32 to vector<43x64xf32>
      %37 = arith.maximumf %35, %36 : vector<43x64xf32>
      %38 = vector.extract_strided_slice %37 {offsets = [0, 0], sizes = [35, 64], strides = [1, 1]} : vector<43x64xf32> to vector<35x64xf32>
      %39 = vector.extract_strided_slice %37 {offsets = [1, 0], sizes = [35, 64], strides = [1, 1]} : vector<43x64xf32> to vector<35x64xf32>
      %40 = arith.maximumf %38, %39 : vector<35x64xf32>
      %41 = vector.extract_strided_slice %37 {offsets = [7, 0], sizes = [35, 64], strides = [1, 1]} : vector<43x64xf32> to vector<35x64xf32>
      %42 = vector.extract_strided_slice %37 {offsets = [8, 0], sizes = [35, 64], strides = [1, 1]} : vector<43x64xf32> to vector<35x64xf32>
      %43 = arith.maximumf %41, %42 : vector<35x64xf32>
      %44 = arith.maximumf %40, %43 : vector<35x64xf32>
      %c0_18 = arith.constant 0 : index
      %c0_19 = arith.constant 0 : index
      %45 = vector.load %arg6[%c0_18, %c0_19] : memref<4x35xf32, #tpu.memory_space<vmem>>, vector<4x35xf32>
      %cst_20 = arith.constant dense<0.000000e+00> : vector<4x64xf32>
      %46 = tpu.matmul %45, %44, %cst_20 {dimension_numbers = #tpu.dot_dimension_numbers<[1], [0], [0], [1], [0, 0, 1, 1], [], []>} : vector<4x35xf32>, vector<35x64xf32>, vector<4x64xf32> -> vector<4x64xf32>
      %c0_21 = arith.constant 0 : index
      %c0_22 = arith.constant 0 : index
      %c0_23 = arith.constant 0 : index
      %47 = vector.load %arg7[%c0_21, %c0_22, %c0_23] : memref<1x4x64xf32, #tpu.memory_space<vmem>>, vector<1x4x64xf32>
      %48 = vector.shape_cast %47 : vector<1x4x64xf32> to vector<4x64xf32>
      %49 = vector.shape_cast %46 : vector<4x64xf32> to vector<1x4x64xf32>
      tpu.vector_store %arg7[%c0_21, %c0_22, %c0_23], %49 {strides = array<i32>} : memref<1x4x64xf32, #tpu.memory_space<vmem>>, vector<1x4x64xf32>,
    } else {
    }
    return
  }
  func.func @transform_0(%arg0: i32, %arg1: i32) -> (i32, i32, i32) {
    %c1_i32 = arith.constant 1 : i32
    %0 = arith.subi %c1_i32, %arg0 : i32
    %1 = arith.muli %0, %arg1 : i32
    %c0_i32 = arith.constant 0 : i32
    %c0_i32_0 = arith.constant 0 : i32
    %c0_i32_1 = arith.constant 0 : i32
    return %1, %c0_i32, %c0_i32_0 : i32, i32, i32
  }
  func.func @transform_1(%arg0: i32, %arg1: i32) -> (i32, i32, i32) {
    %c0_i32 = arith.constant 0 : i32
    %c0_i32_0 = arith.constant 0 : i32
    %c0_i32_1 = arith.constant 0 : i32
    %c0_i32_2 = arith.constant 0 : i32
    return %c0_i32, %c0_i32_0, %c0_i32_1 : i32, i32, i32
  }
  func.func @transform_2(%arg0: i32, %arg1: i32) -> (i32, i32) {
    %c0_i32 = arith.constant 0 : i32
    %c0_i32_0 = arith.constant 0 : i32
    %c0_i32_1 = arith.constant 0 : i32
    return %c0_i32, %c0_i32_0 : i32, i32
  }
  func.func @transform_3(%arg0: i32, %arg1: i32) -> (i32, i32) {
    %c0_i32 = arith.constant 0 : i32
    %c0_i32_0 = arith.constant 0 : i32
    %c0_i32_1 = arith.constant 0 : i32
    return %c0_i32, %c0_i32_0 : i32, i32
  }
  func.func @transform_4(%arg0: i32, %arg1: i32) -> (i32, i32) {
    %c0_i32 = arith.constant 0 : i32
    %c0_i32_0 = arith.constant 0 : i32
    %c0_i32_1 = arith.constant 0 : i32
    return %c0_i32, %c0_i32_0 : i32, i32
  }
  func.func @transform_5(%arg0: i32, %arg1: i32) -> (i32, i32, i32) {
    %0 = arith.muli %arg0, %arg1 : i32
    %c0_i32 = arith.constant 0 : i32
    %c0_i32_0 = arith.constant 0 : i32
    %c0_i32_1 = arith.constant 0 : i32
    return %0, %c0_i32, %c0_i32_0 : i32, i32, i32
  }
}

module attributes {stable_mosaic.version = 11 : i64} {
  func.func @kernel(%arg0: i32, %arg1: i32, %arg2: memref<1x24x64xf32, #tpu.memory_space<vmem>>, %arg3: memref<9x64x64xbf16, #tpu.memory_space<vmem>>, %arg4: memref<1x64xf32, #tpu.memory_space<vmem>>, %arg5: memref<1x64xf32, #tpu.memory_space<vmem>>, %arg6: memref<4x8xf32, #tpu.memory_space<vmem>>, %arg7: memref<1x4x64xf32, #tpu.memory_space<vmem>>, %arg8: memref<2x8x64xf32, #tpu.memory_space<vmem>>, %arg9: memref<1x64xf32, #tpu.memory_space<vmem>>, %arg10: memref<1x64xf32, #tpu.memory_space<vmem>>) attributes {dimension_semantics = [#tpu.dimension_semantics<arbitrary>, #tpu.dimension_semantics<arbitrary>], iteration_bounds = array<i64: 2, 2>, scalar_prefetch = 0 : i64, scratch_operands = 3 : i64, tpu.core_type = #tpu.core_type<tc>, window_params = [{transform_indices = @transform_0, window_bounds = array<i64: 1, 24, 64>}, {pipeline_mode = #tpu.pipeline_mode<synchronous>, transform_indices = @transform_1, window_bounds = array<i64: 9, 64, 64>}, {pipeline_mode = #tpu.pipeline_mode<synchronous>, transform_indices = @transform_2, window_bounds = array<i64: 1, 64>}, {pipeline_mode = #tpu.pipeline_mode<synchronous>, transform_indices = @transform_3, window_bounds = array<i64: 1, 64>}, {pipeline_mode = #tpu.pipeline_mode<synchronous>, transform_indices = @transform_4, window_bounds = array<i64: 4, 8>}, {transform_indices = @transform_5, window_bounds = array<i64: 1, 4, 64>}]} {
    %c0_i32 = arith.constant 0 : i32
    %0 = arith.cmpi eq, %arg0, %c0_i32 : i32
    %c0_i32_0 = arith.constant 0 : i32
    %1 = arith.cmpi eq, %arg1, %c0_i32_0 : i32
    %2 = arith.andi %0, %1 : i1
    %3 = arith.extui %2 : i1 to i32
    %c0_i32_1 = arith.constant 0 : i32
    %4 = arith.cmpi ne, %3, %c0_i32_1 : i32
    scf.if %4 {
      %cst = arith.constant 0.000000e+00 : f32
      %11 = vector.broadcast %cst : f32 to vector<1x64xf32>
      %c0 = arith.constant 0 : index
      %c0_5 = arith.constant 0 : index
      %12 = vector.load %arg9[%c0, %c0_5] : memref<1x64xf32, #tpu.memory_space<vmem>>, vector<1x64xf32>
      tpu.vector_store %arg9[%c0, %c0_5], %11 {strides = array<i32>} : memref<1x64xf32, #tpu.memory_space<vmem>>, vector<1x64xf32>,
      %cst_6 = arith.constant 0.000000e+00 : f32
      %13 = vector.broadcast %cst_6 : f32 to vector<1x64xf32>
      %c0_7 = arith.constant 0 : index
      %c0_8 = arith.constant 0 : index
      %14 = vector.load %arg10[%c0_7, %c0_8] : memref<1x64xf32, #tpu.memory_space<vmem>>, vector<1x64xf32>
      tpu.vector_store %arg10[%c0_7, %c0_8], %13 {strides = array<i32>} : memref<1x64xf32, #tpu.memory_space<vmem>>, vector<1x64xf32>,
    } else {
    }
    %c0_i32_2 = arith.constant 0 : i32
    %5 = arith.cmpi eq, %arg0, %c0_i32_2 : i32
    %6 = arith.extui %5 : i1 to i32
    %c0_i32_3 = arith.constant 0 : i32
    %7 = arith.cmpi ne, %6, %c0_i32_3 : i32
    scf.if %7 {
      %cst = arith.constant 0.000000e+00 : f32
      %11 = vector.broadcast %cst : f32 to vector<8x64xf32>
      %c0 = arith.constant 0 : index
      %c0_5 = arith.constant 0 : index
      %c0_6 = arith.constant 0 : index
      %12 = vector.load %arg2[%c0, %c0_5, %c0_6] : memref<1x24x64xf32, #tpu.memory_space<vmem>>, vector<1x8x64xf32>
      %13 = vector.shape_cast %12 : vector<1x8x64xf32> to vector<8x64xf32>
      %14 = arith.truncf %13 : vector<8x64xf32> to vector<8x64xbf16>
      %c0_7 = arith.constant 0 : index
      %c0_8 = arith.constant 0 : index
      %c0_9 = arith.constant 0 : index
      %15 = vector.load %arg3[%c0_7, %c0_8, %c0_9] : memref<9x64x64xbf16, #tpu.memory_space<vmem>>, vector<1x64x64xbf16>
      %16 = vector.shape_cast %15 : vector<1x64x64xbf16> to vector<64x64xbf16>
      %cst_10 = arith.constant dense<0.000000e+00> : vector<8x64xf32>
      %17 = tpu.matmul %14, %16, %cst_10 {dimension_numbers = #tpu.dot_dimension_numbers<[1], [0], [0], [1], [0, 0, 1, 1], [], []>} : vector<8x64xbf16>, vector<64x64xbf16>, vector<8x64xf32> -> vector<8x64xf32>
      %18 = arith.addf %11, %17 : vector<8x64xf32>
      %c0_11 = arith.constant 0 : index
      %c1 = arith.constant 1 : index
      %c0_12 = arith.constant 0 : index
      %19 = vector.load %arg2[%c0_11, %c1, %c0_12] : memref<1x24x64xf32, #tpu.memory_space<vmem>>, vector<1x8x64xf32>
      %20 = vector.shape_cast %19 : vector<1x8x64xf32> to vector<8x64xf32>
      %21 = arith.truncf %20 : vector<8x64xf32> to vector<8x64xbf16>
      %c1_13 = arith.constant 1 : index
      %c0_14 = arith.constant 0 : index
      %c0_15 = arith.constant 0 : index
      %22 = vector.load %arg3[%c1_13, %c0_14, %c0_15] : memref<9x64x64xbf16, #tpu.memory_space<vmem>>, vector<1x64x64xbf16>
      %23 = vector.shape_cast %22 : vector<1x64x64xbf16> to vector<64x64xbf16>
      %cst_16 = arith.constant dense<0.000000e+00> : vector<8x64xf32>
      %24 = tpu.matmul %21, %23, %cst_16 {dimension_numbers = #tpu.dot_dimension_numbers<[1], [0], [0], [1], [0, 0, 1, 1], [], []>} : vector<8x64xbf16>, vector<64x64xbf16>, vector<8x64xf32> -> vector<8x64xf32>
      %25 = arith.addf %18, %24 : vector<8x64xf32>
      %c0_17 = arith.constant 0 : index
      %c2 = arith.constant 2 : index
      %c0_18 = arith.constant 0 : index
      %26 = vector.load %arg2[%c0_17, %c2, %c0_18] : memref<1x24x64xf32, #tpu.memory_space<vmem>>, vector<1x8x64xf32>
      %27 = vector.shape_cast %26 : vector<1x8x64xf32> to vector<8x64xf32>
      %28 = arith.truncf %27 : vector<8x64xf32> to vector<8x64xbf16>
      %c2_19 = arith.constant 2 : index
      %c0_20 = arith.constant 0 : index
      %c0_21 = arith.constant 0 : index
      %29 = vector.load %arg3[%c2_19, %c0_20, %c0_21] : memref<9x64x64xbf16, #tpu.memory_space<vmem>>, vector<1x64x64xbf16>
      %30 = vector.shape_cast %29 : vector<1x64x64xbf16> to vector<64x64xbf16>
      %cst_22 = arith.constant dense<0.000000e+00> : vector<8x64xf32>
      %31 = tpu.matmul %28, %30, %cst_22 {dimension_numbers = #tpu.dot_dimension_numbers<[1], [0], [0], [1], [0, 0, 1, 1], [], []>} : vector<8x64xbf16>, vector<64x64xbf16>, vector<8x64xf32> -> vector<8x64xf32>
      %32 = arith.addf %25, %31 : vector<8x64xf32>
      %c0_23 = arith.constant 0 : index
      %c4 = arith.constant 4 : index
      %c0_24 = arith.constant 0 : index
      %33 = vector.load %arg2[%c0_23, %c4, %c0_24] : memref<1x24x64xf32, #tpu.memory_space<vmem>>, vector<1x8x64xf32>
      %34 = vector.shape_cast %33 : vector<1x8x64xf32> to vector<8x64xf32>
      %35 = arith.truncf %34 : vector<8x64xf32> to vector<8x64xbf16>
      %c3 = arith.constant 3 : index
      %c0_25 = arith.constant 0 : index
      %c0_26 = arith.constant 0 : index
      %36 = vector.load %arg3[%c3, %c0_25, %c0_26] : memref<9x64x64xbf16, #tpu.memory_space<vmem>>, vector<1x64x64xbf16>
      %37 = vector.shape_cast %36 : vector<1x64x64xbf16> to vector<64x64xbf16>
      %cst_27 = arith.constant dense<0.000000e+00> : vector<8x64xf32>
      %38 = tpu.matmul %35, %37, %cst_27 {dimension_numbers = #tpu.dot_dimension_numbers<[1], [0], [0], [1], [0, 0, 1, 1], [], []>} : vector<8x64xbf16>, vector<64x64xbf16>, vector<8x64xf32> -> vector<8x64xf32>
      %39 = arith.addf %32, %38 : vector<8x64xf32>
      %c0_28 = arith.constant 0 : index
      %c5 = arith.constant 5 : index
      %c0_29 = arith.constant 0 : index
      %40 = vector.load %arg2[%c0_28, %c5, %c0_29] : memref<1x24x64xf32, #tpu.memory_space<vmem>>, vector<1x8x64xf32>
      %41 = vector.shape_cast %40 : vector<1x8x64xf32> to vector<8x64xf32>
      %42 = arith.truncf %41 : vector<8x64xf32> to vector<8x64xbf16>
      %c4_30 = arith.constant 4 : index
      %c0_31 = arith.constant 0 : index
      %c0_32 = arith.constant 0 : index
      %43 = vector.load %arg3[%c4_30, %c0_31, %c0_32] : memref<9x64x64xbf16, #tpu.memory_space<vmem>>, vector<1x64x64xbf16>
      %44 = vector.shape_cast %43 : vector<1x64x64xbf16> to vector<64x64xbf16>
      %cst_33 = arith.constant dense<0.000000e+00> : vector<8x64xf32>
      %45 = tpu.matmul %42, %44, %cst_33 {dimension_numbers = #tpu.dot_dimension_numbers<[1], [0], [0], [1], [0, 0, 1, 1], [], []>} : vector<8x64xbf16>, vector<64x64xbf16>, vector<8x64xf32> -> vector<8x64xf32>
      %46 = arith.addf %39, %45 : vector<8x64xf32>
      %c0_34 = arith.constant 0 : index
      %c6 = arith.constant 6 : index
      %c0_35 = arith.constant 0 : index
      %47 = vector.load %arg2[%c0_34, %c6, %c0_35] : memref<1x24x64xf32, #tpu.memory_space<vmem>>, vector<1x8x64xf32>
      %48 = vector.shape_cast %47 : vector<1x8x64xf32> to vector<8x64xf32>
      %49 = arith.truncf %48 : vector<8x64xf32> to vector<8x64xbf16>
      %c5_36 = arith.constant 5 : index
      %c0_37 = arith.constant 0 : index
      %c0_38 = arith.constant 0 : index
      %50 = vector.load %arg3[%c5_36, %c0_37, %c0_38] : memref<9x64x64xbf16, #tpu.memory_space<vmem>>, vector<1x64x64xbf16>
      %51 = vector.shape_cast %50 : vector<1x64x64xbf16> to vector<64x64xbf16>
      %cst_39 = arith.constant dense<0.000000e+00> : vector<8x64xf32>
      %52 = tpu.matmul %49, %51, %cst_39 {dimension_numbers = #tpu.dot_dimension_numbers<[1], [0], [0], [1], [0, 0, 1, 1], [], []>} : vector<8x64xbf16>, vector<64x64xbf16>, vector<8x64xf32> -> vector<8x64xf32>
      %53 = arith.addf %46, %52 : vector<8x64xf32>
      %c0_40 = arith.constant 0 : index
      %c8 = arith.constant 8 : index
      %c0_41 = arith.constant 0 : index
      %54 = vector.load %arg2[%c0_40, %c8, %c0_41] : memref<1x24x64xf32, #tpu.memory_space<vmem>>, vector<1x8x64xf32>
      %55 = vector.shape_cast %54 : vector<1x8x64xf32> to vector<8x64xf32>
      %56 = arith.truncf %55 : vector<8x64xf32> to vector<8x64xbf16>
      %c6_42 = arith.constant 6 : index
      %c0_43 = arith.constant 0 : index
      %c0_44 = arith.constant 0 : index
      %57 = vector.load %arg3[%c6_42, %c0_43, %c0_44] : memref<9x64x64xbf16, #tpu.memory_space<vmem>>, vector<1x64x64xbf16>
      %58 = vector.shape_cast %57 : vector<1x64x64xbf16> to vector<64x64xbf16>
      %cst_45 = arith.constant dense<0.000000e+00> : vector<8x64xf32>
      %59 = tpu.matmul %56, %58, %cst_45 {dimension_numbers = #tpu.dot_dimension_numbers<[1], [0], [0], [1], [0, 0, 1, 1], [], []>} : vector<8x64xbf16>, vector<64x64xbf16>, vector<8x64xf32> -> vector<8x64xf32>
      %60 = arith.addf %53, %59 : vector<8x64xf32>
      %c0_46 = arith.constant 0 : index
      %c9 = arith.constant 9 : index
      %c0_47 = arith.constant 0 : index
      %61 = vector.load %arg2[%c0_46, %c9, %c0_47] : memref<1x24x64xf32, #tpu.memory_space<vmem>>, vector<1x8x64xf32>
      %62 = vector.shape_cast %61 : vector<1x8x64xf32> to vector<8x64xf32>
      %63 = arith.truncf %62 : vector<8x64xf32> to vector<8x64xbf16>
      %c7 = arith.constant 7 : index
      %c0_48 = arith.constant 0 : index
      %c0_49 = arith.constant 0 : index
      %64 = vector.load %arg3[%c7, %c0_48, %c0_49] : memref<9x64x64xbf16, #tpu.memory_space<vmem>>, vector<1x64x64xbf16>
      %65 = vector.shape_cast %64 : vector<1x64x64xbf16> to vector<64x64xbf16>
      %cst_50 = arith.constant dense<0.000000e+00> : vector<8x64xf32>
      %66 = tpu.matmul %63, %65, %cst_50 {dimension_numbers = #tpu.dot_dimension_numbers<[1], [0], [0], [1], [0, 0, 1, 1], [], []>} : vector<8x64xbf16>, vector<64x64xbf16>, vector<8x64xf32> -> vector<8x64xf32>
      %67 = arith.addf %60, %66 : vector<8x64xf32>
      %c0_51 = arith.constant 0 : index
      %c10 = arith.constant 10 : index
      %c0_52 = arith.constant 0 : index
      %68 = vector.load %arg2[%c0_51, %c10, %c0_52] : memref<1x24x64xf32, #tpu.memory_space<vmem>>, vector<1x8x64xf32>
      %69 = vector.shape_cast %68 : vector<1x8x64xf32> to vector<8x64xf32>
      %70 = arith.truncf %69 : vector<8x64xf32> to vector<8x64xbf16>
      %c8_53 = arith.constant 8 : index
      %c0_54 = arith.constant 0 : index
      %c0_55 = arith.constant 0 : index
      %71 = vector.load %arg3[%c8_53, %c0_54, %c0_55] : memref<9x64x64xbf16, #tpu.memory_space<vmem>>, vector<1x64x64xbf16>
      %72 = vector.shape_cast %71 : vector<1x64x64xbf16> to vector<64x64xbf16>
      %cst_56 = arith.constant dense<0.000000e+00> : vector<8x64xf32>
      %73 = tpu.matmul %70, %72, %cst_56 {dimension_numbers = #tpu.dot_dimension_numbers<[1], [0], [0], [1], [0, 0, 1, 1], [], []>} : vector<8x64xbf16>, vector<64x64xbf16>, vector<8x64xf32> -> vector<8x64xf32>
      %74 = arith.addf %67, %73 : vector<8x64xf32>
      %75 = arith.index_cast %arg1 : i32 to index
      %c0_57 = arith.constant 0 : index
      %c0_58 = arith.constant 0 : index
      %76 = vector.load %arg8[%75, %c0_57, %c0_58] : memref<2x8x64xf32, #tpu.memory_space<vmem>>, vector<1x8x64xf32>
      %77 = vector.shape_cast %76 : vector<1x8x64xf32> to vector<8x64xf32>
      %78 = vector.shape_cast %74 : vector<8x64xf32> to vector<1x8x64xf32>
      tpu.vector_store %arg8[%75, %c0_57, %c0_58], %78 {strides = array<i32>} : memref<2x8x64xf32, #tpu.memory_space<vmem>>, vector<1x8x64xf32>,
      %79 = tpu.iota {dimensions = array<i32: 0>} : vector<8x1xi32>
      %c4_i32 = arith.constant 4 : i32
      %c0_i32_59 = arith.constant 0 : i32
      %80 = arith.cmpi eq, %c4_i32, %c0_i32_59 : i32
      %c1_i32_60 = arith.constant 1 : i32
      %81 = arith.select %80, %c1_i32_60, %c4_i32 : i32
      %82 = vector.broadcast %81 : i32 to vector<8x1xi32>
      %83 = arith.remsi %79, %82 : vector<8x1xi32>
      %c0_i32_61 = arith.constant 0 : i32
      %84 = vector.broadcast %c0_i32_61 : i32 to vector<8x1xi32>
      %85 = arith.cmpi ne, %83, %84 : vector<8x1xi32>
      %c0_i32_62 = arith.constant 0 : i32
      %86 = vector.broadcast %c0_i32_62 : i32 to vector<8x1xi32>
      %87 = arith.cmpi slt, %83, %86 : vector<8x1xi32>
      %c0_i32_63 = arith.constant 0 : i32
      %88 = arith.cmpi slt, %81, %c0_i32_63 : i32
      %89 = vector.broadcast %88 : i1 to vector<8x1xi1>
      %90 = vector.broadcast %89 : vector<8x1xi1> to vector<8x1xi1>
      %91 = arith.xori %87, %90 : vector<8x1xi1>
      %92 = arith.andi %91, %85 : vector<8x1xi1>
      %93 = vector.broadcast %81 : i32 to vector<8x1xi32>
      %94 = arith.addi %83, %93 : vector<8x1xi32>
      %95 = arith.select %92, %94, %83 : vector<8x1xi1>, vector<8x1xi32>
      %c2_i32 = arith.constant 2 : i32
      %96 = vector.broadcast %c2_i32 : i32 to vector<8x1xi32>
      %97 = arith.cmpi slt, %95, %96 : vector<8x1xi32>
      %c8_i32 = arith.constant 8 : i32
      %98 = vector.broadcast %c8_i32 : i32 to vector<8x1xi32>
      %99 = arith.cmpi slt, %79, %98 : vector<8x1xi32>
      %100 = arith.andi %97, %99 : vector<8x1xi1>
      %cst_64 = arith.constant 0.000000e+00 : f32
      %101 = vector.shape_cast %100 : vector<8x1xi1> to vector<8x1xi1>
      %102 = vector.broadcast %101 : vector<8x1xi1> to vector<8x64xi1>
      %103 = vector.broadcast %cst_64 : f32 to vector<8x64xf32>
      %104 = arith.select %102, %74, %103 : vector<8x64xi1>, vector<8x64xf32>
      %c0_65 = arith.constant 0 : index
      %c0_66 = arith.constant 0 : index
      %105 = vector.load %arg9[%c0_65, %c0_66] : memref<1x64xf32, #tpu.memory_space<vmem>>, vector<1x64xf32>
      %cst_67 = arith.constant dense<0.000000e+00> : vector<64xf32>
      %106 = vector.multi_reduction <add>, %104, %cst_67 [0] : vector<8x64xf32> to vector<64xf32>
      %107 = vector.shape_cast %106 : vector<64xf32> to vector<1x64xf32>
      %108 = arith.addf %105, %107 : vector<1x64xf32>
      %c0_68 = arith.constant 0 : index
      %c0_69 = arith.constant 0 : index
      %109 = vector.load %arg9[%c0_68, %c0_69] : memref<1x64xf32, #tpu.memory_space<vmem>>, vector<1x64xf32>
      tpu.vector_store %arg9[%c0_68, %c0_69], %108 {strides = array<i32>} : memref<1x64xf32, #tpu.memory_space<vmem>>, vector<1x64xf32>,
      %c0_70 = arith.constant 0 : index
      %c0_71 = arith.constant 0 : index
      %110 = vector.load %arg10[%c0_70, %c0_71] : memref<1x64xf32, #tpu.memory_space<vmem>>, vector<1x64xf32>
      %111 = arith.mulf %104, %104 : vector<8x64xf32>
      %cst_72 = arith.constant dense<0.000000e+00> : vector<64xf32>
      %112 = vector.multi_reduction <add>, %111, %cst_72 [0] : vector<8x64xf32> to vector<64xf32>
      %113 = vector.shape_cast %112 : vector<64xf32> to vector<1x64xf32>
      %114 = arith.addf %110, %113 : vector<1x64xf32>
      %c0_73 = arith.constant 0 : index
      %c0_74 = arith.constant 0 : index
      %115 = vector.load %arg10[%c0_73, %c0_74] : memref<1x64xf32, #tpu.memory_space<vmem>>, vector<1x64xf32>
      tpu.vector_store %arg10[%c0_73, %c0_74], %114 {strides = array<i32>} : memref<1x64xf32, #tpu.memory_space<vmem>>, vector<1x64xf32>,
    } else {
    }
    %c1_i32 = arith.constant 1 : i32
    %8 = arith.cmpi eq, %arg0, %c1_i32 : i32
    %9 = arith.extui %8 : i1 to i32
    %c0_i32_4 = arith.constant 0 : i32
    %10 = arith.cmpi ne, %9, %c0_i32_4 : i32
    scf.if %10 {
      %c0 = arith.constant 0 : index
      %c0_5 = arith.constant 0 : index
      %11 = vector.load %arg9[%c0, %c0_5] : memref<1x64xf32, #tpu.memory_space<vmem>>, vector<1x64xf32>
      %cst = arith.constant 1.250000e-01 : f32
      %12 = vector.broadcast %cst : f32 to vector<1x64xf32>
      %13 = arith.mulf %11, %12 : vector<1x64xf32>
      %c0_6 = arith.constant 0 : index
      %c0_7 = arith.constant 0 : index
      %14 = vector.load %arg10[%c0_6, %c0_7] : memref<1x64xf32, #tpu.memory_space<vmem>>, vector<1x64xf32>
      %cst_8 = arith.constant 1.250000e-01 : f32
      %15 = vector.broadcast %cst_8 : f32 to vector<1x64xf32>
      %16 = arith.mulf %14, %15 : vector<1x64xf32>
      %17 = arith.mulf %13, %13 : vector<1x64xf32>
      %18 = arith.subf %16, %17 : vector<1x64xf32>
      %cst_9 = arith.constant 0.000000e+00 : f32
      %19 = vector.broadcast %cst_9 : f32 to vector<1x64xf32>
      %20 = arith.maximumf %18, %19 : vector<1x64xf32>
      %cst_10 = arith.constant 9.99999974E-6 : f32
      %21 = vector.broadcast %cst_10 : f32 to vector<1x64xf32>
      %22 = arith.addf %20, %21 : vector<1x64xf32>
      %23 = math.rsqrt %22 : vector<1x64xf32>
      %c0_11 = arith.constant 0 : index
      %c0_12 = arith.constant 0 : index
      %24 = vector.load %arg4[%c0_11, %c0_12] : memref<1x64xf32, #tpu.memory_space<vmem>>, vector<1x64xf32>
      %25 = arith.mulf %24, %23 : vector<1x64xf32>
      %c0_13 = arith.constant 0 : index
      %c0_14 = arith.constant 0 : index
      %26 = vector.load %arg5[%c0_13, %c0_14] : memref<1x64xf32, #tpu.memory_space<vmem>>, vector<1x64xf32>
      %27 = arith.mulf %13, %25 : vector<1x64xf32>
      %28 = arith.subf %26, %27 : vector<1x64xf32>
      %29 = arith.index_cast %arg1 : i32 to index
      %c0_15 = arith.constant 0 : index
      %c0_16 = arith.constant 0 : index
      %30 = vector.load %arg8[%29, %c0_15, %c0_16] : memref<2x8x64xf32, #tpu.memory_space<vmem>>, vector<1x8x64xf32>
      %31 = vector.shape_cast %30 : vector<1x8x64xf32> to vector<8x64xf32>
      %32 = vector.broadcast %25 : vector<1x64xf32> to vector<8x64xf32>
      %33 = arith.mulf %31, %32 : vector<8x64xf32>
      %34 = vector.broadcast %28 : vector<1x64xf32> to vector<8x64xf32>
      %35 = arith.addf %33, %34 : vector<8x64xf32>
      %cst_17 = arith.constant 0.000000e+00 : f32
      %36 = vector.broadcast %cst_17 : f32 to vector<8x64xf32>
      %37 = arith.maximumf %35, %36 : vector<8x64xf32>
      %c0_18 = arith.constant 0 : index
      %c0_19 = arith.constant 0 : index
      %38 = vector.load %arg6[%c0_18, %c0_19] : memref<4x8xf32, #tpu.memory_space<vmem>>, vector<4x8xf32>
      %cst_20 = arith.constant dense<0.000000e+00> : vector<4x64xf32>
      %39 = tpu.matmul %38, %37, %cst_20 {dimension_numbers = #tpu.dot_dimension_numbers<[1], [0], [0], [1], [0, 0, 1, 1], [], []>} : vector<4x8xf32>, vector<8x64xf32>, vector<4x64xf32> -> vector<4x64xf32>
      %c0_21 = arith.constant 0 : index
      %c0_22 = arith.constant 0 : index
      %c0_23 = arith.constant 0 : index
      %40 = vector.load %arg7[%c0_21, %c0_22, %c0_23] : memref<1x4x64xf32, #tpu.memory_space<vmem>>, vector<1x4x64xf32>
      %41 = vector.shape_cast %40 : vector<1x4x64xf32> to vector<4x64xf32>
      %42 = vector.shape_cast %39 : vector<4x64xf32> to vector<1x4x64xf32>
      tpu.vector_store %arg7[%c0_21, %c0_22, %c0_23], %42 {strides = array<i32>} : memref<1x4x64xf32, #tpu.memory_space<vmem>>, vector<1x4x64xf32>,
    } else {
    }
    return
  }
  func.func @transform_0(%arg0: i32, %arg1: i32) -> (i32, i32, i32) {
    %c1_i32 = arith.constant 1 : i32
    %0 = arith.subi %c1_i32, %arg0 : i32
    %1 = arith.muli %0, %arg1 : i32
    %c0_i32 = arith.constant 0 : i32
    %c0_i32_0 = arith.constant 0 : i32
    %c0_i32_1 = arith.constant 0 : i32
    return %1, %c0_i32, %c0_i32_0 : i32, i32, i32
  }
  func.func @transform_1(%arg0: i32, %arg1: i32) -> (i32, i32, i32) {
    %c0_i32 = arith.constant 0 : i32
    %c0_i32_0 = arith.constant 0 : i32
    %c0_i32_1 = arith.constant 0 : i32
    %c0_i32_2 = arith.constant 0 : i32
    return %c0_i32, %c0_i32_0, %c0_i32_1 : i32, i32, i32
  }
  func.func @transform_2(%arg0: i32, %arg1: i32) -> (i32, i32) {
    %c0_i32 = arith.constant 0 : i32
    %c0_i32_0 = arith.constant 0 : i32
    %c0_i32_1 = arith.constant 0 : i32
    return %c0_i32, %c0_i32_0 : i32, i32
  }
  func.func @transform_3(%arg0: i32, %arg1: i32) -> (i32, i32) {
    %c0_i32 = arith.constant 0 : i32
    %c0_i32_0 = arith.constant 0 : i32
    %c0_i32_1 = arith.constant 0 : i32
    return %c0_i32, %c0_i32_0 : i32, i32
  }
  func.func @transform_4(%arg0: i32, %arg1: i32) -> (i32, i32) {
    %c0_i32 = arith.constant 0 : i32
    %c0_i32_0 = arith.constant 0 : i32
    %c0_i32_1 = arith.constant 0 : i32
    return %c0_i32, %c0_i32_0 : i32, i32
  }
  func.func @transform_5(%arg0: i32, %arg1: i32) -> (i32, i32, i32) {
    %0 = arith.muli %arg0, %arg1 : i32
    %c0_i32 = arith.constant 0 : i32
    %c0_i32_0 = arith.constant 0 : i32
    %c0_i32_1 = arith.constant 0 : i32
    return %0, %c0_i32, %c0_i32_0 : i32, i32, i32
  }
}

module attributes {stable_mosaic.version = 11 : i64} {
  func.func @kernel(%arg0: i32, %arg1: i32, %arg2: memref<1x24x64xf32, #tpu.memory_space<vmem>>, %arg3: memref<9x64x64xbf16, #tpu.memory_space<vmem>>, %arg4: memref<1x64xf32, #tpu.memory_space<vmem>>, %arg5: memref<1x64xf32, #tpu.memory_space<vmem>>, %arg6: memref<4x8xf32, #tpu.memory_space<vmem>>, %arg7: memref<1x4x64xf32, #tpu.memory_space<vmem>>, %arg8: memref<2x8x64xf32, #tpu.memory_space<vmem>>, %arg9: memref<1x64xf32, #tpu.memory_space<vmem>>, %arg10: memref<1x64xf32, #tpu.memory_space<vmem>>) attributes {dimension_semantics = [#tpu.dimension_semantics<arbitrary>, #tpu.dimension_semantics<arbitrary>], iteration_bounds = array<i64: 2, 2>, scalar_prefetch = 0 : i64, scratch_operands = 3 : i64, tpu.core_type = #tpu.core_type<tc>, window_params = [{transform_indices = @transform_0, window_bounds = array<i64: 1, 24, 64>}, {pipeline_mode = #tpu.pipeline_mode<synchronous>, transform_indices = @transform_1, window_bounds = array<i64: 9, 64, 64>}, {pipeline_mode = #tpu.pipeline_mode<synchronous>, transform_indices = @transform_2, window_bounds = array<i64: 1, 64>}, {pipeline_mode = #tpu.pipeline_mode<synchronous>, transform_indices = @transform_3, window_bounds = array<i64: 1, 64>}, {pipeline_mode = #tpu.pipeline_mode<synchronous>, transform_indices = @transform_4, window_bounds = array<i64: 4, 8>}, {transform_indices = @transform_5, window_bounds = array<i64: 1, 4, 64>}]} {
    %c0_i32 = arith.constant 0 : i32
    %0 = arith.cmpi eq, %arg0, %c0_i32 : i32
    %c0_i32_0 = arith.constant 0 : i32
    %1 = arith.cmpi eq, %arg1, %c0_i32_0 : i32
    %2 = arith.andi %0, %1 : i1
    %3 = arith.extui %2 : i1 to i32
    %c0_i32_1 = arith.constant 0 : i32
    %4 = arith.cmpi ne, %3, %c0_i32_1 : i32
    scf.if %4 {
      %cst = arith.constant 0.000000e+00 : f32
      %11 = vector.broadcast %cst : f32 to vector<1x64xf32>
      %c0 = arith.constant 0 : index
      %c0_5 = arith.constant 0 : index
      %12 = vector.load %arg9[%c0, %c0_5] : memref<1x64xf32, #tpu.memory_space<vmem>>, vector<1x64xf32>
      tpu.vector_store %arg9[%c0, %c0_5], %11 {strides = array<i32>} : memref<1x64xf32, #tpu.memory_space<vmem>>, vector<1x64xf32>,
      %cst_6 = arith.constant 0.000000e+00 : f32
      %13 = vector.broadcast %cst_6 : f32 to vector<1x64xf32>
      %c0_7 = arith.constant 0 : index
      %c0_8 = arith.constant 0 : index
      %14 = vector.load %arg10[%c0_7, %c0_8] : memref<1x64xf32, #tpu.memory_space<vmem>>, vector<1x64xf32>
      tpu.vector_store %arg10[%c0_7, %c0_8], %13 {strides = array<i32>} : memref<1x64xf32, #tpu.memory_space<vmem>>, vector<1x64xf32>,
    } else {
    }
    %c0_i32_2 = arith.constant 0 : i32
    %5 = arith.cmpi eq, %arg0, %c0_i32_2 : i32
    %6 = arith.extui %5 : i1 to i32
    %c0_i32_3 = arith.constant 0 : i32
    %7 = arith.cmpi ne, %6, %c0_i32_3 : i32
    scf.if %7 {
      %cst = arith.constant 0.000000e+00 : f32
      %11 = vector.broadcast %cst : f32 to vector<8x64xf32>
      %c0 = arith.constant 0 : index
      %c0_5 = arith.constant 0 : index
      %c0_6 = arith.constant 0 : index
      %12 = vector.load %arg2[%c0, %c0_5, %c0_6] : memref<1x24x64xf32, #tpu.memory_space<vmem>>, vector<1x8x64xf32>
      %13 = vector.shape_cast %12 : vector<1x8x64xf32> to vector<8x64xf32>
      %14 = arith.truncf %13 : vector<8x64xf32> to vector<8x64xbf16>
      %c0_7 = arith.constant 0 : index
      %c0_8 = arith.constant 0 : index
      %c0_9 = arith.constant 0 : index
      %15 = vector.load %arg3[%c0_7, %c0_8, %c0_9] : memref<9x64x64xbf16, #tpu.memory_space<vmem>>, vector<1x64x64xbf16>
      %16 = vector.shape_cast %15 : vector<1x64x64xbf16> to vector<64x64xbf16>
      %cst_10 = arith.constant dense<0.000000e+00> : vector<8x64xf32>
      %17 = tpu.matmul %14, %16, %cst_10 {dimension_numbers = #tpu.dot_dimension_numbers<[1], [0], [0], [1], [0, 0, 1, 1], [], []>} : vector<8x64xbf16>, vector<64x64xbf16>, vector<8x64xf32> -> vector<8x64xf32>
      %18 = arith.addf %11, %17 : vector<8x64xf32>
      %c0_11 = arith.constant 0 : index
      %c1 = arith.constant 1 : index
      %c0_12 = arith.constant 0 : index
      %19 = vector.load %arg2[%c0_11, %c1, %c0_12] : memref<1x24x64xf32, #tpu.memory_space<vmem>>, vector<1x8x64xf32>
      %20 = vector.shape_cast %19 : vector<1x8x64xf32> to vector<8x64xf32>
      %21 = arith.truncf %20 : vector<8x64xf32> to vector<8x64xbf16>
      %c1_13 = arith.constant 1 : index
      %c0_14 = arith.constant 0 : index
      %c0_15 = arith.constant 0 : index
      %22 = vector.load %arg3[%c1_13, %c0_14, %c0_15] : memref<9x64x64xbf16, #tpu.memory_space<vmem>>, vector<1x64x64xbf16>
      %23 = vector.shape_cast %22 : vector<1x64x64xbf16> to vector<64x64xbf16>
      %cst_16 = arith.constant dense<0.000000e+00> : vector<8x64xf32>
      %24 = tpu.matmul %21, %23, %cst_16 {dimension_numbers = #tpu.dot_dimension_numbers<[1], [0], [0], [1], [0, 0, 1, 1], [], []>} : vector<8x64xbf16>, vector<64x64xbf16>, vector<8x64xf32> -> vector<8x64xf32>
      %25 = arith.addf %18, %24 : vector<8x64xf32>
      %c0_17 = arith.constant 0 : index
      %c2 = arith.constant 2 : index
      %c0_18 = arith.constant 0 : index
      %26 = vector.load %arg2[%c0_17, %c2, %c0_18] : memref<1x24x64xf32, #tpu.memory_space<vmem>>, vector<1x8x64xf32>
      %27 = vector.shape_cast %26 : vector<1x8x64xf32> to vector<8x64xf32>
      %28 = arith.truncf %27 : vector<8x64xf32> to vector<8x64xbf16>
      %c2_19 = arith.constant 2 : index
      %c0_20 = arith.constant 0 : index
      %c0_21 = arith.constant 0 : index
      %29 = vector.load %arg3[%c2_19, %c0_20, %c0_21] : memref<9x64x64xbf16, #tpu.memory_space<vmem>>, vector<1x64x64xbf16>
      %30 = vector.shape_cast %29 : vector<1x64x64xbf16> to vector<64x64xbf16>
      %cst_22 = arith.constant dense<0.000000e+00> : vector<8x64xf32>
      %31 = tpu.matmul %28, %30, %cst_22 {dimension_numbers = #tpu.dot_dimension_numbers<[1], [0], [0], [1], [0, 0, 1, 1], [], []>} : vector<8x64xbf16>, vector<64x64xbf16>, vector<8x64xf32> -> vector<8x64xf32>
      %32 = arith.addf %25, %31 : vector<8x64xf32>
      %c0_23 = arith.constant 0 : index
      %c4 = arith.constant 4 : index
      %c0_24 = arith.constant 0 : index
      %33 = vector.load %arg2[%c0_23, %c4, %c0_24] : memref<1x24x64xf32, #tpu.memory_space<vmem>>, vector<1x8x64xf32>
      %34 = vector.shape_cast %33 : vector<1x8x64xf32> to vector<8x64xf32>
      %35 = arith.truncf %34 : vector<8x64xf32> to vector<8x64xbf16>
      %c3 = arith.constant 3 : index
      %c0_25 = arith.constant 0 : index
      %c0_26 = arith.constant 0 : index
      %36 = vector.load %arg3[%c3, %c0_25, %c0_26] : memref<9x64x64xbf16, #tpu.memory_space<vmem>>, vector<1x64x64xbf16>
      %37 = vector.shape_cast %36 : vector<1x64x64xbf16> to vector<64x64xbf16>
      %cst_27 = arith.constant dense<0.000000e+00> : vector<8x64xf32>
      %38 = tpu.matmul %35, %37, %cst_27 {dimension_numbers = #tpu.dot_dimension_numbers<[1], [0], [0], [1], [0, 0, 1, 1], [], []>} : vector<8x64xbf16>, vector<64x64xbf16>, vector<8x64xf32> -> vector<8x64xf32>
      %39 = arith.addf %32, %38 : vector<8x64xf32>
      %c0_28 = arith.constant 0 : index
      %c5 = arith.constant 5 : index
      %c0_29 = arith.constant 0 : index
      %40 = vector.load %arg2[%c0_28, %c5, %c0_29] : memref<1x24x64xf32, #tpu.memory_space<vmem>>, vector<1x8x64xf32>
      %41 = vector.shape_cast %40 : vector<1x8x64xf32> to vector<8x64xf32>
      %42 = arith.truncf %41 : vector<8x64xf32> to vector<8x64xbf16>
      %c4_30 = arith.constant 4 : index
      %c0_31 = arith.constant 0 : index
      %c0_32 = arith.constant 0 : index
      %43 = vector.load %arg3[%c4_30, %c0_31, %c0_32] : memref<9x64x64xbf16, #tpu.memory_space<vmem>>, vector<1x64x64xbf16>
      %44 = vector.shape_cast %43 : vector<1x64x64xbf16> to vector<64x64xbf16>
      %cst_33 = arith.constant dense<0.000000e+00> : vector<8x64xf32>
      %45 = tpu.matmul %42, %44, %cst_33 {dimension_numbers = #tpu.dot_dimension_numbers<[1], [0], [0], [1], [0, 0, 1, 1], [], []>} : vector<8x64xbf16>, vector<64x64xbf16>, vector<8x64xf32> -> vector<8x64xf32>
      %46 = arith.addf %39, %45 : vector<8x64xf32>
      %c0_34 = arith.constant 0 : index
      %c6 = arith.constant 6 : index
      %c0_35 = arith.constant 0 : index
      %47 = vector.load %arg2[%c0_34, %c6, %c0_35] : memref<1x24x64xf32, #tpu.memory_space<vmem>>, vector<1x8x64xf32>
      %48 = vector.shape_cast %47 : vector<1x8x64xf32> to vector<8x64xf32>
      %49 = arith.truncf %48 : vector<8x64xf32> to vector<8x64xbf16>
      %c5_36 = arith.constant 5 : index
      %c0_37 = arith.constant 0 : index
      %c0_38 = arith.constant 0 : index
      %50 = vector.load %arg3[%c5_36, %c0_37, %c0_38] : memref<9x64x64xbf16, #tpu.memory_space<vmem>>, vector<1x64x64xbf16>
      %51 = vector.shape_cast %50 : vector<1x64x64xbf16> to vector<64x64xbf16>
      %cst_39 = arith.constant dense<0.000000e+00> : vector<8x64xf32>
      %52 = tpu.matmul %49, %51, %cst_39 {dimension_numbers = #tpu.dot_dimension_numbers<[1], [0], [0], [1], [0, 0, 1, 1], [], []>} : vector<8x64xbf16>, vector<64x64xbf16>, vector<8x64xf32> -> vector<8x64xf32>
      %53 = arith.addf %46, %52 : vector<8x64xf32>
      %c0_40 = arith.constant 0 : index
      %c8 = arith.constant 8 : index
      %c0_41 = arith.constant 0 : index
      %54 = vector.load %arg2[%c0_40, %c8, %c0_41] : memref<1x24x64xf32, #tpu.memory_space<vmem>>, vector<1x8x64xf32>
      %55 = vector.shape_cast %54 : vector<1x8x64xf32> to vector<8x64xf32>
      %56 = arith.truncf %55 : vector<8x64xf32> to vector<8x64xbf16>
      %c6_42 = arith.constant 6 : index
      %c0_43 = arith.constant 0 : index
      %c0_44 = arith.constant 0 : index
      %57 = vector.load %arg3[%c6_42, %c0_43, %c0_44] : memref<9x64x64xbf16, #tpu.memory_space<vmem>>, vector<1x64x64xbf16>
      %58 = vector.shape_cast %57 : vector<1x64x64xbf16> to vector<64x64xbf16>
      %cst_45 = arith.constant dense<0.000000e+00> : vector<8x64xf32>
      %59 = tpu.matmul %56, %58, %cst_45 {dimension_numbers = #tpu.dot_dimension_numbers<[1], [0], [0], [1], [0, 0, 1, 1], [], []>} : vector<8x64xbf16>, vector<64x64xbf16>, vector<8x64xf32> -> vector<8x64xf32>
      %60 = arith.addf %53, %59 : vector<8x64xf32>
      %c0_46 = arith.constant 0 : index
      %c9 = arith.constant 9 : index
      %c0_47 = arith.constant 0 : index
      %61 = vector.load %arg2[%c0_46, %c9, %c0_47] : memref<1x24x64xf32, #tpu.memory_space<vmem>>, vector<1x8x64xf32>
      %62 = vector.shape_cast %61 : vector<1x8x64xf32> to vector<8x64xf32>
      %63 = arith.truncf %62 : vector<8x64xf32> to vector<8x64xbf16>
      %c7 = arith.constant 7 : index
      %c0_48 = arith.constant 0 : index
      %c0_49 = arith.constant 0 : index
      %64 = vector.load %arg3[%c7, %c0_48, %c0_49] : memref<9x64x64xbf16, #tpu.memory_space<vmem>>, vector<1x64x64xbf16>
      %65 = vector.shape_cast %64 : vector<1x64x64xbf16> to vector<64x64xbf16>
      %cst_50 = arith.constant dense<0.000000e+00> : vector<8x64xf32>
      %66 = tpu.matmul %63, %65, %cst_50 {dimension_numbers = #tpu.dot_dimension_numbers<[1], [0], [0], [1], [0, 0, 1, 1], [], []>} : vector<8x64xbf16>, vector<64x64xbf16>, vector<8x64xf32> -> vector<8x64xf32>
      %67 = arith.addf %60, %66 : vector<8x64xf32>
      %c0_51 = arith.constant 0 : index
      %c10 = arith.constant 10 : index
      %c0_52 = arith.constant 0 : index
      %68 = vector.load %arg2[%c0_51, %c10, %c0_52] : memref<1x24x64xf32, #tpu.memory_space<vmem>>, vector<1x8x64xf32>
      %69 = vector.shape_cast %68 : vector<1x8x64xf32> to vector<8x64xf32>
      %70 = arith.truncf %69 : vector<8x64xf32> to vector<8x64xbf16>
      %c8_53 = arith.constant 8 : index
      %c0_54 = arith.constant 0 : index
      %c0_55 = arith.constant 0 : index
      %71 = vector.load %arg3[%c8_53, %c0_54, %c0_55] : memref<9x64x64xbf16, #tpu.memory_space<vmem>>, vector<1x64x64xbf16>
      %72 = vector.shape_cast %71 : vector<1x64x64xbf16> to vector<64x64xbf16>
      %cst_56 = arith.constant dense<0.000000e+00> : vector<8x64xf32>
      %73 = tpu.matmul %70, %72, %cst_56 {dimension_numbers = #tpu.dot_dimension_numbers<[1], [0], [0], [1], [0, 0, 1, 1], [], []>} : vector<8x64xbf16>, vector<64x64xbf16>, vector<8x64xf32> -> vector<8x64xf32>
      %74 = arith.addf %67, %73 : vector<8x64xf32>
      %75 = arith.index_cast %arg1 : i32 to index
      %c0_57 = arith.constant 0 : index
      %c0_58 = arith.constant 0 : index
      %76 = vector.load %arg8[%75, %c0_57, %c0_58] : memref<2x8x64xf32, #tpu.memory_space<vmem>>, vector<1x8x64xf32>
      %77 = vector.shape_cast %76 : vector<1x8x64xf32> to vector<8x64xf32>
      %78 = vector.shape_cast %74 : vector<8x64xf32> to vector<1x8x64xf32>
      tpu.vector_store %arg8[%75, %c0_57, %c0_58], %78 {strides = array<i32>} : memref<2x8x64xf32, #tpu.memory_space<vmem>>, vector<1x8x64xf32>,
      %79 = tpu.iota {dimensions = array<i32: 0>} : vector<8x1xi32>
      %c4_i32 = arith.constant 4 : i32
      %c0_i32_59 = arith.constant 0 : i32
      %80 = arith.cmpi eq, %c4_i32, %c0_i32_59 : i32
      %c1_i32_60 = arith.constant 1 : i32
      %81 = arith.select %80, %c1_i32_60, %c4_i32 : i32
      %82 = vector.broadcast %81 : i32 to vector<8x1xi32>
      %83 = arith.remsi %79, %82 : vector<8x1xi32>
      %c0_i32_61 = arith.constant 0 : i32
      %84 = vector.broadcast %c0_i32_61 : i32 to vector<8x1xi32>
      %85 = arith.cmpi ne, %83, %84 : vector<8x1xi32>
      %c0_i32_62 = arith.constant 0 : i32
      %86 = vector.broadcast %c0_i32_62 : i32 to vector<8x1xi32>
      %87 = arith.cmpi slt, %83, %86 : vector<8x1xi32>
      %c0_i32_63 = arith.constant 0 : i32
      %88 = arith.cmpi slt, %81, %c0_i32_63 : i32
      %89 = vector.broadcast %88 : i1 to vector<8x1xi1>
      %90 = vector.broadcast %89 : vector<8x1xi1> to vector<8x1xi1>
      %91 = arith.xori %87, %90 : vector<8x1xi1>
      %92 = arith.andi %91, %85 : vector<8x1xi1>
      %93 = vector.broadcast %81 : i32 to vector<8x1xi32>
      %94 = arith.addi %83, %93 : vector<8x1xi32>
      %95 = arith.select %92, %94, %83 : vector<8x1xi1>, vector<8x1xi32>
      %c2_i32 = arith.constant 2 : i32
      %96 = vector.broadcast %c2_i32 : i32 to vector<8x1xi32>
      %97 = arith.cmpi slt, %95, %96 : vector<8x1xi32>
      %c8_i32 = arith.constant 8 : i32
      %98 = vector.broadcast %c8_i32 : i32 to vector<8x1xi32>
      %99 = arith.cmpi slt, %79, %98 : vector<8x1xi32>
      %100 = arith.andi %97, %99 : vector<8x1xi1>
      %cst_64 = arith.constant 0.000000e+00 : f32
      %101 = vector.shape_cast %100 : vector<8x1xi1> to vector<8x1xi1>
      %102 = vector.broadcast %101 : vector<8x1xi1> to vector<8x64xi1>
      %103 = vector.broadcast %cst_64 : f32 to vector<8x64xf32>
      %104 = arith.select %102, %74, %103 : vector<8x64xi1>, vector<8x64xf32>
      %c0_65 = arith.constant 0 : index
      %c0_66 = arith.constant 0 : index
      %105 = vector.load %arg9[%c0_65, %c0_66] : memref<1x64xf32, #tpu.memory_space<vmem>>, vector<1x64xf32>
      %cst_67 = arith.constant dense<0.000000e+00> : vector<64xf32>
      %106 = vector.multi_reduction <add>, %104, %cst_67 [0] : vector<8x64xf32> to vector<64xf32>
      %107 = vector.shape_cast %106 : vector<64xf32> to vector<1x64xf32>
      %108 = arith.addf %105, %107 : vector<1x64xf32>
      %c0_68 = arith.constant 0 : index
      %c0_69 = arith.constant 0 : index
      %109 = vector.load %arg9[%c0_68, %c0_69] : memref<1x64xf32, #tpu.memory_space<vmem>>, vector<1x64xf32>
      tpu.vector_store %arg9[%c0_68, %c0_69], %108 {strides = array<i32>} : memref<1x64xf32, #tpu.memory_space<vmem>>, vector<1x64xf32>,
      %c0_70 = arith.constant 0 : index
      %c0_71 = arith.constant 0 : index
      %110 = vector.load %arg10[%c0_70, %c0_71] : memref<1x64xf32, #tpu.memory_space<vmem>>, vector<1x64xf32>
      %111 = arith.mulf %104, %104 : vector<8x64xf32>
      %cst_72 = arith.constant dense<0.000000e+00> : vector<64xf32>
      %112 = vector.multi_reduction <add>, %111, %cst_72 [0] : vector<8x64xf32> to vector<64xf32>
      %113 = vector.shape_cast %112 : vector<64xf32> to vector<1x64xf32>
      %114 = arith.addf %110, %113 : vector<1x64xf32>
      %c0_73 = arith.constant 0 : index
      %c0_74 = arith.constant 0 : index
      %115 = vector.load %arg10[%c0_73, %c0_74] : memref<1x64xf32, #tpu.memory_space<vmem>>, vector<1x64xf32>
      tpu.vector_store %arg10[%c0_73, %c0_74], %114 {strides = array<i32>} : memref<1x64xf32, #tpu.memory_space<vmem>>, vector<1x64xf32>,
    } else {
    }
    %c1_i32 = arith.constant 1 : i32
    %8 = arith.cmpi eq, %arg0, %c1_i32 : i32
    %9 = arith.extui %8 : i1 to i32
    %c0_i32_4 = arith.constant 0 : i32
    %10 = arith.cmpi ne, %9, %c0_i32_4 : i32
    scf.if %10 {
      %c0 = arith.constant 0 : index
      %c0_5 = arith.constant 0 : index
      %11 = vector.load %arg9[%c0, %c0_5] : memref<1x64xf32, #tpu.memory_space<vmem>>, vector<1x64xf32>
      %cst = arith.constant 1.250000e-01 : f32
      %12 = vector.broadcast %cst : f32 to vector<1x64xf32>
      %13 = arith.mulf %11, %12 : vector<1x64xf32>
      %c0_6 = arith.constant 0 : index
      %c0_7 = arith.constant 0 : index
      %14 = vector.load %arg10[%c0_6, %c0_7] : memref<1x64xf32, #tpu.memory_space<vmem>>, vector<1x64xf32>
      %cst_8 = arith.constant 1.250000e-01 : f32
      %15 = vector.broadcast %cst_8 : f32 to vector<1x64xf32>
      %16 = arith.mulf %14, %15 : vector<1x64xf32>
      %17 = arith.mulf %13, %13 : vector<1x64xf32>
      %18 = arith.subf %16, %17 : vector<1x64xf32>
      %cst_9 = arith.constant 0.000000e+00 : f32
      %19 = vector.broadcast %cst_9 : f32 to vector<1x64xf32>
      %20 = arith.maximumf %18, %19 : vector<1x64xf32>
      %cst_10 = arith.constant 9.99999974E-6 : f32
      %21 = vector.broadcast %cst_10 : f32 to vector<1x64xf32>
      %22 = arith.addf %20, %21 : vector<1x64xf32>
      %23 = math.rsqrt %22 : vector<1x64xf32>
      %c0_11 = arith.constant 0 : index
      %c0_12 = arith.constant 0 : index
      %24 = vector.load %arg4[%c0_11, %c0_12] : memref<1x64xf32, #tpu.memory_space<vmem>>, vector<1x64xf32>
      %25 = arith.mulf %24, %23 : vector<1x64xf32>
      %c0_13 = arith.constant 0 : index
      %c0_14 = arith.constant 0 : index
      %26 = vector.load %arg5[%c0_13, %c0_14] : memref<1x64xf32, #tpu.memory_space<vmem>>, vector<1x64xf32>
      %27 = arith.mulf %13, %25 : vector<1x64xf32>
      %28 = arith.subf %26, %27 : vector<1x64xf32>
      %29 = arith.index_cast %arg1 : i32 to index
      %c0_15 = arith.constant 0 : index
      %c0_16 = arith.constant 0 : index
      %30 = vector.load %arg8[%29, %c0_15, %c0_16] : memref<2x8x64xf32, #tpu.memory_space<vmem>>, vector<1x8x64xf32>
      %31 = vector.shape_cast %30 : vector<1x8x64xf32> to vector<8x64xf32>
      %32 = vector.broadcast %25 : vector<1x64xf32> to vector<8x64xf32>
      %33 = arith.mulf %31, %32 : vector<8x64xf32>
      %34 = vector.broadcast %28 : vector<1x64xf32> to vector<8x64xf32>
      %35 = arith.addf %33, %34 : vector<8x64xf32>
      %cst_17 = arith.constant 0.000000e+00 : f32
      %36 = vector.broadcast %cst_17 : f32 to vector<8x64xf32>
      %37 = arith.maximumf %35, %36 : vector<8x64xf32>
      %c0_18 = arith.constant 0 : index
      %c0_19 = arith.constant 0 : index
      %38 = vector.load %arg6[%c0_18, %c0_19] : memref<4x8xf32, #tpu.memory_space<vmem>>, vector<4x8xf32>
      %cst_20 = arith.constant dense<0.000000e+00> : vector<4x64xf32>
      %39 = tpu.matmul %38, %37, %cst_20 {dimension_numbers = #tpu.dot_dimension_numbers<[1], [0], [0], [1], [0, 0, 1, 1], [], []>} : vector<4x8xf32>, vector<8x64xf32>, vector<4x64xf32> -> vector<4x64xf32>
      %c0_21 = arith.constant 0 : index
      %c0_22 = arith.constant 0 : index
      %c0_23 = arith.constant 0 : index
      %40 = vector.load %arg7[%c0_21, %c0_22, %c0_23] : memref<1x4x64xf32, #tpu.memory_space<vmem>>, vector<1x4x64xf32>
      %41 = vector.shape_cast %40 : vector<1x4x64xf32> to vector<4x64xf32>
      %42 = vector.shape_cast %39 : vector<4x64xf32> to vector<1x4x64xf32>
      tpu.vector_store %arg7[%c0_21, %c0_22, %c0_23], %42 {strides = array<i32>} : memref<1x4x64xf32, #tpu.memory_space<vmem>>, vector<1x4x64xf32>,
    } else {
    }
    return
  }
  func.func @transform_0(%arg0: i32, %arg1: i32) -> (i32, i32, i32) {
    %c1_i32 = arith.constant 1 : i32
    %0 = arith.subi %c1_i32, %arg0 : i32
    %1 = arith.muli %0, %arg1 : i32
    %c0_i32 = arith.constant 0 : i32
    %c0_i32_0 = arith.constant 0 : i32
    %c0_i32_1 = arith.constant 0 : i32
    return %1, %c0_i32, %c0_i32_0 : i32, i32, i32
  }
  func.func @transform_1(%arg0: i32, %arg1: i32) -> (i32, i32, i32) {
    %c0_i32 = arith.constant 0 : i32
    %c0_i32_0 = arith.constant 0 : i32
    %c0_i32_1 = arith.constant 0 : i32
    %c0_i32_2 = arith.constant 0 : i32
    return %c0_i32, %c0_i32_0, %c0_i32_1 : i32, i32, i32
  }
  func.func @transform_2(%arg0: i32, %arg1: i32) -> (i32, i32) {
    %c0_i32 = arith.constant 0 : i32
    %c0_i32_0 = arith.constant 0 : i32
    %c0_i32_1 = arith.constant 0 : i32
    return %c0_i32, %c0_i32_0 : i32, i32
  }
  func.func @transform_3(%arg0: i32, %arg1: i32) -> (i32, i32) {
    %c0_i32 = arith.constant 0 : i32
    %c0_i32_0 = arith.constant 0 : i32
    %c0_i32_1 = arith.constant 0 : i32
    return %c0_i32, %c0_i32_0 : i32, i32
  }
  func.func @transform_4(%arg0: i32, %arg1: i32) -> (i32, i32) {
    %c0_i32 = arith.constant 0 : i32
    %c0_i32_0 = arith.constant 0 : i32
    %c0_i32_1 = arith.constant 0 : i32
    return %c0_i32, %c0_i32_0 : i32, i32
  }
  func.func @transform_5(%arg0: i32, %arg1: i32) -> (i32, i32, i32) {
    %0 = arith.muli %arg0, %arg1 : i32
    %c0_i32 = arith.constant 0 : i32
    %c0_i32_0 = arith.constant 0 : i32
    %c0_i32_1 = arith.constant 0 : i32
    return %0, %c0_i32, %c0_i32_0 : i32, i32, i32
  }
}

</mosaic_0001>

<bundles_post_ra>
// kernel: cnn_encoder.7
= control target key start
LH: loop header
LB: loop body
LE: loop exit
PB: predicated region body
PF: predicated region fallthrough
CT: control target
= control target key end

     0   :  { %10 = vsyncpa [#allocation6], 0  ;;  %s2121_s0 = inlined_call_operand.vmem [shape: f32[2,24,64], index: 0, kind: input, shape index: {}]   ;;  %s2122_s1 = inlined_call_operand.vmem [shape: bf16[9,64,64], index: 1, kind: input, shape index: {}]   ;;  %s2123_s2 = inlined_call_operand.vmem [shape: f32[1,64], index: 2, kind: input, shape index: {}]   ;;  %s2124_s3 = inlined_call_operand.vmem [shape: f32[1,64], index: 3, kind: input, shape index: {}]   ;;  %s2125_s4 = inlined_call_operand.vmem [shape: f32[4,8], index: 4, kind: input, shape index: {}]   ;;  %s2126_s5 = inlined_call_operand.hbm [shape: f32[2,4,64], index: 5, kind: output, shape index: {}]  }
   0x1   :  { %12 = vsyncpa [#allocation6 + $0x1], 0  ;;  %s1782_s18 = smov 0   ;;  %s1784_s19 = smov 0  }
   0x2   :  { %s1786_s20 = smov 0   ;;  %s1788_s21 = smov 0  }
   0x3   :  { %s1790_s22 = smov 0   ;;  %s1792_s23 = smov 0  }
   0x4   :  { %s1794_s24 = smov 0   ;;  %s1796_s25 = smov 0  }
   0x5 LB: > { %s1221_s26 = sadd.s32 4294967295, %s1744_s25   ;;  %s1222_s27 = sadd.s32 4294967294, %s1744_s25   ;;  %s1744_s25 = sphi %s1796_s25, %s18_s25   ;;  %s1740_s24 = sphi %s1794_s24, %s2135_s24   ;;  %s1736_s23 = sphi %s1792_s23, %s2134_s23   ;;  %s1732_s22 = sphi %s1790_s22, %s2133_s22   ;;  %s1728_s21 = sphi %s1788_s21, %s2132_s21   ;;  %s1724_s20 = sphi %s1786_s20, %s2131_s20   ;;  %s1720_s19 = sphi %s1784_s19, %s2130_s19   ;;  %s1716_s18 = sphi %s1782_s18, %s2129_s18  }
   0x6   : > { %s27_s28 = sadd.s32 1, %s1736_s23  ;;  %s30_s29 = sadd.s32 1, %s1740_s24 }
   0x7   : > { %p28_p0 = scmp.ge.s32.totalorder %s27_s28, 2  ;;  %s148_s30 = smul.u32 %s1736_s23, %s1740_s24 }
   0x8   : > { %p163_p1 = scmp.ne.s32.totalorder %s1724_s20, %s1720_s19  ;;  %p164_p2 = scmp.eq.s32.totalorder %s1221_s26, 3 }
   0x9   : > { %s2137_s28 = smov (%p28_p0, %s27_s28), 0  ;;  %s2139_s29 = smov (!%p28_p0, %s30_s29), %s1740_s24 }
   0xa   : > { %p169_p3 = scmp.ne.s32.totalorder %s1720_s19, %s1716_s18  ;;  %p32_p4 = scmp.ge.s32.totalorder %s2139_s29, 2 }
   0xb   : > { %p170_p5 = scmp.eq.s32.totalorder %s1222_s27, 3  ;;  %p1835_p6 = por %p164_p2, %p163_p1 }
   0xc   : > { %p1225_p7 = scmp.ge.s32.totalorder %s1744_s25, 1  ;;  %s2141_s29 = smov (%p32_p4, %s2139_s29), 0 }
   0xd   : > { %p1842_p8 = por %p170_p5, %p169_p3  ;;  %p212_p9 = scmp.lt.s32.totalorder %s1744_s25, 5 }
   0xe   : > { %s149_s8 = smul.u32 %s2141_s29, %s2137_s28  ;;  %s153_s10 = sadd.s32 1, %s1724_s20 }
   0xf   : > { %p213_p10 = pnand %p1225_p7, %p212_p9 }
  0x10   : > { %s150_s9 = ssub.s32 %s148_s30, %s149_s8  ;;  %s239_s12 = sand.u32 (!%p213_p10), 1, %s1720_s19  }
  0x11   : > { %p151_p11 = scmp.eq.s32.totalorder %s150_s9, 0  ;;  %216 = sbr.rel (%p213_p10) target bundleno = 626 (0x272), region = 40 }
  0x12   : > { %s242_s13 = ssub.s32 (!%p213_p10), 1, %s1732_s22  ;;  %s1857_s14 = sshll.u32 (!%p213_p10), %s239_s12, 2 }
  0x13   : > { %s1851_s11 = scalar_select %p151_p11, %s1724_s20, %s153_s10  }
  0x14   : > { %s243_s15 = smul.u32 (!%p213_p10), %s1728_s21, %s242_s13  ;;  %p253_p12 = scmp.eq.s32.totalorder (!%p213_p10), %s1732_s22, 0 }
  0x15   : > { %p254_p0 = scmp.eq.s32.totalorder (!%p213_p10), %s1728_s21, 0  ;;  %s241_s30 = scalar_lea.vmem (!%p213_p10), [#allocation5], %s1857_s14 }
  0x16   : > { %p244_p13 = scmp.lt.s32.totalorder (!%p213_p10), %s243_s15, 1 }
  0x17   : > { %p255_p1 = pnand (!%p213_p10), %p254_p0, %p253_p12 }
  0x18   : > { %s2143_s15 = smov (!%p244_p13, %s243_s15), 1  ;;  %vm259_vm0 = vcmask (!%p255_p1), 516096   ;;  %v1746_v0 = vmov (!%p255_p1), 0.0  }
  0x19   : > { %s1535_s16 = smul.u32 24, %s2143_s15  ;;  %260 = vst.msk [vmem:[#allocation3] sm:$0x1] (!%p255_p1), %vm259_vm0, %v1746_v0  ;;  %261 = vst.msk [vmem:[#allocation4] sm:$0x1] (!%p255_p1), %vm259_vm0, %v1746_v0 }
  0x1a   : > { %258 = sbr.rel (%p255_p1) target bundleno = 33 (0x21), region = 44 }
  0x1b   : > { %s1865_s27 = scalar_lea.vmem %s2121_s0, %s1535_s16 }
  0x21 PF: > { %p1228_p2 = scmp.ne.s32.totalorder %s1732_s22, 0 }
  0x22   : > { %v1612_v1 = vld [vmem:[%s2122_s1 + $0x20] sm:$0xff] (!%p1228_p2)   ;;  %v1747_v2 = vmov (!%p1228_p2), 0.0   ;;  %v1614_v4 = vld [vmem:[%s2122_s1 + $0x28] sm:$0xff] (!%p1228_p2)   ;;  %vm1748_vm1 = vmmov (!%p1228_p2), 0   ;;  %v1616_v6 = vld [vmem:[%s2122_s1 + $0x30] sm:$0xff] (!%p1228_p2)   ;;  %vm310_vm2 = vcmask (!%p1228_p2), 523264   ;;  %v977_v60 = vlaneseq (!%p1228_p2) }
  0x23   : > { %264 = sbr.rel (%p1228_p2) target bundleno = 349 (0x15d), region = 48  ;;  %1393 = vmatprep.subr.bf16.mxu1 (!%p1228_p2), %v1747_v2  ;;  %1441 = vmatprep.subr.bf16.mxu0 (!%p1228_p2), %v1747_v2  ;;  %v1613_v3 = vld [vmem:[%s2122_s1 + $0x80] sm:$0xff] (!%p1228_p2)   ;;  %v1615_v5 = vld [vmem:[%s2122_s1 + $0x88] sm:$0xff] (!%p1228_p2)   ;;  %v1617_v7 = vld [vmem:[%s2122_s1 + $0x90] sm:$0xff] (!%p1228_p2)   ;;  %s1338_s8 = sshll.u32 (!%p1228_p2), %s1728_s21, 3  ;;  %vm1006_vm4 = vcmask (!%p1228_p2), 516096  }
  0x24   : > { %1394 = vmatpush3.bf16.msra.mxu1 (!%p1228_p2), %v1612_v1  ;;  %1401 = vmatprep.mubr.msk.bf16.mxu1 (!%p1228_p2), %vm1748_vm1, %v1747_v2  ;;  %v1618_v8 = vld [vmem:[%s2122_s1 + $0x38] sm:$0xff] (!%p1228_p2)   ;;  %v275_v10 = vld [vmem:[%s1865_s27 + $0x1] sm:$0xff] (!%p1228_p2)  ;;  %v1624_v18 = vld [vmem:[%s2122_s1 + $0x10] sm:$0xff] (!%p1228_p2)   ;;  %v978_v61 = vshrl.u32 (!%p1228_p2), %v977_v60, 7 }
  0x25   : > { %1442 = vmatpush3.bf16.msra.mxu0 (!%p1228_p2), %v1613_v3  ;;  %1395 = vmatprep.subr.bf16.mxu1 (!%p1228_p2), %v1747_v2  ;;  %v1619_v9 = vld [vmem:[%s2122_s1 + $0x98] sm:$0xff] (!%p1228_p2)   ;;  %v579_v11 = vld [vmem:[%s1865_s27 + $0x5] sm:$0xff] (!%p1228_p2)  ;;  %v276_v12 = vpack.c.bf16 (!%p1228_p2), %v275_v10, %v275_v10  ;;  %v1625_v19 = vld [vmem:[%s2122_s1 + $0xb0] sm:$0xff] (!%p1228_p2)  }
  0x26   : > { %1443 = vmatprep.subr.bf16.mxu0 (!%p1228_p2), %v1747_v2  ;;  %1449 = vmatprep.mubr.msk.bf16.mxu0 (!%p1228_p2), %vm1748_vm1, %v1747_v2  ;;  %v1620_v13 = vld [vmem:[%s2122_s1] sm:$0xff] (!%p1228_p2)   ;;  %v580_v14 = vpack.c.bf16 (!%p1228_p2), %v579_v11, %v579_v11  ;;  %v1622_v16 = vld [vmem:[%s2122_s1 + $0x8] sm:$0xff] (!%p1228_p2)   ;;  %v1626_v20 = vld [vmem:[%s2122_s1 + $0x18] sm:$0xff] (!%p1228_p2)   ;;  %v983_v62 = vand.u32 (!%p1228_p2), 3, %v978_v61 }
  0x27   : > { %v1621_v15 = vld [vmem:[%s2122_s1 + $0xa0] sm:$0xff] (!%p1228_p2)   ;;  %v1623_v17 = vld [vmem:[%s2122_s1 + $0xa8] sm:$0xff] (!%p1228_p2)   ;;  %v1627_v21 = vld [vmem:[%s2122_s1 + $0xb8] sm:$0xff] (!%p1228_p2)  }
  0x28   : > { %1396 = vmatpush3.bf16.msra.mxu1 (!%p1228_p2), %v1614_v4  ;;  %v265_v22 = vld [vmem:[%s1865_s27] sm:$0xff] (!%p1228_p2)  ;;  %v1630_v28 = vld [vmem:[%s2122_s1 + $0x48] sm:$0xff] (!%p1228_p2)   ;;  %v1632_v30 = vld [vmem:[%s2122_s1 + $0x50] sm:$0xff] (!%p1228_p2)   ;;  %vm991_vm3 = vcmp.lt.s32.totalorder (!%p1228_p2), %v983_v62, 2 }
  0x29   : > { %1444 = vmatpush3.bf16.msra.mxu0 (!%p1228_p2), %v1615_v5  ;;  %1397 = vmatprep.subr.bf16.mxu1 (!%p1228_p2), %v1747_v2  ;;  %v658_v23 = vld [vmem:[%s1865_s27 + $0x6] sm:$0xff] (!%p1228_p2)  ;;  %v266_v24 = vpack.c.bf16 (!%p1228_p2), %v265_v22, %v265_v22  ;;  %v1633_v31 = vld [vmem:[%s2122_s1 + $0xd0] sm:$0xff] (!%p1228_p2)   ;;  %v1634_v32 = vld [vmem:[%s2122_s1 + $0x58] sm:$0xff] (!%p1228_p2)  }
  0x2a   : > { %1445 = vmatprep.subr.bf16.mxu0 %v1747_v2  ;;  %v1628_v25 = vld [vmem:[%s2122_s1 + $0x40] sm:$0xff]   ;;  %v659_v26 = vpack.c.bf16 %v658_v23, %v658_v23  ;;  %v1631_v29 = vld [vmem:[%s2122_s1 + $0xc8] sm:$0xff]   ;;  %v1635_v34 = vld [vmem:[%s2122_s1 + $0xd8] sm:$0xff]  }
  0x2b   : > { %v1629_v27 = vld [vmem:[%s2122_s1 + $0xc0] sm:$0xff]   ;;  %v737_v35 = vld [vmem:[%s1865_s27 + $0x8] sm:$0xff]  ;;  %v1640_v42 = vld [vmem:[%s2122_s1 + $0x70] sm:$0xff]  }
  0x2c   : > { %1398 = vmatpush3.bf16.msra.mxu1 %v1616_v6  ;;  %v421_v33 = vld [vmem:[%s1865_s27 + $0x2] sm:$0xff]  ;;  %v738_v38 = vpack.c.bf16 %v737_v35, %v737_v35  ;;  %v1641_v43 = vld [vmem:[%s2122_s1 + $0xf0] sm:$0xff]   ;;  %v1642_v44 = vld [vmem:[%s2122_s1 + $0x78] sm:$0xff]  }
  0x2d   : > { %1446 = vmatpush3.bf16.msra.mxu0 %v1617_v7  ;;  %1399 = vmatprep.subr.bf16.mxu1 %v1747_v2  ;;  %v422_v36 = vpack.c.bf16 %v421_v33, %v421_v33  ;;  %v1636_v37 = vld [vmem:[%s2122_s1 + $0x60] sm:$0xff]   ;;  %v1638_v40 = vld [vmem:[%s2122_s1 + $0x68] sm:$0xff]   ;;  %v1643_v46 = vld [vmem:[%s2122_s1 + $0xf8] sm:$0xff]  }
  0x2e   : > { %1447 = vmatprep.subr.bf16.mxu0 %v1747_v2  ;;  %v1637_v39 = vld [vmem:[%s2122_s1 + $0xe0] sm:$0xff]   ;;  %v1639_v41 = vld [vmem:[%s2122_s1 + $0xe8] sm:$0xff]   ;;  %v1646_v52 = vld [vmem:[%s2122_s1 + $0x110] sm:$0xff]  }
  0x2f   : > { %v500_v45 = vld [vmem:[%s1865_s27 + $0x4] sm:$0xff]  ;;  %v1647_v53 = vld [vmem:[%s2122_s1 + $0x118] sm:$0xff]  }
  0x30   : > { %1400 = vmatpush3.bf16.msra.mxu1 %v1618_v8  ;;  %v816_v47 = vld [vmem:[%s1865_s27 + $0x9] sm:$0xff]  ;;  %v501_v48 = vpack.c.bf16 %v500_v45, %v500_v45  ;;  %v1644_v50 = vld [vmem:[%s2122_s1 + $0x100] sm:$0xff]  }
  0x31   : > { %1448 = vmatpush3.bf16.msra.mxu0 %v1619_v9  ;;  %1405 = vmatprep.subr.bf16.mxu1 %v1747_v2  ;;  %v817_v49 = vpack.c.bf16 %v816_v47, %v816_v47  ;;  %v1645_v51 = vld [vmem:[%s2122_s1 + $0x108] sm:$0xff]  }
  0x32   : > { %1453 = vmatprep.subr.bf16.mxu0 %v1747_v2  ;;  %v895_v54 = vld [vmem:[%s1865_s27 + $0xa] sm:$0xff]  ;;  %s975_s27 = scalar_lea.vmem [#allocation2], %s1338_s8 }
  0x33   : > { %1402 = vmatmul.mubr.msk.bf16.vlgmr.msra.gmra.mrb[0].mxu1 %vm310_vm2, %v276_v12  ;;  %v896_v55 = vpack.c.bf16 %v895_v54, %v895_v54 }
  0x34   : > { %1406 = vmatpush3.bf16.msra.mxu1 %v1620_v13  ;;  %1450 = vmatmul.mubr.msk.bf16.vlgmr.msra.gmra.mrb[0].mxu0 %vm310_vm2, %v580_v14 }
  0x35   : > { %1454 = vmatpush3.bf16.msra.mxu0 %v1621_v15  ;;  %1407 = vmatprep.subr.bf16.mxu1 %v1747_v2 }
  0x36   : > { %1455 = vmatprep.subr.bf16.mxu0 %v1747_v2  ;;  %1413 = vmatprep.mubr.msk.bf16.mxu1 %vm1748_vm1, %v1747_v2 }
  0x37   : > { %1461 = vmatprep.mubr.msk.bf16.mxu0 %vm1748_vm1, %v1747_v2 }
  0x38   : > { %1408 = vmatpush3.bf16.msra.mxu1 %v1622_v16 }
  0x39   : > { %1456 = vmatpush3.bf16.msra.mxu0 %v1623_v17  ;;  %1409 = vmatprep.subr.bf16.mxu1 %v1747_v2  ;;  %v997_v17 = vld [vmem:[#allocation3] sm:$0x1] }
  0x3a   : > { %1457 = vmatprep.subr.bf16.mxu0 %v1747_v2 }
  0x3c   : > { %1410 = vmatpush3.bf16.msra.mxu1 %v1624_v18 }
  0x3d   : > { %1458 = vmatpush3.bf16.msra.mxu0 %v1625_v19  ;;  %1411 = vmatprep.subr.bf16.mxu1 %v1747_v2 }
  0x3e   : > { %1459 = vmatprep.subr.bf16.mxu0 %v1747_v2 }
  0x40   : > { %1412 = vmatpush3.bf16.msra.mxu1 %v1626_v20  ;;  %v1008_v20 = vld [vmem:[#allocation4] sm:$0x1] }
  0x41   : > { %1460 = vmatpush3.bf16.msra.mxu0 %v1627_v21  ;;  %1417 = vmatprep.subr.bf16.mxu1 %v1747_v2 }
  0x42   : > { %1465 = vmatprep.subr.bf16.mxu0 %v1747_v2 }
  0x43   : > { %1414 = vmatmul.mubr.msk.bf16.vlgmr.msra.gmra.mrb[0].mxu1 %vm310_vm2, %v266_v24 }
  0x44   : > { %1418 = vmatpush3.bf16.msra.mxu1 %v1628_v25  ;;  %1462 = vmatmul.mubr.msk.bf16.vlgmr.msra.gmra.mrb[0].mxu0 %vm310_vm2, %v659_v26 }
  0x45   : > { %1466 = vmatpush3.bf16.msra.mxu0 %v1629_v27  ;;  %1419 = vmatprep.subr.bf16.mxu1 %v1747_v2 }
  0x46   : > { %1467 = vmatprep.subr.bf16.mxu0 %v1747_v2  ;;  %1425 = vmatprep.mubr.msk.bf16.mxu1 %vm1748_vm1, %v1747_v2 }
  0x47   : > { %1473 = vmatprep.mubr.msk.bf16.mxu0 %vm1748_vm1, %v1747_v2 }
  0x48   : > { %1420 = vmatpush3.bf16.msra.mxu1 %v1630_v28 }
  0x49   : > { %1468 = vmatpush3.bf16.msra.mxu0 %v1631_v29  ;;  %1421 = vmatprep.subr.bf16.mxu1 %v1747_v2 }
  0x4a   : > { %1469 = vmatprep.subr.bf16.mxu0 %v1747_v2 }
  0x4c   : > { %1422 = vmatpush3.bf16.msra.mxu1 %v1632_v30 }
  0x4d   : > { %1470 = vmatpush3.bf16.msra.mxu0 %v1633_v31  ;;  %1423 = vmatprep.subr.bf16.mxu1 %v1747_v2 }
  0x4e   : > { %1471 = vmatprep.subr.bf16.mxu0 %v1747_v2 }
  0x50   : > { %1424 = vmatpush3.bf16.msra.mxu1 %v1634_v32 }
  0x51   : > { %1472 = vmatpush3.bf16.msra.mxu0 %v1635_v34  ;;  %1429 = vmatprep.subr.bf16.mxu1 %v1747_v2 }
  0x52   : > { %1477 = vmatprep.subr.bf16.mxu0 %v1747_v2 }
  0x53   : > { %1426 = vmatmul.mubr.msk.bf16.vlgmr.msra.gmra.mrb[0].mxu1 %vm310_vm2, %v422_v36 }
  0x54   : > { %1430 = vmatpush3.bf16.msra.mxu1 %v1636_v37  ;;  %1474 = vmatmul.mubr.msk.bf16.vlgmr.msra.gmra.mrb[0].mxu0 %vm310_vm2, %v738_v38 }
  0x55   : > { %1478 = vmatpush3.bf16.msra.mxu0 %v1637_v39  ;;  %1431 = vmatprep.subr.bf16.mxu1 %v1747_v2 }
  0x56   : > { %1479 = vmatprep.subr.bf16.mxu0 %v1747_v2  ;;  %1437 = vmatprep.mubr.msk.bf16.mxu1 %vm1748_vm1, %v1747_v2 }
  0x57   : > { %1485 = vmatprep.mubr.msk.bf16.mxu0 %vm1748_vm1, %v1747_v2 }
  0x58   : > { %1432 = vmatpush3.bf16.msra.mxu1 %v1638_v40 }
  0x59   : > { %1480 = vmatpush3.bf16.msra.mxu0 %v1639_v41  ;;  %1433 = vmatprep.subr.bf16.mxu1 %v1747_v2 }
  0x5a   : > { %1481 = vmatprep.subr.bf16.mxu0 %v1747_v2 }
  0x5c   : > { %1434 = vmatpush3.bf16.msra.mxu1 %v1640_v42 }
  0x5d   : > { %1482 = vmatpush3.bf16.msra.mxu0 %v1641_v43  ;;  %1435 = vmatprep.subr.bf16.mxu1 %v1747_v2 }
  0x5e   : > { %1483 = vmatprep.subr.bf16.mxu0 %v1747_v2 }
  0x60   : > { %1436 = vmatpush3.bf16.msra.mxu1 %v1642_v44 }
  0x61   : > { %1484 = vmatpush3.bf16.msra.mxu0 %v1643_v46 }
  0x62   : > { %1489 = vmatprep.subr.bf16.mxu0 %v1747_v2 }
  0x63   : > { %1438 = vmatmul.mubr.msk.bf16.vlgmr.msra.gmra.mrb[0].mxu1 %vm310_vm2, %v501_v48 }
  0x64   : > { %1486 = vmatmul.mubr.msk.bf16.vlgmr.msra.gmra.mrb[0].mxu0 %vm310_vm2, %v817_v49 }
  0x65   : > { %1490 = vmatpush3.bf16.msra.mxu0 %v1644_v50  ;;  %1497 = vmatprep.mubr.msk.bf16.mxu0 %vm1748_vm1, %v1747_v2 }
  0x66   : > { %1491 = vmatprep.subr.bf16.mxu0 %v1747_v2 }
  0x69   : > { %1492 = vmatpush3.bf16.msra.mxu0 %v1645_v51 }
  0x6a   : > { %1493 = vmatprep.subr.bf16.mxu0 %v1747_v2 }
  0x6d   : > { %1494 = vmatpush3.bf16.msra.mxu0 %v1646_v52 }
  0x6e   : > { %1495 = vmatprep.subr.bf16.mxu0 %v1747_v2 }
  0x71   : > { %1496 = vmatpush3.bf16.msra.mxu0 %v1647_v53 }
  0x74   : > { %1498 = vmatmul.mubr.msk.bf16.vlgmr.msra.gmra.mrb[0].mxu0 %vm310_vm2, %v896_v55 }
 0x136   : > { %v572_v56 = vpop.f32.mrb[0].mxu1 }
 0x137   : > { %v1439_v57 = vpop.f32.mrb[1].mxu1 }
 0x138   : > { %v575_v58 = vpop.f32.mrb[2].mxu1 }
 0x139   : > { %v1440_v59 = vpop.f32.mrb[3].mxu1 }
 0x147   : > { %v967_v63 = vpop.f32.mrb[0].mxu0 }
 0x148   : > { %v1506_v0 = vadd.f32 %v967_v63, %v572_v56  ;;  %v1499_v1 = vpop.f32.mrb[1].mxu0 }
 0x149   : > { %v970_v3 = vpop.f32.mrb[2].mxu0 }
 0x14a   : > { %976 = vst.msk [vmem:[%s975_s27] sm:$0xff] %vm310_vm2, %v1506_v0  ;;  %v996_v2 = vsel %vm991_vm3, %v1506_v0, 0.0  ;;  %v1500_v4 = vpop.f32.mrb[3].mxu0 }
 0x14b   : > { %v998_v5 = vsel %vm310_vm2, %v996_v2, 0.0  ;;  %v1009_v6 = vmul.f32 %v996_v2, %v996_v2 }
 0x14c   : > { %v999_v7 = vrot.slane %v998_v5, 4 }
 0x14d   : > { %v1010_v8 = vsel %vm310_vm2, %v1009_v6, 0.0 }
 0x14e   : > { %v1000_v9 = vadd.f32 %v999_v7, %v998_v5  ;;  %v1011_v10 = vrot.slane %v1010_v8, 4 }
 0x150   : > { %v1001_v11 = vrot.slane %v1000_v9, 2  ;;  %v1012_v12 = vadd.f32 %v1011_v10, %v1010_v8 }
 0x152   : > { %v1002_v13 = vadd.f32 %v1001_v11, %v1000_v9  ;;  %v1013_v14 = vrot.slane %v1012_v12, 2 }
 0x154   : > { %v1003_v15 = vrot.slane %v1002_v13, 1  ;;  %v1014_v16 = vadd.f32 %v1013_v14, %v1012_v12 }
 0x156   : > { %v1004_v18 = vadd.f32 %v1003_v15, %v1002_v13  ;;  %v1015_v19 = vrot.slane %v1014_v16, 1 }
 0x158   : > { %v1005_v21 = vadd.f32 %v1004_v18, %v997_v17  ;;  %v1016_v22 = vadd.f32 %v1015_v19, %v1014_v16 }
 0x15a   : > { %1007 = vst.msk [vmem:[#allocation3] sm:$0x1] %vm1006_vm4, %v1005_v21  ;;  %v1017_v23 = vadd.f32 %v1016_v22, %v1008_v20 }
 0x15c   : > { %1018 = vst.msk [vmem:[#allocation4] sm:$0x1] %vm1006_vm4, %v1017_v23 }
 0x15d PF: > { %p1339_p3 = scmp.ne.s32.totalorder %s1732_s22, 1 }
 0x15e   : > { %v1749_v26 = vmov (!%p1339_p3), 0.0   ;;  %vm1750_vm5 = vmmov (!%p1339_p3), 0   ;;  %v1041_v33 = vlaneseq (!%p1339_p3)  ;;  %s1340_s9 = sshll.u32 (!%p1339_p3), %s1728_s21, 3  ;;  %v1032_v35 = vld [vmem:[%s2123_s2] sm:$0x1] (!%p1339_p3)  ;;  %vm1056_vm6 = vcmask (!%p1339_p3), 64512  }
 0x15f   : > { %1022 = sbr.rel (%p1339_p3) target bundleno = 601 (0x259), region = 52  ;;  %1501 = vmatprep.subr.mxu0 (!%p1339_p3), %v1749_v26  ;;  %1503 = vmatprep.mubr.msk.f32.mxu0 (!%p1339_p3), %vm1750_vm5, %v1749_v26  ;;  %v1034_v39 = vld [vmem:[%s2124_s3] sm:$0x1] (!%p1339_p3)  ;;  %s1038_s17 = scalar_lea.vmem (!%p1339_p3), [#allocation2], %s1340_s9  ;;  %vm1130_vm7 = vcmask (!%p1339_p3), 519168  }
 0x160   : > { %v1042_v34 = vshrl.u32 (!%p1339_p3), %v1041_v33, 7  ;;  %v1039_v40 = vld [vmem:[%s1038_s17] sm:$0xff] (!%p1339_p3) }
 0x161   : > { %v1023_v24 = vld [vmem:[#allocation3] sm:$0x1] (!%p1339_p3)  ;;  %v1055_v48 = vld [vmem:[%s2125_s4] sm:$0xf] (!%p1339_p3) }
 0x162   : > { %v1024_v27 = vmul.f32 (!%p1339_p3), 0.125, %v1023_v24  ;;  %v1043_v36 = vsub.s32 (!%p1339_p3), 0, %v1042_v34 }
 0x163   : > { %v1025_v25 = vld [vmem:[#allocation4] sm:$0x1] (!%p1339_p3) }
 0x164   : > { %v1026_v28 = vmul.f32 (!%p1339_p3), 0.125, %v1025_v25  ;;  %v1027_v29 = vmul.f32 (!%p1339_p3), %v1024_v27, %v1024_v27 }
 0x166   : > { %v1028_v30 = vsub.f32 %v1026_v28, %v1027_v29 }
 0x168   : > { %v1029_v31 = vmax.f32 %v1028_v30, 0.0 }
 0x16a   : > { %v1030_v32 = vadd.f32 1e-05, %v1029_v31 }
 0x16c   : > { %1648 = vrsqrt.f32 %v1030_v32 }
 0x176   : > { %v1649_v37 = vpop.eup %1648 }
 0x177   : > { %v1033_v38 = vmul.f32 %v1649_v37, %v1032_v35 }
 0x179   : > { %v1035_v41 = vmul.f32 %v1033_v38, %v1024_v27  ;;  %v1044_v42 = vrot.slane %v1033_v38, %v1043_v36 }
 0x17b   : > { %v1036_v43 = vsub.f32 %v1034_v39, %v1035_v41  ;;  %v1046_v44 = vmul.f32 %v1044_v42, %v1039_v40 }
 0x17d   : > { %v1051_v45 = vrot.slane %v1036_v43, %v1043_v36 }
 0x17f   : > { %v1053_v46 = vadd.f32 %v1051_v45, %v1046_v44 }
 0x181   : > { %v1054_v47 = vmax.f32 %v1053_v46, 0.0 }
 0x183   : > { %1502 = vmatpush3.msra.mxu0 %v1054_v47 }
 0x184   : > { %1504 = vmatmul.mubr.msk.f32.vlgmr.msra.gmra.mrb[0].mxu0 %vm1056_vm6, %v1055_v48 }
 0x257   : > { %v1126_v49 = vpop.f32.mrb[0].mxu0 }
 0x258   : > { %1131 = vst.msk [vmem:[%s241_s30] sm:$0xf] %vm1130_vm7, %v1126_v49  ;;  %v1505_v50 = vpop.f32.mrb[1].mxu0 }
 0x259 PF: > { %s1140_s27 = smul.u32 %s1728_s21, %s1732_s22  ;;  %s1147_s9 = sshll.u32 %s241_s30, 4  ;;  %s2070_s9 = int_to_ptr.vmem [resolvable:$true] %s1147_s9 }
 0x25a   : > { %s1133_s17 = scalar_lea.sflag [#allocation6], %s239_s12  ;;  %s1650_s26 = scalar_lea.vmem %s2070_s9, 64 }
 0x25b   : > { %s1343_s10 = sshll.u32 %s1140_s27, 6  ;;  %p1651_p4 = scmp.ne.s32.totalorder %s2070_s9, %s1650_s26 }
 0x25c   : > { %s1145_s16 = scalar_lea.hbm %s2126_s5, %s1343_s10  ;;  %s1751_s21 = smov [#allocation5]  }
 0x25d   : > { %p1652_p5 = pnand %p1651_p4, %p1835_p6  ;;  %s1654_s22 = sshll.u32 %s1751_s21, 4  ;;  %s1655_s22 = int_to_ptr.vmem [resolvable:$false] %s1654_s22 }
 0x25e   : > { %s1656_s14 = scalar_lea.vmem %s1655_s22, 128  ;;  %p1657_p9 = scmp.lt.s32.totalorder %s2070_s9, %s1655_s22 }
 0x25f   : > { %p1653_p7 = pneg %p1652_p5  ;;  %p1658_p10 = scmp.lt.s32.totalorder %s1656_s14, %s1650_s26 }
 0x261   : > { %p1659_p11 = por %p1658_p10, %p1657_p9 }
 0x263   : > { %p1660_p12 = pnand %p1659_p11, %p1653_p7 }
 0x265   : > { %1663 = shalt.err (!%p1660_p12)
}
 0x266   : > { %s1664_s30 = scalar_lea.hbm %s1145_s16, 64  ;;  %s1668_s27 = scalar_lea.hbm %s2126_s5, 128 }
 0x267   : > { %p1665_p13 = scmp.ne.s32.totalorder %s1145_s16, %s1664_s30  ;;  %p1669_p2 = scmp.lt.u32.totalorder %s1145_s16, %s2126_s5 }
 0x268   : > { %p1670_p3 = scmp.lt.u32.totalorder %s1668_s27, %s1664_s30  ;;  %p1672_p5 = scmp.lt.u32.totalorder %s1664_s30, %s1145_s16 }
 0x269   : > { %p1666_p0 = pnand %p1665_p13, %p1835_p6 }
 0x26a   : > { %p1671_p4 = por %p1670_p3, %p1669_p2 }
 0x26b   : > { %p1667_p1 = pneg %p1666_p0 }
 0x26c   : > { %p1673_p9 = por %p1672_p5, %p1671_p4 }
 0x26e   : > { %p1674_p7 = pnand %p1673_p9, %p1667_p1 }
 0x270   : > { %1677 = shalt.err (!%p1674_p7)
}
 0x271   : > { %1536 = dma.vmem_to_hbm [thread:$0]  (%p1835_p6), %s2070_s9, 64, %s1145_s16, %s1133_s17  }
 0x272 PF: > { %p1542_p10 = scmp.ge.s32.totalorder %s1744_s25, 2  ;;  %s1159_s15 = sand.u32 1, %s1716_s18  }
 0x273   : > { %s1160_s26 = scalar_lea.sflag [#allocation6], %s1159_s15 }
 0x274   : > { %p1539_p11 = pnand %p1542_p10, %p1842_p8 }
 0x276   : > { %1711 = dma.done.wait (!%p1539_p11), %s1160_s26, 64  }
 0x277   : > { %1713 = vsyncadd (!%p1539_p11), %s1160_s26, 4294967232  ;;  %s18_s25 = sadd.s32 1, %s1744_s25   ;;  %s2129_s18 = smov %s1720_s19 }
 0x278   : > { %p15_p12 = scmp.ge.s32.totalorder %s18_s25, 6   ;;  %s2130_s19 = smov %s1724_s20 }
 0x279   : > { %s2131_s20 = smov %s1851_s11  ;;  %s2132_s21 = smov %s1736_s23 }
 0x27a   : > { %s2133_s22 = smov %s1740_s24  ;;  %s2134_s23 = smov %s2137_s28 }
 0x27b   : > { %s2135_s24 = smov %s2141_s29  ;;  %17 = sbr.rel (!%p15_p12) target bundleno = 5 (0x5), region = 97 }
 0x282   :  { %1165 = vsyncpa [#allocation6], 1 }
 0x283   :  { %1167 = vsyncpa [#allocation6 + $0x1], 1 }

// kernel: cnn_encoder.6
= control target key start
LH: loop header
LB: loop body
LE: loop exit
PB: predicated region body
PF: predicated region fallthrough
CT: control target
= control target key end

     0   :  { %s1677_s18 = smov 0   ;;  %s1679_s19 = smov 0   ;;  %s1939_s0 = inlined_call_operand.vmem [shape: f32[2,24,64], index: 0, kind: input, shape index: {}]   ;;  %s1940_s1 = inlined_call_operand.vmem [shape: bf16[9,64,64], index: 1, kind: input, shape index: {}]   ;;  %s1941_s2 = inlined_call_operand.vmem [shape: f32[1,64], index: 2, kind: input, shape index: {}]   ;;  %s1942_s3 = inlined_call_operand.vmem [shape: f32[1,64], index: 3, kind: input, shape index: {}]   ;;  %s1943_s4 = inlined_call_operand.vmem [shape: f32[4,8], index: 4, kind: input, shape index: {}]   ;;  %s1944_s5 = inlined_call_operand.vmem [shape: f32[2,4,64], index: 5, kind: output, shape index: {}]  }
   0x1   :  { %s1681_s20 = smov 0   ;;  %s1683_s21 = smov 0  }
   0x2   :  { %s1685_s22 = smov 0  }
   0x3 LB: > { %s24_s23 = sadd.s32 1, %s1632_s20  ;;  %s27_s24 = sadd.s32 1, %s1636_s21  ;;  %s1640_s22 = sphi %s1685_s22, %s15_s22   ;;  %s1636_s21 = sphi %s1683_s21, %s1948_s21   ;;  %s1632_s20 = sphi %s1681_s20, %s1947_s20   ;;  %s1628_s19 = sphi %s1679_s19, %s1946_s19   ;;  %s1624_s18 = sphi %s1677_s18, %s1945_s18  }
   0x4   : > { %p25_p0 = scmp.ge.s32.totalorder %s24_s23, 2  ;;  %p1210_p1 = scmp.ge.s32.totalorder %s1640_s22, 1 }
   0x5   : > { %p209_p2 = scmp.lt.s32.totalorder %s1640_s22, 5 }
   0x6   : > { %s1950_s23 = smov (%p25_p0, %s24_s23), 0  ;;  %s1952_s24 = smov (!%p25_p0, %s27_s24), %s1636_s21 }
   0x7   : > { %p210_p3 = pnand %p1210_p1, %p209_p2  ;;  %p29_p4 = scmp.ge.s32.totalorder %s1952_s24, 2 }
   0x8   : > { %s239_s25 = ssub.s32 (!%p210_p3), 1, %s1628_s19  ;;  %s248_s26 = smul.u32 (!%p210_p3), %s1624_s18, %s1628_s19 }
   0x9   : > { %s1954_s24 = smov (%p29_p4, %s1952_s24), 0  ;;  %213 = sbr.rel (%p210_p3) target bundleno = 593 (0x251), region = 40 }
   0xa   : > { %s240_s27 = smul.u32 (!%p210_p3), %s1624_s18, %s239_s25  ;;  %p255_p5 = scmp.eq.s32.totalorder (!%p210_p3), %s1628_s19, 0 }
   0xb   : > { %p249_p6 = scmp.lt.s32.totalorder (!%p210_p3), %s248_s26, 1  ;;  %p256_p7 = scmp.eq.s32.totalorder (!%p210_p3), %s1624_s18, 0 }
   0xc   : > { %p241_p8 = scmp.lt.s32.totalorder (!%p210_p3), %s240_s27, 1 }
   0xd   : > { %p257_p9 = pnand (!%p210_p3), %p256_p7, %p255_p5 }
  0x10   : > { %s1956_s26 = smov (!%p249_p6, %s248_s26), 1  ;;  %s1958_s27 = smov (!%p241_p8, %s240_s27), 1 }
  0x11   : > { %s1212_s28 = sshll.u32 %s1956_s26, 2  ;;  %s1518_s29 = smul.u32 24, %s1958_s27  ;;  %vm261_vm0 = vcmask (!%p257_p9), 516096   ;;  %v1642_v0 = vmov (!%p257_p9), 0.0  }
  0x12   : > { %s1720_s7 = scalar_lea.vmem %s1944_s5, %s1212_s28  ;;  %260 = sbr.rel (%p257_p9) target bundleno = 25 (0x19), region = 44  ;;  %262 = vst.msk [vmem:[#allocation3] sm:$0x1] (!%p257_p9), %vm261_vm0, %v1642_v0  ;;  %263 = vst.msk [vmem:[#allocation4] sm:$0x1] (!%p257_p9), %vm261_vm0, %v1642_v0 }
  0x13   : > { %s1725_s10 = scalar_lea.vmem %s1939_s0, %s1518_s29 }
  0x19 PF: > { %p1213_p10 = scmp.ne.s32.totalorder %s1628_s19, 0 }
  0x1a   : > { %v1564_v1 = vld [vmem:[%s1940_s1 + $0x20] sm:$0xff] (!%p1213_p10)   ;;  %v1643_v2 = vmov (!%p1213_p10), 0.0   ;;  %v1566_v4 = vld [vmem:[%s1940_s1 + $0x28] sm:$0xff] (!%p1213_p10)   ;;  %vm1644_vm1 = vmmov (!%p1213_p10), 0   ;;  %v1568_v6 = vld [vmem:[%s1940_s1 + $0x30] sm:$0xff] (!%p1213_p10)   ;;  %vm312_vm2 = vcmask (!%p1213_p10), 523264   ;;  %v979_v60 = vlaneseq (!%p1213_p10) }
  0x1b   : > { %266 = sbr.rel (%p1213_p10) target bundleno = 341 (0x155), region = 48  ;;  %1376 = vmatprep.subr.bf16.mxu1 (!%p1213_p10), %v1643_v2  ;;  %1424 = vmatprep.subr.bf16.mxu0 (!%p1213_p10), %v1643_v2  ;;  %v1565_v3 = vld [vmem:[%s1940_s1 + $0x80] sm:$0xff] (!%p1213_p10)   ;;  %v1567_v5 = vld [vmem:[%s1940_s1 + $0x88] sm:$0xff] (!%p1213_p10)   ;;  %v1569_v7 = vld [vmem:[%s1940_s1 + $0x90] sm:$0xff] (!%p1213_p10)   ;;  %s1323_s26 = sshll.u32 (!%p1213_p10), %s1624_s18, 3  ;;  %vm1008_vm4 = vcmask (!%p1213_p10), 516096  }
  0x1c   : > { %1377 = vmatpush3.bf16.msra.mxu1 (!%p1213_p10), %v1564_v1  ;;  %1384 = vmatprep.mubr.msk.bf16.mxu1 (!%p1213_p10), %vm1644_vm1, %v1643_v2  ;;  %v1570_v8 = vld [vmem:[%s1940_s1 + $0x38] sm:$0xff] (!%p1213_p10)   ;;  %v277_v10 = vld [vmem:[%s1725_s10 + $0x1] sm:$0xff] (!%p1213_p10)  ;;  %v1576_v18 = vld [vmem:[%s1940_s1 + $0x10] sm:$0xff] (!%p1213_p10)   ;;  %v980_v61 = vshrl.u32 (!%p1213_p10), %v979_v60, 7 }
  0x1d   : > { %1425 = vmatpush3.bf16.msra.mxu0 (!%p1213_p10), %v1565_v3  ;;  %1378 = vmatprep.subr.bf16.mxu1 (!%p1213_p10), %v1643_v2  ;;  %v1571_v9 = vld [vmem:[%s1940_s1 + $0x98] sm:$0xff] (!%p1213_p10)   ;;  %v581_v11 = vld [vmem:[%s1725_s10 + $0x5] sm:$0xff] (!%p1213_p10)  ;;  %v278_v12 = vpack.c.bf16 (!%p1213_p10), %v277_v10, %v277_v10  ;;  %v1577_v19 = vld [vmem:[%s1940_s1 + $0xb0] sm:$0xff] (!%p1213_p10)  }
  0x1e   : > { %1426 = vmatprep.subr.bf16.mxu0 (!%p1213_p10), %v1643_v2  ;;  %1432 = vmatprep.mubr.msk.bf16.mxu0 (!%p1213_p10), %vm1644_vm1, %v1643_v2  ;;  %v1572_v13 = vld [vmem:[%s1940_s1] sm:$0xff] (!%p1213_p10)   ;;  %v582_v14 = vpack.c.bf16 (!%p1213_p10), %v581_v11, %v581_v11  ;;  %v1574_v16 = vld [vmem:[%s1940_s1 + $0x8] sm:$0xff] (!%p1213_p10)   ;;  %v1578_v20 = vld [vmem:[%s1940_s1 + $0x18] sm:$0xff] (!%p1213_p10)   ;;  %v985_v62 = vand.u32 (!%p1213_p10), 3, %v980_v61 }
  0x1f   : > { %v1573_v15 = vld [vmem:[%s1940_s1 + $0xa0] sm:$0xff] (!%p1213_p10)   ;;  %v1575_v17 = vld [vmem:[%s1940_s1 + $0xa8] sm:$0xff] (!%p1213_p10)   ;;  %v1579_v21 = vld [vmem:[%s1940_s1 + $0xb8] sm:$0xff] (!%p1213_p10)  }
  0x20   : > { %1379 = vmatpush3.bf16.msra.mxu1 (!%p1213_p10), %v1566_v4  ;;  %v267_v22 = vld [vmem:[%s1725_s10] sm:$0xff] (!%p1213_p10)  ;;  %v1582_v28 = vld [vmem:[%s1940_s1 + $0x48] sm:$0xff] (!%p1213_p10)   ;;  %v1584_v30 = vld [vmem:[%s1940_s1 + $0x50] sm:$0xff] (!%p1213_p10)   ;;  %vm993_vm3 = vcmp.lt.s32.totalorder (!%p1213_p10), %v985_v62, 2 }
  0x21   : > { %1427 = vmatpush3.bf16.msra.mxu0 (!%p1213_p10), %v1567_v5  ;;  %1380 = vmatprep.subr.bf16.mxu1 (!%p1213_p10), %v1643_v2  ;;  %v660_v23 = vld [vmem:[%s1725_s10 + $0x6] sm:$0xff] (!%p1213_p10)  ;;  %v268_v24 = vpack.c.bf16 (!%p1213_p10), %v267_v22, %v267_v22  ;;  %v1585_v31 = vld [vmem:[%s1940_s1 + $0xd0] sm:$0xff] (!%p1213_p10)   ;;  %v1586_v32 = vld [vmem:[%s1940_s1 + $0x58] sm:$0xff] (!%p1213_p10)  }
  0x22   : > { %1428 = vmatprep.subr.bf16.mxu0 %v1643_v2  ;;  %v1580_v25 = vld [vmem:[%s1940_s1 + $0x40] sm:$0xff]   ;;  %v661_v26 = vpack.c.bf16 %v660_v23, %v660_v23  ;;  %v1583_v29 = vld [vmem:[%s1940_s1 + $0xc8] sm:$0xff]   ;;  %v1587_v34 = vld [vmem:[%s1940_s1 + $0xd8] sm:$0xff]  }
  0x23   : > { %v1581_v27 = vld [vmem:[%s1940_s1 + $0xc0] sm:$0xff]   ;;  %v739_v35 = vld [vmem:[%s1725_s10 + $0x8] sm:$0xff]  ;;  %v1592_v42 = vld [vmem:[%s1940_s1 + $0x70] sm:$0xff]  }
  0x24   : > { %1381 = vmatpush3.bf16.msra.mxu1 %v1568_v6  ;;  %v423_v33 = vld [vmem:[%s1725_s10 + $0x2] sm:$0xff]  ;;  %v740_v38 = vpack.c.bf16 %v739_v35, %v739_v35  ;;  %v1593_v43 = vld [vmem:[%s1940_s1 + $0xf0] sm:$0xff]   ;;  %v1594_v44 = vld [vmem:[%s1940_s1 + $0x78] sm:$0xff]  }
  0x25   : > { %1429 = vmatpush3.bf16.msra.mxu0 %v1569_v7  ;;  %1382 = vmatprep.subr.bf16.mxu1 %v1643_v2  ;;  %v424_v36 = vpack.c.bf16 %v423_v33, %v423_v33  ;;  %v1588_v37 = vld [vmem:[%s1940_s1 + $0x60] sm:$0xff]   ;;  %v1590_v40 = vld [vmem:[%s1940_s1 + $0x68] sm:$0xff]   ;;  %v1595_v46 = vld [vmem:[%s1940_s1 + $0xf8] sm:$0xff]  }
  0x26   : > { %1430 = vmatprep.subr.bf16.mxu0 %v1643_v2  ;;  %v1589_v39 = vld [vmem:[%s1940_s1 + $0xe0] sm:$0xff]   ;;  %v1591_v41 = vld [vmem:[%s1940_s1 + $0xe8] sm:$0xff]   ;;  %v1598_v52 = vld [vmem:[%s1940_s1 + $0x110] sm:$0xff]  }
  0x27   : > { %v502_v45 = vld [vmem:[%s1725_s10 + $0x4] sm:$0xff]  ;;  %v1599_v53 = vld [vmem:[%s1940_s1 + $0x118] sm:$0xff]  }
  0x28   : > { %1383 = vmatpush3.bf16.msra.mxu1 %v1570_v8  ;;  %v818_v47 = vld [vmem:[%s1725_s10 + $0x9] sm:$0xff]  ;;  %v503_v48 = vpack.c.bf16 %v502_v45, %v502_v45  ;;  %v1596_v50 = vld [vmem:[%s1940_s1 + $0x100] sm:$0xff]  }
  0x29   : > { %1431 = vmatpush3.bf16.msra.mxu0 %v1571_v9  ;;  %1388 = vmatprep.subr.bf16.mxu1 %v1643_v2  ;;  %v819_v49 = vpack.c.bf16 %v818_v47, %v818_v47  ;;  %v1597_v51 = vld [vmem:[%s1940_s1 + $0x108] sm:$0xff]  }
  0x2a   : > { %1436 = vmatprep.subr.bf16.mxu0 %v1643_v2  ;;  %v897_v54 = vld [vmem:[%s1725_s10 + $0xa] sm:$0xff]  ;;  %s977_s10 = scalar_lea.vmem [#allocation2], %s1323_s26 }
  0x2b   : > { %1385 = vmatmul.mubr.msk.bf16.vlgmr.msra.gmra.mrb[0].mxu1 %vm312_vm2, %v278_v12  ;;  %v898_v55 = vpack.c.bf16 %v897_v54, %v897_v54 }
  0x2c   : > { %1389 = vmatpush3.bf16.msra.mxu1 %v1572_v13  ;;  %1433 = vmatmul.mubr.msk.bf16.vlgmr.msra.gmra.mrb[0].mxu0 %vm312_vm2, %v582_v14 }
  0x2d   : > { %1437 = vmatpush3.bf16.msra.mxu0 %v1573_v15  ;;  %1390 = vmatprep.subr.bf16.mxu1 %v1643_v2 }
  0x2e   : > { %1438 = vmatprep.subr.bf16.mxu0 %v1643_v2  ;;  %1396 = vmatprep.mubr.msk.bf16.mxu1 %vm1644_vm1, %v1643_v2 }
  0x2f   : > { %1444 = vmatprep.mubr.msk.bf16.mxu0 %vm1644_vm1, %v1643_v2 }
  0x30   : > { %1391 = vmatpush3.bf16.msra.mxu1 %v1574_v16 }
  0x31   : > { %1439 = vmatpush3.bf16.msra.mxu0 %v1575_v17  ;;  %1392 = vmatprep.subr.bf16.mxu1 %v1643_v2  ;;  %v999_v17 = vld [vmem:[#allocation3] sm:$0x1] }
  0x32   : > { %1440 = vmatprep.subr.bf16.mxu0 %v1643_v2 }
  0x34   : > { %1393 = vmatpush3.bf16.msra.mxu1 %v1576_v18 }
  0x35   : > { %1441 = vmatpush3.bf16.msra.mxu0 %v1577_v19  ;;  %1394 = vmatprep.subr.bf16.mxu1 %v1643_v2 }
  0x36   : > { %1442 = vmatprep.subr.bf16.mxu0 %v1643_v2 }
  0x38   : > { %1395 = vmatpush3.bf16.msra.mxu1 %v1578_v20  ;;  %v1010_v20 = vld [vmem:[#allocation4] sm:$0x1] }
  0x39   : > { %1443 = vmatpush3.bf16.msra.mxu0 %v1579_v21  ;;  %1400 = vmatprep.subr.bf16.mxu1 %v1643_v2 }
  0x3a   : > { %1448 = vmatprep.subr.bf16.mxu0 %v1643_v2 }
  0x3b   : > { %1397 = vmatmul.mubr.msk.bf16.vlgmr.msra.gmra.mrb[0].mxu1 %vm312_vm2, %v268_v24 }
  0x3c   : > { %1401 = vmatpush3.bf16.msra.mxu1 %v1580_v25  ;;  %1445 = vmatmul.mubr.msk.bf16.vlgmr.msra.gmra.mrb[0].mxu0 %vm312_vm2, %v661_v26 }
  0x3d   : > { %1449 = vmatpush3.bf16.msra.mxu0 %v1581_v27  ;;  %1402 = vmatprep.subr.bf16.mxu1 %v1643_v2 }
  0x3e   : > { %1450 = vmatprep.subr.bf16.mxu0 %v1643_v2  ;;  %1408 = vmatprep.mubr.msk.bf16.mxu1 %vm1644_vm1, %v1643_v2 }
  0x3f   : > { %1456 = vmatprep.mubr.msk.bf16.mxu0 %vm1644_vm1, %v1643_v2 }
  0x40   : > { %1403 = vmatpush3.bf16.msra.mxu1 %v1582_v28 }
  0x41   : > { %1451 = vmatpush3.bf16.msra.mxu0 %v1583_v29  ;;  %1404 = vmatprep.subr.bf16.mxu1 %v1643_v2 }
  0x42   : > { %1452 = vmatprep.subr.bf16.mxu0 %v1643_v2 }
  0x44   : > { %1405 = vmatpush3.bf16.msra.mxu1 %v1584_v30 }
  0x45   : > { %1453 = vmatpush3.bf16.msra.mxu0 %v1585_v31  ;;  %1406 = vmatprep.subr.bf16.mxu1 %v1643_v2 }
  0x46   : > { %1454 = vmatprep.subr.bf16.mxu0 %v1643_v2 }
  0x48   : > { %1407 = vmatpush3.bf16.msra.mxu1 %v1586_v32 }
  0x49   : > { %1455 = vmatpush3.bf16.msra.mxu0 %v1587_v34  ;;  %1412 = vmatprep.subr.bf16.mxu1 %v1643_v2 }
  0x4a   : > { %1460 = vmatprep.subr.bf16.mxu0 %v1643_v2 }
  0x4b   : > { %1409 = vmatmul.mubr.msk.bf16.vlgmr.msra.gmra.mrb[0].mxu1 %vm312_vm2, %v424_v36 }
  0x4c   : > { %1413 = vmatpush3.bf16.msra.mxu1 %v1588_v37  ;;  %1457 = vmatmul.mubr.msk.bf16.vlgmr.msra.gmra.mrb[0].mxu0 %vm312_vm2, %v740_v38 }
  0x4d   : > { %1461 = vmatpush3.bf16.msra.mxu0 %v1589_v39  ;;  %1414 = vmatprep.subr.bf16.mxu1 %v1643_v2 }
  0x4e   : > { %1462 = vmatprep.subr.bf16.mxu0 %v1643_v2  ;;  %1420 = vmatprep.mubr.msk.bf16.mxu1 %vm1644_vm1, %v1643_v2 }
  0x4f   : > { %1468 = vmatprep.mubr.msk.bf16.mxu0 %vm1644_vm1, %v1643_v2 }
  0x50   : > { %1415 = vmatpush3.bf16.msra.mxu1 %v1590_v40 }
  0x51   : > { %1463 = vmatpush3.bf16.msra.mxu0 %v1591_v41  ;;  %1416 = vmatprep.subr.bf16.mxu1 %v1643_v2 }
  0x52   : > { %1464 = vmatprep.subr.bf16.mxu0 %v1643_v2 }
  0x54   : > { %1417 = vmatpush3.bf16.msra.mxu1 %v1592_v42 }
  0x55   : > { %1465 = vmatpush3.bf16.msra.mxu0 %v1593_v43  ;;  %1418 = vmatprep.subr.bf16.mxu1 %v1643_v2 }
  0x56   : > { %1466 = vmatprep.subr.bf16.mxu0 %v1643_v2 }
  0x58   : > { %1419 = vmatpush3.bf16.msra.mxu1 %v1594_v44 }
  0x59   : > { %1467 = vmatpush3.bf16.msra.mxu0 %v1595_v46 }
  0x5a   : > { %1472 = vmatprep.subr.bf16.mxu0 %v1643_v2 }
  0x5b   : > { %1421 = vmatmul.mubr.msk.bf16.vlgmr.msra.gmra.mrb[0].mxu1 %vm312_vm2, %v503_v48 }
  0x5c   : > { %1469 = vmatmul.mubr.msk.bf16.vlgmr.msra.gmra.mrb[0].mxu0 %vm312_vm2, %v819_v49 }
  0x5d   : > { %1473 = vmatpush3.bf16.msra.mxu0 %v1596_v50  ;;  %1480 = vmatprep.mubr.msk.bf16.mxu0 %vm1644_vm1, %v1643_v2 }
  0x5e   : > { %1474 = vmatprep.subr.bf16.mxu0 %v1643_v2 }
  0x61   : > { %1475 = vmatpush3.bf16.msra.mxu0 %v1597_v51 }
  0x62   : > { %1476 = vmatprep.subr.bf16.mxu0 %v1643_v2 }
  0x65   : > { %1477 = vmatpush3.bf16.msra.mxu0 %v1598_v52 }
  0x66   : > { %1478 = vmatprep.subr.bf16.mxu0 %v1643_v2 }
  0x69   : > { %1479 = vmatpush3.bf16.msra.mxu0 %v1599_v53 }
  0x6c   : > { %1481 = vmatmul.mubr.msk.bf16.vlgmr.msra.gmra.mrb[0].mxu0 %vm312_vm2, %v898_v55 }
 0x12e   : > { %v574_v56 = vpop.f32.mrb[0].mxu1 }
 0x12f   : > { %v1422_v57 = vpop.f32.mrb[1].mxu1 }
 0x130   : > { %v577_v58 = vpop.f32.mrb[2].mxu1 }
 0x131   : > { %v1423_v59 = vpop.f32.mrb[3].mxu1 }
 0x13f   : > { %v969_v63 = vpop.f32.mrb[0].mxu0 }
 0x140   : > { %v1489_v0 = vadd.f32 %v969_v63, %v574_v56  ;;  %v1482_v1 = vpop.f32.mrb[1].mxu0 }
 0x141   : > { %v972_v3 = vpop.f32.mrb[2].mxu0 }
 0x142   : > { %978 = vst.msk [vmem:[%s977_s10] sm:$0xff] %vm312_vm2, %v1489_v0  ;;  %v998_v2 = vsel %vm993_vm3, %v1489_v0, 0.0  ;;  %v1483_v4 = vpop.f32.mrb[3].mxu0 }
 0x143   : > { %v1000_v5 = vsel %vm312_vm2, %v998_v2, 0.0  ;;  %v1011_v6 = vmul.f32 %v998_v2, %v998_v2 }
 0x144   : > { %v1001_v7 = vrot.slane %v1000_v5, 4 }
 0x145   : > { %v1012_v8 = vsel %vm312_vm2, %v1011_v6, 0.0 }
 0x146   : > { %v1002_v9 = vadd.f32 %v1001_v7, %v1000_v5  ;;  %v1013_v10 = vrot.slane %v1012_v8, 4 }
 0x148   : > { %v1003_v11 = vrot.slane %v1002_v9, 2  ;;  %v1014_v12 = vadd.f32 %v1013_v10, %v1012_v8 }
 0x14a   : > { %v1004_v13 = vadd.f32 %v1003_v11, %v1002_v9  ;;  %v1015_v14 = vrot.slane %v1014_v12, 2 }
 0x14c   : > { %v1005_v15 = vrot.slane %v1004_v13, 1  ;;  %v1016_v16 = vadd.f32 %v1015_v14, %v1014_v12 }
 0x14e   : > { %v1006_v18 = vadd.f32 %v1005_v15, %v1004_v13  ;;  %v1017_v19 = vrot.slane %v1016_v16, 1 }
 0x150   : > { %v1007_v21 = vadd.f32 %v1006_v18, %v999_v17  ;;  %v1018_v22 = vadd.f32 %v1017_v19, %v1016_v16 }
 0x152   : > { %1009 = vst.msk [vmem:[#allocation3] sm:$0x1] %vm1008_vm4, %v1007_v21  ;;  %v1019_v23 = vadd.f32 %v1018_v22, %v1010_v20 }
 0x154   : > { %1020 = vst.msk [vmem:[#allocation4] sm:$0x1] %vm1008_vm4, %v1019_v23 }
 0x155 PF: > { %p1324_p11 = scmp.ne.s32.totalorder %s1628_s19, 1 }
 0x156   : > { %v1645_v26 = vmov (!%p1324_p11), 0.0   ;;  %vm1646_vm5 = vmmov (!%p1324_p11), 0   ;;  %v1043_v33 = vlaneseq (!%p1324_p11)  ;;  %s1325_s27 = sshll.u32 (!%p1324_p11), %s1624_s18, 3  ;;  %v1034_v35 = vld [vmem:[%s1941_s2] sm:$0x1] (!%p1324_p11)  ;;  %vm1058_vm6 = vcmask (!%p1324_p11), 64512  }
 0x157   : > { %1024 = sbr.rel (%p1324_p11) target bundleno = 593 (0x251), region = 52  ;;  %1484 = vmatprep.subr.mxu0 (!%p1324_p11), %v1645_v26  ;;  %1486 = vmatprep.mubr.msk.f32.mxu0 (!%p1324_p11), %vm1646_vm5, %v1645_v26  ;;  %v1036_v39 = vld [vmem:[%s1942_s3] sm:$0x1] (!%p1324_p11)  ;;  %s1040_s6 = scalar_lea.vmem (!%p1324_p11), [#allocation2], %s1325_s27  ;;  %vm1132_vm7 = vcmask (!%p1324_p11), 519168  }
 0x158   : > { %v1044_v34 = vshrl.u32 (!%p1324_p11), %v1043_v33, 7  ;;  %v1041_v40 = vld [vmem:[%s1040_s6] sm:$0xff] (!%p1324_p11) }
 0x159   : > { %v1025_v24 = vld [vmem:[#allocation3] sm:$0x1] (!%p1324_p11)  ;;  %v1057_v48 = vld [vmem:[%s1943_s4] sm:$0xf] (!%p1324_p11) }
 0x15a   : > { %v1026_v27 = vmul.f32 (!%p1324_p11), 0.125, %v1025_v24  ;;  %v1045_v36 = vsub.s32 (!%p1324_p11), 0, %v1044_v34 }
 0x15b   : > { %v1027_v25 = vld [vmem:[#allocation4] sm:$0x1] (!%p1324_p11) }
 0x15c   : > { %v1028_v28 = vmul.f32 (!%p1324_p11), 0.125, %v1027_v25  ;;  %v1029_v29 = vmul.f32 (!%p1324_p11), %v1026_v27, %v1026_v27 }
 0x15e   : > { %v1030_v30 = vsub.f32 %v1028_v28, %v1029_v29 }
 0x160   : > { %v1031_v31 = vmax.f32 %v1030_v30, 0.0 }
 0x162   : > { %v1032_v32 = vadd.f32 1e-05, %v1031_v31 }
 0x164   : > { %1600 = vrsqrt.f32 %v1032_v32 }
 0x16e   : > { %v1601_v37 = vpop.eup %1600 }
 0x16f   : > { %v1035_v38 = vmul.f32 %v1601_v37, %v1034_v35 }
 0x171   : > { %v1037_v41 = vmul.f32 %v1035_v38, %v1026_v27  ;;  %v1046_v42 = vrot.slane %v1035_v38, %v1045_v36 }
 0x173   : > { %v1038_v43 = vsub.f32 %v1036_v39, %v1037_v41  ;;  %v1048_v44 = vmul.f32 %v1046_v42, %v1041_v40 }
 0x175   : > { %v1053_v45 = vrot.slane %v1038_v43, %v1045_v36 }
 0x177   : > { %v1055_v46 = vadd.f32 %v1053_v45, %v1048_v44 }
 0x179   : > { %v1056_v47 = vmax.f32 %v1055_v46, 0.0 }
 0x17b   : > { %1485 = vmatpush3.msra.mxu0 %v1056_v47 }
 0x17c   : > { %1487 = vmatmul.mubr.msk.f32.vlgmr.msra.gmra.mrb[0].mxu0 %vm1058_vm6, %v1057_v48 }
 0x24f   : > { %v1128_v49 = vpop.f32.mrb[0].mxu0 }
 0x250   : > { %1133 = vst.msk [vmem:[%s1720_s7] sm:$0xf] %vm1132_vm7, %v1128_v49  ;;  %v1488_v50 = vpop.f32.mrb[1].mxu0 }
 0x251 PF: > { %s15_s22 = sadd.s32 1, %s1640_s22   ;;  %s1945_s18 = smov %s1632_s20 }
 0x252   : > { %p12_p12 = scmp.ge.s32.totalorder %s15_s22, 6   ;;  %s1946_s19 = smov %s1636_s21 }
 0x253   : > { %s1947_s20 = smov %s1950_s23  ;;  %s1948_s21 = smov %s1954_s24 }
 0x254   :  { %14 = sbr.rel (!%p12_p12) target bundleno = 3 (0x3), region = 92 }

// kernel: cnn_encoder.5
= control target key start
LH: loop header
LB: loop body
LE: loop exit
PB: predicated region body
PF: predicated region fallthrough
CT: control target
= control target key end

     0   :  { %s2445_s18 = smov 0   ;;  %s2447_s19 = smov 0   ;;  %s2910_s0 = inlined_call_operand.vmem [shape: f32[2,64,64], index: 0, kind: input, shape index: {}]   ;;  %s2911_s1 = inlined_call_operand.vmem [shape: bf16[9,64,64], index: 1, kind: input, shape index: {}]   ;;  %s2912_s2 = inlined_call_operand.vmem [shape: f32[1,64], index: 2, kind: input, shape index: {}]   ;;  %s2913_s3 = inlined_call_operand.vmem [shape: f32[1,64], index: 3, kind: input, shape index: {}]   ;;  %s2914_s4 = inlined_call_operand.vmem [shape: f32[4,35], index: 4, kind: input, shape index: {}]   ;;  %s2915_s5 = inlined_call_operand.vmem [shape: f32[2,4,64], index: 5, kind: output, shape index: {}]  }
   0x1   :  { %s2449_s20 = smov 0   ;;  %s2451_s21 = smov 0  }
   0x2   :  { %s2453_s22 = smov 0  }
   0x3 LB: > { %s24_s23 = sadd.s32 1, %s2398_s20  ;;  %s27_s24 = sadd.s32 1, %s2402_s21  ;;  %s2406_s22 = sphi %s2453_s22, %s15_s22   ;;  %s2402_s21 = sphi %s2451_s21, %s2927_s21   ;;  %s2398_s20 = sphi %s2449_s20, %s2926_s20   ;;  %s2394_s19 = sphi %s2447_s19, %s2925_s19   ;;  %s2390_s18 = sphi %s2445_s18, %s2924_s18  }
   0x4   : > { %p25_p0 = scmp.ge.s32.totalorder %s24_s23, 2  ;;  %p1769_p1 = scmp.ge.s32.totalorder %s2406_s22, 1 }
   0x5   : > { %p209_p2 = scmp.lt.s32.totalorder %s2406_s22, 5 }
   0x6   : > { %s2929_s23 = smov (%p25_p0, %s24_s23), 0  ;;  %s2931_s24 = smov (!%p25_p0, %s27_s24), %s2402_s21 }
   0x7   : > { %p210_p3 = pnand %p1769_p1, %p209_p2  ;;  %p29_p4 = scmp.ge.s32.totalorder %s2931_s24, 2 }
   0x8   : > { %s239_s25 = ssub.s32 (!%p210_p3), 1, %s2394_s19  ;;  %s248_s26 = smul.u32 (!%p210_p3), %s2390_s18, %s2394_s19 }
   0x9   : > { %s2933_s24 = smov (%p29_p4, %s2931_s24), 0  ;;  %213 = sbr.rel (%p210_p3) target bundleno = 656 (0x290), region = 40 }
   0xa   : > { %s240_s27 = smul.u32 (!%p210_p3), %s2390_s18, %s239_s25  ;;  %p255_p5 = scmp.eq.s32.totalorder (!%p210_p3), %s2394_s19, 0 }
   0xb   : > { %p249_p6 = scmp.lt.s32.totalorder (!%p210_p3), %s248_s26, 1  ;;  %p256_p7 = scmp.eq.s32.totalorder (!%p210_p3), %s2390_s18, 0 }
   0xc   : > { %p241_p8 = scmp.lt.s32.totalorder (!%p210_p3), %s240_s27, 1 }
   0xd   : > { %p257_p9 = pnand (!%p210_p3), %p256_p7, %p255_p5 }
  0x10   : > { %s2935_s26 = smov (!%p249_p6, %s248_s26), 1  ;;  %s2937_s27 = smov (!%p241_p8, %s240_s27), 1 }
  0x11   : > { %s1772_s28 = sshll.u32 %s2935_s26, 2  ;;  %s1906_s29 = sshll.u32 %s2937_s27, 6  ;;  %vm261_vm0 = vcmask (!%p257_p9), 516096   ;;  %v2408_v0 = vmov (!%p257_p9), 0.0  }
  0x12   : > { %s2488_s7 = scalar_lea.vmem %s2915_s5, %s1772_s28  ;;  %s2493_s10 = scalar_lea.vmem %s2910_s0, %s1906_s29  ;;  %262 = vst.msk [vmem:[#allocation3] sm:$0x1] (!%p257_p9), %vm261_vm0, %v2408_v0  ;;  %263 = vst.msk [vmem:[#allocation4] sm:$0x1] (!%p257_p9), %vm261_vm0, %v2408_v0 }
  0x13   : > { %260 = sbr.rel (%p257_p9) target bundleno = 26 (0x1a), region = 44 }
  0x1a PF: > { %p1773_p10 = scmp.ne.s32.totalorder %s2394_s19, 0 }
  0x1b   : > { %v2330_v1 = vld [vmem:[%s2911_s1 + $0x20] sm:$0xff] (!%p1773_p10)   ;;  %v2409_v2 = vmov (!%p1773_p10), 0.0   ;;  %v2332_v4 = vld [vmem:[%s2911_s1 + $0x28] sm:$0xff] (!%p1773_p10)   ;;  %vm2410_vm1 = vmmov (!%p1773_p10), 0   ;;  %v2334_v6 = vld [vmem:[%s2911_s1 + $0x30] sm:$0xff] (!%p1773_p10)   ;;  %vm326_vm2 = vcmask (!%p1773_p10), 523264  }
  0x1c   : > { %266 = sbr.rel (%p1773_p10) target bundleno = 384 (0x180), region = 48  ;;  %1976 = vmatprep.subr.bf16.mxu1 (!%p1773_p10), %v2409_v2  ;;  %2056 = vmatprep.subr.bf16.mxu0 (!%p1773_p10), %v2409_v2  ;;  %v2504_v3 = vld [vmem:[%s2911_s1 + $0x80] sm:$0xff] (!%p1773_p10)   ;;  %v2516_v5 = vld [vmem:[%s2911_s1 + $0x88] sm:$0xff] (!%p1773_p10)   ;;  %v2529_v7 = vld [vmem:[%s2911_s1 + $0x90] sm:$0xff] (!%p1773_p10)  }
  0x1d   : > { %1977 = vmatpush3.bf16.msra.mxu1 (!%p1773_p10), %v2330_v1  ;;  %1984 = vmatprep.mubr.msk.bf16.mxu1 (!%p1773_p10), %vm2410_vm1, %v2409_v2  ;;  %v2336_v8 = vld [vmem:[%s2911_s1 + $0x38] sm:$0xff] (!%p1773_p10)   ;;  %v284_v9 = vld [vmem:[%s2493_s10 + $0x1] sm:$0xff] (!%p1773_p10)  ;;  %v285_v11 = vld [vmem:[%s2493_s10 + $0x9] sm:$0xff] (!%p1773_p10) }
  0x1e   : > { %2057 = vmatpush3.bf16.msra.mxu0 (!%p1773_p10), %v2504_v3  ;;  %1978 = vmatprep.subr.bf16.mxu1 (!%p1773_p10), %v2409_v2  ;;  %v2539_v10 = vld [vmem:[%s2911_s1 + $0x98] sm:$0xff] (!%p1773_p10)   ;;  %v2543_v12 = vld [vmem:[%s2493_s10 + $0x8] sm:$0xff] (!%p1773_p10)  ;;  %v2548_v13 = vld [vmem:[%s2493_s10 + $0x10] sm:$0xff] (!%p1773_p10)  ;;  %v290_v14 = vpack.c.bf16 (!%p1773_p10), %v285_v11, %v284_v9 }
  0x1f   : > { %2058 = vmatprep.subr.bf16.mxu0 (!%p1773_p10), %v2409_v2  ;;  %2064 = vmatprep.mubr.msk.bf16.mxu0 (!%p1773_p10), %vm2410_vm1, %v2409_v2  ;;  %v717_v15 = vpack.c.bf16 (!%p1773_p10), %v2548_v13, %v2543_v12  ;;  %v2339_v16 = vld [vmem:[%s2911_s1] sm:$0xff] (!%p1773_p10)   ;;  %v286_v18 = vld [vmem:[%s2493_s10 + $0x11] sm:$0xff] (!%p1773_p10)  ;;  %v2340_v20 = vld [vmem:[%s2911_s1 + $0xa8] sm:$0xff] (!%p1773_p10)  }
  0x20   : > { %v2338_v17 = vld [vmem:[%s2911_s1 + $0xa0] sm:$0xff] (!%p1773_p10)   ;;  %v713_v21 = vld [vmem:[%s2493_s10 + $0x18] sm:$0xff] (!%p1773_p10)  ;;  %v2342_v22 = vld [vmem:[%s2911_s1 + $0x8] sm:$0xff] (!%p1773_p10)   ;;  %v831_v33 = vpack.c.bf16 (!%p1773_p10), %v286_v18, %v285_v11 }
  0x21   : > { %1979 = vmatpush3.bf16.msra.mxu1 (!%p1773_p10), %v2332_v4  ;;  %v287_v19 = vld [vmem:[%s2493_s10 + $0x19] sm:$0xff] (!%p1773_p10)  ;;  %v2341_v26 = vld [vmem:[%s2911_s1 + $0xb0] sm:$0xff] (!%p1773_p10)   ;;  %v288_v28 = vld [vmem:[%s2493_s10 + $0x21] sm:$0xff] (!%p1773_p10)  ;;  %v2647_v45 = vpack.c.bf16 (!%p1773_p10), %v713_v21, %v2548_v13 }
  0x22   : > { %2059 = vmatpush3.bf16.msra.mxu0 (!%p1773_p10), %v2516_v5  ;;  %1980 = vmatprep.subr.bf16.mxu1 (!%p1773_p10), %v2409_v2  ;;  %v2576_v23 = vld [vmem:[%s2493_s10 + $0x20] sm:$0xff] (!%p1773_p10)  ;;  %v291_v24 = vpack.c.bf16 (!%p1773_p10), %v287_v19, %v286_v18  ;;  %v2344_v27 = vld [vmem:[%s2911_s1 + $0x10] sm:$0xff] (!%p1773_p10)   ;;  %v289_v29 = vld [vmem:[%s2493_s10 + $0x29] sm:$0x7] (!%p1773_p10)  ;;  %v832_v38 = vpack.c.bf16 (!%p1773_p10), %v288_v28, %v287_v19 }
  0x23   : > { %2060 = vmatprep.subr.bf16.mxu0 %v2409_v2  ;;  %v718_v25 = vpack.c.bf16 %v2576_v23, %v713_v21  ;;  %v2343_v30 = vld [vmem:[%s2911_s1 + $0xb8] sm:$0xff]   ;;  %v292_v32 = vpack.c.bf16 %v289_v29, %v288_v28  ;;  %v2345_v34 = vld [vmem:[%s2911_s1 + $0xc0] sm:$0xff]   ;;  %v2347_v36 = vld [vmem:[%s2911_s1 + $0xc8] sm:$0xff]  }
  0x24   : > { %v2346_v31 = vld [vmem:[%s2911_s1 + $0x18] sm:$0xff]   ;;  %v267_v35 = vld [vmem:[%s2493_s10] sm:$0xff]  ;;  %v2349_v40 = vld [vmem:[%s2911_s1 + $0xd0] sm:$0xff]  }
  0x25   : > { %1981 = vmatpush3.bf16.msra.mxu1 %v2334_v6  ;;  %v273_v37 = vpack.c.bf16 %v2543_v12, %v267_v35  ;;  %v2348_v39 = vld [vmem:[%s2911_s1 + $0x40] sm:$0xff]   ;;  %v2350_v41 = vld [vmem:[%s2911_s1 + $0x48] sm:$0xff]   ;;  %v830_v43 = vld [vmem:[%s2493_s10 + $0x31] sm:$0x7] }
  0x26   : > { %2061 = vmatpush3.bf16.msra.mxu0 %v2529_v7  ;;  %1982 = vmatprep.subr.bf16.mxu1 %v2409_v2  ;;  %v829_v42 = vld [vmem:[%s2493_s10 + $0x29] sm:$0xff]  ;;  %v2351_v44 = vld [vmem:[%s2911_s1 + $0xd8] sm:$0xff]   ;;  %v2353_v54 = vld [vmem:[%s2911_s1 + $0xe0] sm:$0xff]  }
  0x27   : > { %2062 = vmatprep.subr.bf16.mxu0 %v2409_v2  ;;  %v833_v46 = vpack.c.bf16 %v830_v43, %v829_v42  ;;  %v2352_v47 = vld [vmem:[%s2911_s1 + $0x50] sm:$0xff]   ;;  %v272_v48 = vld [vmem:[%s2493_s10 + $0x28] sm:$0x7]  ;;  %v2354_v51 = vld [vmem:[%s2911_s1 + $0x58] sm:$0xff]  }
  0x28   : > { %v939_v49 = vld [vmem:[%s2493_s10 + $0xe] sm:$0xff]  ;;  %v940_v50 = vld [vmem:[%s2493_s10 + $0x16] sm:$0xff]  ;;  %v275_v52 = vpack.c.bf16 %v272_v48, %v2576_v23  ;;  %v483_v55 = vld [vmem:[%s2493_s10 + $0x2] sm:$0xff] }
  0x29   : > { %1983 = vmatpush3.bf16.msra.mxu1 %v2336_v8  ;;  %v945_v53 = vpack.c.bf16 %v940_v50, %v939_v49  ;;  %v484_v56 = vld [vmem:[%s2493_s10 + $0xa] sm:$0xff]  ;;  %v941_v58 = vld [vmem:[%s2493_s10 + $0x1e] sm:$0xff]  ;;  %v485_v0 = vld [vmem:[%s2493_s10 + $0x12] sm:$0xff] }
  0x2a   : > { %2063 = vmatpush3.bf16.msra.mxu0 %v2539_v10  ;;  %1996 = vmatprep.subr.bf16.mxu1 %v2409_v2  ;;  %v2355_v57 = vld [vmem:[%s2911_s1 + $0xe8] sm:$0xff]   ;;  %v489_v60 = vpack.c.bf16 %v484_v56, %v483_v55  ;;  %v2356_v62 = vld [vmem:[%s2911_s1 + $0x60] sm:$0xff]   ;;  %v2357_v63 = vld [vmem:[%s2911_s1 + $0xf0] sm:$0xff]  }
  0x2b   : > { %2076 = vmatprep.subr.bf16.mxu0 %v2409_v2  ;;  %v942_v59 = vld [vmem:[%s2493_s10 + $0x26] sm:$0xff]  ;;  %v486_v1 = vld [vmem:[%s2493_s10 + $0x1a] sm:$0xff]  ;;  %v943_v6 = vld [vmem:[%s2493_s10 + $0x2e] sm:$0xff] }
  0x2c   : > { %1985 = vmatmul.mubr.msk.bf16.vlgmr.msra.gmra.mrb[0].mxu1 %vm326_vm2, %v290_v14  ;;  %v946_v61 = vpack.c.bf16 %v942_v59, %v941_v58  ;;  %v2358_v4 = vld [vmem:[%s2911_s1 + $0x68] sm:$0xff]   ;;  %v944_v8 = vld [vmem:[%s2493_s10 + $0x36] sm:$0x7]  ;;  %v490_v11 = vpack.c.bf16 %v486_v1, %v485_v0  ;;  %v2361_v21 = vld [vmem:[%s2911_s1 + $0x100] sm:$0xff]  }
  0x2d   : > { %2065 = vmatmul.mubr.msk.bf16.vlgmr.msra.gmra.mrb[0].mxu0 %vm326_vm2, %v717_v15  ;;  %1997 = vmatpush3.bf16.msra.mxu1 %v2339_v16  ;;  %v2359_v9 = vld [vmem:[%s2911_s1 + $0xf8] sm:$0xff]   ;;  %v947_v12 = vpack.c.bf16 %v944_v8, %v943_v6  ;;  %v2360_v13 = vld [vmem:[%s2911_s1 + $0x70] sm:$0xff]   ;;  %v487_v14 = vld [vmem:[%s2493_s10 + $0x22] sm:$0xff] }
  0x2e   : > { %2077 = vmatpush3.bf16.msra.mxu0 %v2338_v17  ;;  %1988 = vmatprep.mubr.msk.bf16.mxu1 %vm2410_vm1, %v2409_v2  ;;  %v488_v15 = vld [vmem:[%s2493_s10 + $0x2a] sm:$0x7]  ;;  %v1053_v16 = vld [vmem:[%s2493_s10 + $0xf] sm:$0xff]  ;;  %v1054_v17 = vld [vmem:[%s2493_s10 + $0x17] sm:$0xff] }
  0x2f   : > { %2078 = vmatprep.subr.bf16.mxu0 %v2409_v2  ;;  %2068 = vmatprep.mubr.msk.bf16.mxu0 %vm2410_vm1, %v2409_v2  ;;  %v2362_v18 = vld [vmem:[%s2911_s1 + $0x78] sm:$0xff]   ;;  %v491_v19 = vpack.c.bf16 %v488_v15, %v487_v14  ;;  %v2364_v29 = vld [vmem:[%s2911_s1 + $0x110] sm:$0xff]   ;;  %v1170_v35 = vld [vmem:[%s2493_s10 + $0x28] sm:$0xff] }
  0x30   : > { %1998 = vmatprep.subr.bf16.mxu1 %v2409_v2 }
  0x31   : > { %1999 = vmatpush3.bf16.msra.mxu1 %v2342_v22  ;;  %v597_v22 = vld [vmem:[%s2493_s10 + $0x7] sm:$0xff] }
  0x32   : > { %2079 = vmatpush3.bf16.msra.mxu0 %v2340_v20  ;;  %2000 = vmatprep.subr.bf16.mxu1 %v2409_v2  ;;  %v1059_v20 = vpack.c.bf16 %v1054_v17, %v1053_v16 }
  0x33   : > { %2080 = vmatprep.subr.bf16.mxu0 %v2409_v2 }
  0x34   : > { %1989 = vmatmul.mubr.msk.bf16.gmra.mrb[4].mxu1 %vm326_vm2, %v291_v24  ;;  %v2363_v24 = vld [vmem:[%s2911_s1 + $0x108] sm:$0xff]  }
  0x35   : > { %2069 = vmatmul.mubr.msk.bf16.gmra.mrb[4].mxu0 %vm326_vm2, %v718_v25  ;;  %1992 = vmatprep.mubr.msk.bf16.mxu1 %vm2410_vm1, %v2409_v2  ;;  %v1055_v25 = vld [vmem:[%s2493_s10 + $0x1f] sm:$0xff] }
  0x36   : > { %2081 = vmatpush3.bf16.msra.mxu0 %v2341_v26  ;;  %2084 = vmatprep.mubr.msk.bf16.mxu0 %vm2410_vm1, %v2409_v2  ;;  %v1056_v26 = vld [vmem:[%s2493_s10 + $0x27] sm:$0xff] }
  0x37   : > { %2082 = vmatprep.subr.bf16.mxu0 %v2409_v2  ;;  %2001 = vmatpush3.bf16.msra.mxu1 %v2344_v27  ;;  %v603_v27 = vpack.c.bf16 %v1053_v16, %v597_v22  ;;  %v1060_v28 = vpack.c.bf16 %v1056_v26, %v1055_v25 }
  0x38   : > { %2002 = vmatprep.subr.bf16.mxu1 %v2409_v2 }
  0x3a   : > { %2083 = vmatpush3.bf16.msra.mxu0 %v2343_v30  ;;  %v1057_v30 = vld [vmem:[%s2493_s10 + $0x2f] sm:$0xff] }
  0x3b   : > { %2096 = vmatprep.subr.bf16.mxu0 %v2409_v2  ;;  %2003 = vmatpush3.bf16.msra.mxu1 %v2346_v31  ;;  %v1058_v31 = vld [vmem:[%s2493_s10 + $0x37] sm:$0x7] }
  0x3c   : > { %1993 = vmatmul.mubr.msk.bf16.gmra.mrb[8].mxu1 %vm326_vm2, %v292_v32  ;;  %2016 = vmatprep.subr.bf16.mxu1 %v2409_v2  ;;  %v2365_v32 = vld [vmem:[%s2911_s1 + $0x118] sm:$0xff]  }
  0x3d   : > { %2085 = vmatmul.mubr.msk.bf16.vlgmr.msra.gmra.mrb[0].mxu0 %vm326_vm2, %v831_v33  ;;  %2004 = vmatprep.mubr.msk.bf16.mxu1 %vm2410_vm1, %v2409_v2  ;;  %v604_v33 = vpack.c.bf16 %v1055_v25, %v1054_v17 }
  0x3e   : > { %2097 = vmatpush3.bf16.msra.mxu0 %v2345_v34  ;;  %2088 = vmatprep.mubr.msk.bf16.mxu0 %vm2410_vm1, %v2409_v2  ;;  %v602_v34 = vld [vmem:[%s2493_s10 + $0x2f] sm:$0x7] }
  0x3f   : > { %2098 = vmatprep.subr.bf16.mxu0 %v2409_v2 }
  0x42   : > { %2099 = vmatpush3.bf16.msra.mxu0 %v2347_v36  ;;  %v1174_v36 = vpack.c.bf16 %v1170_v35, %v2576_v23 }
  0x43   : > { %2100 = vmatprep.subr.bf16.mxu0 %v2409_v2 }
  0x44   : > { %2005 = vmatmul.mubr.msk.bf16.vlgmr.msra.gmra.mrb[0].mxu1 %vm326_vm2, %v273_v37 }
  0x45   : > { %2089 = vmatmul.mubr.msk.bf16.gmra.mrb[4].mxu0 %vm326_vm2, %v832_v38  ;;  %2017 = vmatpush3.bf16.msra.mxu1 %v2348_v39  ;;  %v1172_v38 = vld [vmem:[%s2493_s10 + $0x38] sm:$0x7] }
  0x46   : > { %2101 = vmatpush3.bf16.msra.mxu0 %v2349_v40  ;;  %2008 = vmatprep.mubr.msk.bf16.mxu1 %vm2410_vm1, %v2409_v2  ;;  %v1290_v40 = vlaneseq }
  0x47   : > { %2092 = vmatprep.mubr.msk.bf16.mxu0 %vm2410_vm1, %v2409_v2  ;;  %2018 = vmatprep.subr.bf16.mxu1 %v2409_v2 }
  0x48   : > { %2102 = vmatprep.subr.bf16.mxu0 %v2409_v2 }
  0x49   : > { %2019 = vmatpush3.bf16.msra.mxu1 %v2350_v41  ;;  %v1291_v41 = vshrl.u32 %v1290_v40, 7 }
  0x4a   : > { %2103 = vmatpush3.bf16.msra.mxu0 %v2351_v44  ;;  %2020 = vmatprep.subr.bf16.mxu1 %v2409_v2 }
  0x4b   : > { %2116 = vmatprep.subr.bf16.mxu0 %v2409_v2  ;;  %v1292_v42 = vadd.s32 8, %v1291_v41  ;;  %v2796_v43 = vmul.u32.u64.low 2454267026, %v1291_v41  ;;  %v2797_v44 = vmul.u32.u64.high 2454267026, %v1291_v41, %v2796_v43 }
  0x4c   : > { %2009 = vmatmul.mubr.msk.bf16.gmra.mrb[4].mxu1 %vm326_vm2, %v2647_v45 }
  0x4d   : > { %2093 = vmatmul.mubr.msk.bf16.gmra.mrb[8].mxu0 %vm326_vm2, %v833_v46  ;;  %2012 = vmatprep.mubr.msk.bf16.mxu1 %vm2410_vm1, %v2409_v2  ;;  %vm1303_vm3 = vc.u32 %v2796_v43, 2454267026  ;;  %v1293_v46 = vadd.s32 16, %v1291_v41 }
  0x4e   : > { %2104 = vmatprep.mubr.msk.bf16.mxu0 %vm2410_vm1, %v2409_v2  ;;  %2021 = vmatpush3.bf16.msra.mxu1 %v2352_v47  ;;  %v2411_v47 = vmov 0  }
  0x4f   : > { %2022 = vmatprep.subr.bf16.mxu1 %v2409_v2  ;;  %v1304_v48 = vsel %vm1303_vm3, 1, %v2411_v47  ;;  %v2802_v49 = vmul.u32.u64.low 2454267026, %v1293_v46  ;;  %v2803_v50 = vmul.u32.u64.high 2454267026, %v1293_v46, %v2802_v49 }
  0x51   : > { %vm1331_vm5 = vc.u32 %v2802_v49, 2454267026 }
  0x52   : > { %2023 = vmatpush3.bf16.msra.mxu1 %v2354_v51 }
  0x53   : > { %2036 = vmatprep.subr.bf16.mxu1 %v2409_v2 }
  0x54   : > { %2013 = vmatmul.mubr.msk.bf16.gmra.mrb[8].mxu1 %vm326_vm2, %v275_v52  ;;  %v2805_v52 = vadd.s32 32, %v1291_v41 }
  0x55   : > { %2105 = vmatmul.mubr.msk.bf16.vlgmr.msra.gmra.mrb[0].mxu0 %vm326_vm2, %v945_v53  ;;  %2024 = vmatprep.mubr.msk.bf16.mxu1 %vm2410_vm1, %v2409_v2  ;;  %v1305_v53 = vadd.s32 %v2797_v44, %v1304_v48 }
  0x56   : > { %2117 = vmatpush3.bf16.msra.mxu0 %v2353_v54  ;;  %2108 = vmatprep.mubr.msk.bf16.mxu0 %vm2410_vm1, %v2409_v2 }
  0x57   : > { %2118 = vmatprep.subr.bf16.mxu0 %v2409_v2  ;;  %v1306_v59 = vshrl.u32 %v1305_v53, 2 }
  0x59   : > { %v1307_v0 = vmul.u32 7, %v1306_v59 }
  0x5a   : > { %2119 = vmatpush3.bf16.msra.mxu0 %v2355_v57  ;;  %v2813_v57 = vmul.u32.u64.low 2454267026, %v2805_v52  ;;  %v2814_v58 = vmul.u32.u64.high 2454267026, %v2805_v52, %v2813_v57 }
  0x5b   : > { %2120 = vmatprep.subr.bf16.mxu0 %v2409_v2 }
  0x5c   : > { %2025 = vmatmul.mubr.msk.bf16.vlgmr.msra.gmra.mrb[0].mxu1 %vm326_vm2, %v489_v60  ;;  %v1332_v60 = vsel %vm1331_vm5, 1, %v2411_v47  ;;  %vm1359_vm7 = vc.u32 %v2813_v57, 2454267026 }
  0x5d   : > { %2109 = vmatmul.mubr.msk.bf16.gmra.mrb[4].mxu0 %vm326_vm2, %v946_v61  ;;  %2037 = vmatpush3.bf16.msra.mxu1 %v2356_v62  ;;  %v1333_v1 = vadd.s32 %v2803_v50, %v1332_v60 }
  0x5e   : > { %2121 = vmatpush3.bf16.msra.mxu0 %v2357_v63  ;;  %2028 = vmatprep.mubr.msk.bf16.mxu1 %vm2410_vm1, %v2409_v2 }
  0x5f   : > { %2112 = vmatprep.mubr.msk.bf16.mxu0 %vm2410_vm1, %v2409_v2  ;;  %2038 = vmatprep.subr.bf16.mxu1 %v2409_v2  ;;  %v1334_v14 = vshrl.u32 %v1333_v1, 2 }
  0x60   : > { %2122 = vmatprep.subr.bf16.mxu0 %v2409_v2 }
  0x61   : > { %2039 = vmatpush3.bf16.msra.mxu1 %v2358_v4 }
  0x62   : > { %2123 = vmatpush3.bf16.msra.mxu0 %v2359_v9  ;;  %2040 = vmatprep.subr.bf16.mxu1 %v2409_v2 }
  0x63   : > { %2136 = vmatprep.subr.bf16.mxu0 %v2409_v2 }
  0x64   : > { %2029 = vmatmul.mubr.msk.bf16.gmra.mrb[4].mxu1 %vm326_vm2, %v490_v11  ;;  %v1360_v11 = vsel %vm1359_vm7, 1, %v2411_v47 }
  0x65   : > { %2113 = vmatmul.mubr.msk.bf16.gmra.mrb[8].mxu0 %vm326_vm2, %v947_v12  ;;  %2032 = vmatprep.mubr.msk.bf16.mxu1 %vm2410_vm1, %v2409_v2  ;;  %v1361_v15 = vadd.s32 %v2814_v58, %v1360_v11 }
  0x66   : > { %2124 = vmatprep.mubr.msk.bf16.mxu0 %vm2410_vm1, %v2409_v2  ;;  %2041 = vmatpush3.bf16.msra.mxu1 %v2360_v13  ;;  %v1308_v13 = vsub.s32 %v1291_v41, %v1307_v0 }
  0x67   : > { %2042 = vmatprep.subr.bf16.mxu1 %v2409_v2 }
  0x68   : > { %vm1381_vm8 = vcmp.ne.s32.totalorder %v1308_v13, 0  ;;  %vm1387_vm9 = vcmp.lt.s32.totalorder %v1308_v13, 0 }
  0x69   : > { %vm1393_vm12 = vmand %vm1387_vm9, %vm1381_vm8 }
  0x6a   : > { %2043 = vmatpush3.bf16.msra.mxu1 %v2362_v18 }
  0x6b   : > { %2175 = vmatprep.subr.bf16.mxu1 %v2409_v2 }
  0x6c   : > { %2033 = vmatmul.mubr.msk.bf16.gmra.mrb[8].mxu1 %vm326_vm2, %v491_v19  ;;  %v1335_v19 = vmul.u32 7, %v1334_v14 }
  0x6d   : > { %2125 = vmatmul.mubr.msk.bf16.vlgmr.msra.gmra.mrb[0].mxu0 %vm326_vm2, %v1059_v20  ;;  %2044 = vmatprep.mubr.msk.bf16.mxu1 %vm2410_vm1, %v2409_v2 }
  0x6e   : > { %2137 = vmatpush3.bf16.msra.mxu0 %v2361_v21  ;;  %2128 = vmatprep.mubr.msk.bf16.mxu0 %vm2410_vm1, %v2409_v2  ;;  %v1362_v21 = vshrl.u32 %v1361_v15, 2 }
  0x6f   : > { %2138 = vmatprep.subr.bf16.mxu0 %v2409_v2 }
  0x72   : > { %2139 = vmatpush3.bf16.msra.mxu0 %v2363_v24  ;;  %v1399_v24 = vadd.s32 7, %v1308_v13 }
  0x73   : > { %2140 = vmatprep.subr.bf16.mxu0 %v2409_v2 }
  0x74   : > { %2045 = vmatmul.mubr.msk.bf16.vlgmr.msra.gmra.mrb[0].mxu1 %vm326_vm2, %v603_v27 }
  0x75   : > { %2129 = vmatmul.mubr.msk.bf16.gmra.mrb[4].mxu0 %vm326_vm2, %v1060_v28  ;;  %2179 = vmatpush3.bf16.msra.mxu1 %v2504_v3  ;;  %v1061_v3 = vpack.c.bf16 %v1058_v31, %v1057_v30  ;;  %v1336_v28 = vsub.s32 %v1293_v46, %v1335_v19  ;;  %v1363_v30 = vmul.u32 7, %v1362_v21  ;;  %v1405_v31 = vsel %vm1393_vm12, %v1399_v24, %v1308_v13 }
  0x76   : > { %2141 = vmatpush3.bf16.msra.mxu0 %v2364_v29  ;;  %2048 = vmatprep.mubr.msk.bf16.mxu1 %vm2410_vm1, %v2409_v2  ;;  %vm1411_vm0 = vcmp.lt.s32.totalorder %v1405_v31, 5 }
  0x77   : > { %2132 = vmatprep.mubr.msk.bf16.mxu0 %vm2410_vm1, %v2409_v2  ;;  %2142 = vmatprep.subr.bf16.mxu0 %v2409_v2  ;;  %vm1383_vm14 = vcmp.ne.s32.totalorder %v1336_v28, 0  ;;  %vm1389_vm15 = vcmp.lt.s32.totalorder %v1336_v28, 0 }
  0x78   : > { %2176 = vmatprep.subr.bf16.mxu1 %v2409_v2  ;;  %vm2827_vm5 = vmand %vm1389_vm15, %vm1383_vm14  ;;  %vm1288_vm15 = vcmask 518144  }
  0x79   : > { %2180 = vmatpush3.bf16.msra.mxu1 %v2516_v5  ;;  %v605_v5 = vpack.c.bf16 %v602_v34, %v1056_v26  ;;  %v1364_v34 = vsub.s32 %v2805_v52, %v1363_v30 }
  0x7a   : > { %2143 = vmatpush3.bf16.msra.mxu0 %v2365_v32  ;;  %2177 = vmatprep.subr.bf16.mxu1 %v2409_v2 }
  0x7b   : > { %vm1385_vm7 = vcmp.ne.s32.totalorder %v1364_v34, 0  ;;  %vm1391_vm8 = vcmp.lt.s32.totalorder %v1364_v34, 0 }
  0x7c   : > { %2049 = vmatmul.mubr.msk.bf16.gmra.mrb[4].mxu1 %vm326_vm2, %v604_v33  ;;  %vm2847_vm9 = vmand %vm1391_vm8, %vm1385_vm7 }
  0x7d   : > { %2133 = vmatmul.mubr.msk.bf16.gmra.mrb[8].mxu0 %vm326_vm2, %v1061_v3  ;;  %2052 = vmatprep.mubr.msk.bf16.mxu1 %vm2410_vm1, %v2409_v2 }
  0x7e   : > { %2144 = vmatprep.mubr.msk.bf16.mxu0 %vm2410_vm1, %v2409_v2  ;;  %2181 = vmatpush3.bf16.msra.mxu1 %v2529_v7  ;;  %v716_v7 = vld [vmem:[%s2493_s10 + $0x30] sm:$0x7] }
  0x7f   : > { %2178 = vmatprep.subr.bf16.mxu1 %v2409_v2  ;;  %v719_v37 = vpack.c.bf16 %v716_v7, %v1170_v35 }
  0x82   : > { %2182 = vmatpush3.bf16.msra.mxu1 %v2539_v10  ;;  %v1171_v10 = vld [vmem:[%s2493_s10 + $0x30] sm:$0xff]  ;;  %s1281_s10 = smul.u32 48, %s2390_s18 }
  0x83   : > { %v1175_v39 = vpack.c.bf16 %v1172_v38, %v1171_v10 }
  0x84   : > { %2053 = vmatmul.mubr.msk.bf16.gmra.mrb[8].mxu1 %vm326_vm2, %v605_v5  ;;  %s2831_s26 = scalar_lea.vmem [#allocation2], %s1281_s10 }
  0x85   : > { %2145 = vmatmul.mubr.msk.bf16.vlgmr.msra.gmra.mrb[0].mxu0 %vm326_vm2, %v2647_v45  ;;  %2072 = vmatprep.mubr.msk.bf16.mxu1 %vm2410_vm1, %v2409_v2  ;;  %v2799_v23 = vmul.u32.u64.low 2454267026, %v1292_v42  ;;  %v2800_v45 = vmul.u32.u64.high 2454267026, %v1292_v42, %v2799_v23 }
  0x86   : > { %2148 = vmatprep.mubr.msk.bf16.mxu0 %vm2410_vm1, %v2409_v2 }
  0x87   : > { %vm1317_vm4 = vc.u32 %v2799_v23, 2454267026 }
  0x88   : > { %v1318_v51 = vsel %vm1317_vm4, 1, %v2411_v47 }
  0x89   : > { %v1319_v56 = vadd.s32 %v2800_v45, %v1318_v51 }
  0x8b   : > { %v1320_v61 = vshrl.u32 %v1319_v56, 2 }
  0x8d   : > { %2149 = vmatmul.mubr.msk.bf16.gmra.mrb[4].mxu0 %vm326_vm2, %v1174_v36  ;;  %v1321_v8 = vmul.u32 7, %v1320_v61  ;;  %v1401_v36 = vadd.s32 7, %v1336_v28 }
  0x8e   : > { %2152 = vmatprep.mubr.msk.bf16.mxu0 %vm2410_vm1, %v2409_v2  ;;  %v1294_v2 = vadd.s32 24, %v1291_v41 }
  0x8f   : > { %v1322_v16 = vsub.s32 %v1292_v42, %v1321_v8  ;;  %v1407_v44 = vsel %vm2827_vm5, %v1401_v36, %v1336_v28 }
  0x90   : > { %2073 = vmatmul.mubr.msk.bf16.vlgmr.msra.gmra.mrb[8].mxu1 %vm326_vm2, %v719_v37  ;;  %v2808_v54 = vmul.u32.u64.low 2454267026, %v1294_v2  ;;  %v2809_v55 = vmul.u32.u64.high 2454267026, %v1294_v2, %v2808_v54 }
  0x91   : > { %vm1382_vm10 = vcmp.ne.s32.totalorder %v1322_v16, 0  ;;  %vm1388_vm11 = vcmp.lt.s32.totalorder %v1322_v16, 0  ;;  %v1400_v27 = vadd.s32 7, %v1322_v16 }
  0x92   : > { %vm1345_vm6 = vc.u32 %v2808_v54, 2454267026  ;;  %vm2820_vm13 = vmand %vm1388_vm11, %vm1382_vm10  ;;  %vm1413_vm10 = vcmp.lt.s32.totalorder %v1407_v44, 5 }
  0x93   : > { %v1346_v62 = vsel %vm1345_vm6, 1, %v2411_v47  ;;  %v1406_v33 = vsel %vm2820_vm13, %v1400_v27, %v1322_v16  ;;  %vm1421_vm13 = vcmp.lt.s32.totalorder %v2805_v52, 35 }
  0x94   : > { %v1347_v9 = vadd.s32 %v2809_v55, %v1346_v62  ;;  %vm1412_vm4 = vcmp.lt.s32.totalorder %v1406_v33, 5 }
  0x95   : > { %2153 = vmatmul.mubr.msk.bf16.gmra.mrb[8].mxu0 %vm326_vm2, %v1175_v39 }
  0x96   : > { %v1348_v17 = vshrl.u32 %v1347_v9, 2 }
  0x98   : > { %v1349_v25 = vmul.u32 7, %v1348_v17 }
  0x9a   : > { %v1350_v32 = vsub.s32 %v1294_v2, %v1349_v25  ;;  %v1403_v2 = vadd.s32 7, %v1364_v34 }
  0x9c   : > { %vm1384_vm1 = vcmp.ne.s32.totalorder %v1350_v32, 0  ;;  %vm1390_vm3 = vcmp.lt.s32.totalorder %v1350_v32, 0  ;;  %v1402_v40 = vadd.s32 7, %v1350_v32  ;;  %v1409_v58 = vsel %vm2847_vm9, %v1403_v2, %v1364_v34 }
  0x9d   : > { %vm2835_vm6 = vmand %vm1390_vm3, %vm1384_vm1  ;;  %vm1415_vm12 = vcmp.lt.s32.totalorder %v1409_v58, 5 }
  0x9e   : > { %v1408_v48 = vsel %vm2835_vm6, %v1402_v40, %v1350_v32  ;;  %vm1427_vm14 = vmand %vm1415_vm12, %vm1421_vm13 }
  0x9f   : > { %vm1414_vm11 = vcmp.lt.s32.totalorder %v1408_v48, 5 }
 0x147   : > { %v682_v63 = vpop.f32.mrb[0].mxu1 }
 0x148   : > { %v2046_v4 = vpop.f32.mrb[1].mxu1 }
 0x149   : > { %v685_v6 = vpop.f32.mrb[2].mxu1 }
 0x14a   : > { %v2047_v12 = vpop.f32.mrb[3].mxu1 }
 0x14f   : > { %v690_v18 = vpop.f32.mrb[4].mxu1 }
 0x150   : > { %v2050_v20 = vpop.f32.mrb[5].mxu1 }
 0x151   : > { %v693_v22 = vpop.f32.mrb[6].mxu1 }
 0x152   : > { %v2051_v26 = vpop.f32.mrb[7].mxu1 }
 0x158   : > { %v1252_v3 = vpop.f32.mrb[0].mxu0 }
 0x159   : > { %v2183_v5 = vadd.f32 %v1252_v3, %v682_v63  ;;  %v2146_v35 = vpop.f32.mrb[1].mxu0 }
 0x15a   : > { %v1255_v7 = vpop.f32.mrb[2].mxu0 }
 0x15b   : > { %1283 = vst.msk [vmem:[%s2831_s26] sm:$0xff] %vm326_vm2, %v2183_v5  ;;  %v1441_v10 = vsel %vm1411_vm0, %v2183_v5, 0.0  ;;  %v2184_v38 = vadd.f32 %v1255_v7, %v685_v6  ;;  %v2147_v39 = vpop.f32.mrb[3].mxu0  ;;  %v1447_v7 = vld [vmem:[#allocation3] sm:$0x1]  ;;  %vm1466_vm0 = vcmask 516096  }
 0x15c   : > { %v1469_v41 = vmul.f32 %v1441_v10, %v1441_v10  ;;  %v1448_v23 = vsel %vm326_vm2, %v1441_v10, 0.0 }
 0x15d   : > { %1284 = vst.msk [vmem:[%s2831_s26 + $0x8] sm:$0xff] %vm326_vm2, %v2184_v38  ;;  %v1442_v43 = vsel %vm1412_vm4, %v2184_v38, 0.0  ;;  %v1468_v38 = vld [vmem:[#allocation4] sm:$0x1] }
 0x15e   : > { %v1449_v45 = vsel %vm326_vm2, %v1442_v43, 0.0  ;;  %v1470_v46 = vmul.f32 %v1442_v43, %v1442_v43  ;;  %v1475_v50 = vsel %vm326_vm2, %v1469_v41, 0.0 }
 0x15f   : > { %v1450_v47 = vadd.f32 %v1449_v45, %v1448_v23 }
 0x160   : > { %v1476_v51 = vsel %vm326_vm2, %v1470_v46, 0.0  ;;  %v1260_v53 = vpop.f32.mrb[4].mxu0 }
 0x161   : > { %v1477_v54 = vadd.f32 %v1476_v51, %v1475_v50  ;;  %v2185_v55 = vadd.f32 %v1260_v53, %v690_v18  ;;  %v2150_v56 = vpop.f32.mrb[5].mxu0 }
 0x162   : > { %v1263_v57 = vpop.f32.mrb[6].mxu0 }
 0x163   : > { %1285 = vst.msk [vmem:[%s2831_s26 + $0x10] sm:$0xff] %vm326_vm2, %v2185_v55  ;;  %v1443_v59 = vsel %vm1413_vm10, %v2185_v55, 0.0  ;;  %v2186_v60 = vadd.f32 %v1263_v57, %v693_v22  ;;  %v2151_v61 = vpop.f32.mrb[7].mxu0  ;;  %v812_v62 = vpop.f32.mrb[8].mxu1 }
 0x164   : > { %v1451_v63 = vsel %vm326_vm2, %v1443_v59, 0.0  ;;  %v1471_v0 = vmul.f32 %v1443_v59, %v1443_v59  ;;  %v2074_v1 = vpop.f32.mrb[9].mxu1 }
 0x165   : > { %v1452_v4 = vadd.f32 %v1451_v63, %v1450_v47  ;;  %1286 = vst.msk [vmem:[%s2831_s26 + $0x18] sm:$0xff] %vm326_vm2, %v2186_v60  ;;  %v1444_v6 = vsel %vm1414_vm11, %v2186_v60, 0.0  ;;  %v815_v8 = vpop.f32.mrb[10].mxu1 }
 0x166   : > { %v1478_v9 = vsel %vm326_vm2, %v1471_v0, 0.0  ;;  %v1453_v11 = vsel %vm326_vm2, %v1444_v6, 0.0  ;;  %v1472_v12 = vmul.f32 %v1444_v6, %v1444_v6  ;;  %v2075_v13 = vpop.f32.mrb[11].mxu1 }
 0x167   : > { %v1479_v14 = vadd.f32 %v1478_v9, %v1477_v54  ;;  %v1454_v15 = vadd.f32 %v1453_v11, %v1452_v4 }
 0x168   : > { %v1480_v16 = vsel %vm326_vm2, %v1472_v12, 0.0  ;;  %v1268_v17 = vpop.f32.mrb[8].mxu0 }
 0x169   : > { %v1481_v18 = vadd.f32 %v1480_v16, %v1479_v14  ;;  %v2187_v19 = vadd.f32 %v1268_v17, %v812_v62  ;;  %v2154_v20 = vpop.f32.mrb[9].mxu0 }
 0x16a   : > { %v1271_v21 = vpop.f32.mrb[10].mxu0 }
 0x16b   : > { %1287 = vst.msk [vmem:[%s2831_s26 + $0x20] sm:$0xff] %vm326_vm2, %v2187_v19  ;;  %v1445_v52 = vsel %vm1427_vm14, %v2187_v19, 0.0  ;;  %v2188_v22 = vadd.f32 %v1271_v21, %v815_v8  ;;  %v2155_v24 = vpop.f32.mrb[11].mxu0 }
 0x16c   : > { %v1455_v25 = vsel %vm326_vm2, %v1445_v52, 0.0  ;;  %v1473_v26 = vmul.f32 %v1445_v52, %v1445_v52 }
 0x16d   : > { %v1456_v27 = vadd.f32 %v1455_v25, %v1454_v15  ;;  %1289 = vst.msk [vmem:[%s2831_s26 + $0x28] sm:$0x7] %vm1288_vm15, %v2188_v22 }
 0x16e   : > { %v1482_v28 = vsel %vm326_vm2, %v1473_v26, 0.0 }
 0x16f   : > { %v1459_v29 = vrot.slane %v1456_v27, 4  ;;  %v1483_v30 = vadd.f32 %v1482_v28, %v1481_v18 }
 0x171   : > { %v1460_v31 = vadd.f32 %v1459_v29, %v1456_v27  ;;  %v1486_v32 = vrot.slane %v1483_v30, 4 }
 0x173   : > { %v1461_v33 = vrot.slane %v1460_v31, 2  ;;  %v1487_v3 = vadd.f32 %v1486_v32, %v1483_v30 }
 0x175   : > { %v1462_v34 = vadd.f32 %v1461_v33, %v1460_v31  ;;  %v1488_v5 = vrot.slane %v1487_v3, 2 }
 0x177   : > { %v1463_v35 = vrot.slane %v1462_v34, 1  ;;  %v1489_v36 = vadd.f32 %v1488_v5, %v1487_v3 }
 0x179   : > { %v1464_v37 = vadd.f32 %v1463_v35, %v1462_v34  ;;  %v1490_v10 = vrot.slane %v1489_v36, 1 }
 0x17b   : > { %v1465_v39 = vadd.f32 %v1464_v37, %v1447_v7  ;;  %v1491_v40 = vadd.f32 %v1490_v10, %v1489_v36 }
 0x17d   : > { %1467 = vst.msk [vmem:[#allocation3] sm:$0x1] %vm1466_vm0, %v1465_v39  ;;  %v1492_v41 = vadd.f32 %v1491_v40, %v1468_v38 }
 0x17f   : > { %1493 = vst.msk [vmem:[#allocation4] sm:$0x1] %vm1466_vm0, %v1492_v41 }
 0x180 PF: > { %p1901_p11 = scmp.ne.s32.totalorder %s2394_s19, 1 }
 0x181   : > { %v2412_v44 = vmov (!%p1901_p11), 0.0|0.0   ;;  %vm2413_vm2 = vmmov (!%p1901_p11), 0   ;;  %v2414_v2 = vmov (!%p1901_p11), 0.0   ;;  %v1521_v50 = vlaneseq (!%p1901_p11)  ;;  %s1512_s19 = smul.u32 (!%p1901_p11), 48, %s2390_s18  ;;  %v1507_v53 = vld [vmem:[%s2912_s2] sm:$0x1] (!%p1901_p11) }
 0x182   : > { %1497 = sbr.rel (%p1901_p11) target bundleno = 656 (0x290), region = 52  ;;  %2169 = vmatprep.subr.bf16.mxu0 (!%p1901_p11), %v2412_v44  ;;  %2166 = vmatprep.mubr.msk.f32.mxu0 (!%p1901_p11), %vm2413_vm2, %v2414_v2  ;;  %v1509_v57 = vld [vmem:[%s2913_s3] sm:$0x1] (!%p1901_p11)  ;;  %vm1555_vm1 = vcmask (!%p1901_p11), 1046528   ;;  %vm1590_vm3 = vcmask (!%p1901_p11), 1040384   ;;  %vm1617_vm4 = vcmask (!%p1901_p11), 1042432  }
 0x183   : > { %v1522_v51 = vshrl.u32 (!%p1901_p11), %v1521_v50, 7  ;;  %s1513_s6 = scalar_lea.vmem (!%p1901_p11), [#allocation2], %s1512_s19  ;;  %vm1613_vm5 = vcmask (!%p1901_p11), 285696   ;;  %vm1691_vm6 = vcmask (!%p1901_p11), 519168  }
 0x184   : > { %v1498_v42 = vld [vmem:[#allocation3] sm:$0x1] (!%p1901_p11)  ;;  %v1515_v59 = vld [vmem:[%s1513_s6 + $0x8] sm:$0xff] (!%p1901_p11)  ;;  %v1516_v60 = vld [vmem:[%s1513_s6 + $0x10] sm:$0xff] (!%p1901_p11) }
 0x185   : > { %v1499_v23 = vmul.f32 (!%p1901_p11), 0.02, %v1498_v42  ;;  %v1523_v54 = vsub.s32 (!%p1901_p11), 0, %v1522_v51  ;;  %v1514_v58 = vld [vmem:[%s1513_s6] sm:$0xff] (!%p1901_p11)  ;;  %v1517_v62 = vld [vmem:[%s1513_s6 + $0x18] sm:$0xff] (!%p1901_p11) }
 0x186   : > { %v1500_v43 = vld [vmem:[#allocation4] sm:$0x1] (!%p1901_p11)  ;;  %v1519_v1 = vld [vmem:[%s1513_s6 + $0x28] sm:$0x7] (!%p1901_p11) }
 0x187   : > { %v1501_v45 = vmul.f32 (!%p1901_p11), 0.02, %v1500_v43  ;;  %v1502_v46 = vmul.f32 (!%p1901_p11), %v1499_v23, %v1499_v23  ;;  %v1518_v0 = vld [vmem:[%s1513_s6 + $0x20] sm:$0xff] (!%p1901_p11) }
 0x189   : > { %v1503_v47 = vsub.f32 %v1501_v45, %v1502_v46 }
 0x18b   : > { %v1504_v48 = vmax.f32 %v1503_v47, 0.0 }
 0x18d   : > { %v1505_v49 = vadd.f32 1e-05, %v1504_v48 }
 0x18f   : > { %2366 = vrsqrt.f32 %v1505_v49 }
 0x199   : > { %v2367_v55 = vpop.eup %2366 }
 0x19a   : > { %v1508_v56 = vmul.f32 %v2367_v55, %v1507_v53 }
 0x19c   : > { %v1510_v61 = vmul.f32 %v1508_v56, %v1499_v23  ;;  %v1524_v63 = vrot.slane %v1508_v56, %v1523_v54 }
 0x19e   : > { %v1511_v4 = vsub.f32 %v1509_v57, %v1510_v61  ;;  %v1526_v6 = vmul.f32 %v1524_v63, %v1514_v58  ;;  %v1527_v8 = vmul.f32 %v1524_v63, %v1515_v59  ;;  %v1528_v9 = vmul.f32 %v1524_v63, %v1516_v60  ;;  %v1612_v61 = vld [vmem:[%s2914_s4] sm:$0xf] }
 0x19f   : > { %v1529_v11 = vmul.f32 %v1524_v63, %v1517_v62  ;;  %v1530_v12 = vmul.f32 %v1524_v63, %v1518_v0  ;;  %v1531_v13 = vmul.f32 %v1524_v63, %v1519_v1 }
 0x1a0   : > { %v1536_v14 = vrot.slane %v1511_v4, %v1523_v54 }
 0x1a2   : > { %v1538_v15 = vadd.f32 %v1536_v14, %v1526_v6  ;;  %v1539_v16 = vadd.f32 %v1536_v14, %v1527_v8  ;;  %v1540_v17 = vadd.f32 %v1536_v14, %v1528_v9  ;;  %v1541_v18 = vadd.f32 %v1536_v14, %v1529_v11 }
 0x1a3   : > { %v1542_v19 = vadd.f32 %v1536_v14, %v1530_v12  ;;  %v1543_v20 = vadd.f32 %v1536_v14, %v1531_v13 }
 0x1a4   : > { %v1544_v21 = vmax.f32 %v1538_v15, 0.0  ;;  %v1545_v52 = vmax.f32 %v1539_v16, 0.0  ;;  %v1546_v22 = vmax.f32 %v1540_v17, 0.0  ;;  %v1547_v24 = vmax.f32 %v1541_v18, 0.0 }
 0x1a5   : > { %v1548_v25 = vmax.f32 %v1542_v19, 0.0  ;;  %v1549_v26 = vmax.f32 %v1543_v20, 0.0 }
 0x1a6   : > { %v1556_v27 = vrot.slane %v1544_v21, 1  ;;  %v1557_v28 = vrot.slane %v1545_v52, 1  ;;  %v1559_v29 = vrot.slane %v1546_v22, 1  ;;  %v1561_v30 = vrot.slane %v1547_v24, 1 }
 0x1a7   : > { %v1563_v31 = vrot.slane %v1548_v25, 1  ;;  %v1576_v32 = vrot.slane %v1549_v26, 1 }
 0x1a8   : > { %v1558_v33 = vsel %vm1555_vm1, %v1556_v27, %v1557_v28  ;;  %v1560_v3 = vsel %vm1555_vm1, %v1557_v28, %v1559_v29  ;;  %v1562_v34 = vsel %vm1555_vm1, %v1559_v29, %v1561_v30  ;;  %v1581_v5 = vmax.f32 %v1544_v21, %v1557_v28 }
 0x1a9   : > { %v1571_v35 = vmax.f32 %v1545_v52, %v1560_v3  ;;  %v1572_v36 = vmax.f32 %v1546_v22, %v1562_v34  ;;  %v1564_v7 = vsel %vm1555_vm1, %v1561_v30, %v1563_v31  ;;  %v1570_v37 = vmax.f32 %v1544_v21, %v1558_v33 }
 0x1aa   : > { %v1591_v10 = vrot.slane %v1581_v5, 7  ;;  %v1573_v38 = vmax.f32 %v1547_v24, %v1564_v7  ;;  %v1577_v39 = vsel %vm1555_vm1, %v1563_v31, %v1576_v32  ;;  %v1583_v43 = vmax.f32 %v1549_v26, %v1576_v32 }
 0x1ab   : > { %v1592_v40 = vrot.slane %v1571_v35, 7  ;;  %v1594_v41 = vrot.slane %v1572_v36, 7  ;;  %v1582_v42 = vmax.f32 %v1548_v25, %v1577_v39  ;;  %v1574_v58 = vmax.f32 %v1548_v25, %v1563_v31 }
 0x1ac   : > { %v1596_v23 = vrot.slane %v1573_v38, 7  ;;  %v1600_v54 = vrot.slane %v1583_v43, 7 }
 0x1ad   : > { %v1593_v45 = vsel %vm1590_vm3, %v1591_v10, %v1592_v40  ;;  %v1595_v46 = vsel %vm1590_vm3, %v1592_v40, %v1594_v41  ;;  %v1598_v47 = vrot.slane %v1582_v42, 7 }
 0x1ae   : > { %v1607_v48 = vmax.f32 %v1570_v37, %v1593_v45  ;;  %v1608_v49 = vmax.f32 %v1571_v35, %v1595_v46  ;;  %v1597_v50 = vsel %vm1590_vm3, %v1594_v41, %v1596_v23 }
 0x1af   : > { %v1599_v51 = vsel %vm1590_vm3, %v1596_v23, %v1598_v47  ;;  %v1609_v53 = vmax.f32 %v1572_v36, %v1597_v50  ;;  %v1601_v59 = vsel %vm1590_vm3, %v1598_v47, %v1600_v54 }
 0x1b0   : > { %v2170_v55 = vpack.c.bf16 %v1608_v49, %v1607_v48  ;;  %v1610_v56 = vmax.f32 %v1573_v38, %v1599_v51  ;;  %v1611_v60 = vmax.f32 %v1574_v58, %v1601_v59 }
 0x1b2   : > { %2171 = vmatpush3.bf16.msra.mxu0 %v2170_v55  ;;  %v2173_v57 = vpack.c.bf16 %v1610_v56, %v1609_v53 }
 0x1b3   : > { %2172 = vmatprep.subr.bf16.mxu0 %v2412_v44 }
 0x1b6   : > { %2174 = vmatpush3.bf16.msra.mxu0 %v2173_v57 }
 0x1b7   : > { %2164 = vmatprep.subr.mxu0 %v2414_v2 }
 0x1ba   : > { %2165 = vmatpush3.msk.msra.mxu0 %vm1617_vm4, %v1611_v60 }
 0x1bb   : > { %2167 = vmatmul.mubr.msk.f32.vlgmr.msra.gmra.mrb[0].mxu0 %vm1613_vm5, %v1612_v61 }
 0x28e   : > { %v1687_v62 = vpop.f32.mrb[0].mxu0 }
 0x28f   : > { %1692 = vst.msk [vmem:[%s2488_s7] sm:$0xf] %vm1691_vm6, %v1687_v62  ;;  %v2168_v63 = vpop.f32.mrb[1].mxu0 }
 0x290 PF: > { %s15_s22 = sadd.s32 1, %s2406_s22   ;;  %s2924_s18 = smov %s2398_s20 }
 0x291   : > { %p12_p12 = scmp.ge.s32.totalorder %s15_s22, 6   ;;  %s2925_s19 = smov %s2402_s21 }
 0x292   : > { %s2926_s20 = smov %s2929_s23  ;;  %s2927_s21 = smov %s2933_s24 }
 0x293   :  { %14 = sbr.rel (!%p12_p12) target bundleno = 3 (0x3), region = 92 }

// kernel: cnn_encoder.4
= control target key start
LH: loop header
LB: loop body
LE: loop exit
PB: predicated region body
PF: predicated region fallthrough
CT: control target
= control target key end

     0   :  { %s5258_s18 = smov 0   ;;  %s5260_s19 = smov 0   ;;  %s6333_s0 = inlined_call_operand.vmem [shape: f32[2,280,3], index: 0, kind: input, shape index: {}]   ;;  %s6334_s1 = inlined_call_operand.vmem [shape: bf16[9,3,64], index: 1, kind: input, shape index: {}]   ;;  %s6335_s2 = inlined_call_operand.vmem [shape: f32[1,64], index: 2, kind: input, shape index: {}]   ;;  %s6336_s3 = inlined_call_operand.vmem [shape: f32[1,64], index: 3, kind: input, shape index: {}]   ;;  %s6337_s4 = inlined_call_operand.vmem [shape: f32[49,224], index: 4, kind: input, shape index: {}]   ;;  %s6338_s5 = inlined_call_operand.vmem [shape: f32[2,49,64], index: 5, kind: output, shape index: {}]  }
   0x1   :  { %s5262_s20 = smov 0   ;;  %s5264_s21 = smov 0  }
   0x2   :  { %s5266_s22 = smov 0  }
   0x3 LB: > { %s24_s23 = sadd.s32 1, %s5215_s20  ;;  %s27_s24 = sadd.s32 1, %s5219_s21  ;;  %s5223_s22 = sphi %s5266_s22, %s15_s22   ;;  %s5219_s21 = sphi %s5264_s21, %s6366_s21   ;;  %s5215_s20 = sphi %s5262_s20, %s6365_s20   ;;  %s5211_s19 = sphi %s5260_s19, %s6364_s19   ;;  %s5207_s18 = sphi %s5258_s18, %s6363_s18  }
   0x4   : > { %p25_p0 = scmp.ge.s32.totalorder %s24_s23, 2  ;;  %p4186_p1 = scmp.ge.s32.totalorder %s5223_s22, 1 }
   0x5   : > { %p209_p2 = scmp.lt.s32.totalorder %s5223_s22, 5 }
   0x6   : > { %s6368_s23 = smov (%p25_p0, %s24_s23), 0  ;;  %s6370_s24 = smov (!%p25_p0, %s27_s24), %s5219_s21 }
   0x7   : > { %p210_p3 = pnand %p4186_p1, %p209_p2  ;;  %p29_p4 = scmp.ge.s32.totalorder %s6370_s24, 2 }
   0x8   : > { %s240_s25 = ssub.s32 (!%p210_p3), 1, %s5211_s19  ;;  %s249_s26 = smul.u32 (!%p210_p3), %s5207_s18, %s5211_s19 }
   0x9   : > { %s6372_s24 = smov (%p29_p4, %s6370_s24), 0  ;;  %213 = sbr.rel (%p210_p3) target bundleno = 879 (0x36f), region = 40 }
   0xa   : > { %s241_s27 = smul.u32 (!%p210_p3), %s5207_s18, %s240_s25  ;;  %p257_p5 = scmp.eq.s32.totalorder (!%p210_p3), %s5211_s19, 0 }
   0xb   : > { %p250_p6 = scmp.lt.s32.totalorder (!%p210_p3), %s249_s26, 1  ;;  %p258_p7 = scmp.eq.s32.totalorder (!%p210_p3), %s5207_s18, 0 }
   0xc   : > { %p242_p8 = scmp.lt.s32.totalorder (!%p210_p3), %s241_s27, 1 }
   0xd   : > { %p259_p9 = pnand (!%p210_p3), %p258_p7, %p257_p5 }
  0x10   : > { %s6374_s26 = smov (!%p250_p6, %s249_s26), 1  ;;  %s6376_s27 = smov (!%p242_p8, %s241_s27), 1 }
  0x11   : > { %s5139_s28 = smul.u32 56, %s6374_s26  ;;  %vm263_vm0 = vcmask (!%p259_p9), 516096   ;;  %v5225_v0 = vmov (!%p259_p9), 0.0  }
  0x12   : > { %s5138_s29 = smul.u32 280, %s6376_s27  ;;  %264 = vst.msk [vmem:[#allocation3] sm:$0x1] (!%p259_p9), %vm263_vm0, %v5225_v0  ;;  %265 = vst.msk [vmem:[#allocation4] sm:$0x1] (!%p259_p9), %vm263_vm0, %v5225_v0 }
  0x13   : > { %s5301_s7 = scalar_lea.vmem %s6338_s5, %s5139_s28  ;;  %262 = sbr.rel (%p259_p9) target bundleno = 26 (0x1a), region = 44 }
  0x14   : > { %s5306_s10 = scalar_lea.vmem %s6333_s0, %s5138_s29 }
  0x1a PF: > { %p4189_p10 = scmp.ne.s32.totalorder %s5211_s19, 0 }
  0x1b   : > { %v4190_v1 = vld [vmem:[%s6334_s1 + $0x2] sm:$0x3] (!%p4189_p10)  ;;  %vm415_vm1 = vcmask (!%p4189_p10), 1040384   ;;  %vm416_vm2 = vcmask (!%p4189_p10), 1041408   ;;  %v5226_v3 = vmov (!%p4189_p10), 65535   ;;  %v318_v6 = vld [vmem:[%s5306_s10 + $0x9] sm:$0xff] (!%p4189_p10) }
  0x1c   : > { %268 = sbr.rel (%p4189_p10) target bundleno = 551 (0x227), region = 48  ;;  %v317_v2 = vld [vmem:[%s5306_s10 + $0x1] sm:$0xff] (!%p4189_p10)  ;;  %v417_v4 = vsel (!%p4189_p10), %vm415_vm1, 4294967295, %v5226_v3  ;;  %vm366_vm3 = vcmask (!%p4189_p10), 23552   ;;  %v1375_v7 = vld [vmem:[%s5306_s10 + $0x11] sm:$0xff] (!%p4189_p10)  ;;  %v1376_v10 = vld [vmem:[%s5306_s10 + $0x19] sm:$0xff] (!%p4189_p10) }
  0x1d   : > { %v4257_v5 = vld [vmem:[%s6334_s1 + $0x8] sm:$0x3] (!%p4189_p10)  ;;  %v5318_v8 = vsel (!%p4189_p10), %vm416_vm2, %v417_v4, 0  ;;  %v348_v9 = vpack.c.bf16 (!%p4189_p10), %v318_v6, %v317_v2  ;;  %v316_v11 = vld [vmem:[%s6334_s1] sm:$0x3] (!%p4189_p10)  ;;  %v1406_v15 = vpack.c.bf16 (!%p4189_p10), %v1376_v10, %v1375_v7  ;;  %v1379_v20 = vld [vmem:[%s5306_s10 + $0x31] sm:$0xff] (!%p4189_p10) }
  0x1e   : > { %v1377_v12 = vld [vmem:[%s5306_s10 + $0x21] sm:$0xff] (!%p4189_p10)  ;;  %v420_v13 = vand.u32 (!%p4189_p10), %v4190_v1, %v5318_v8  ;;  %v5327_v14 = vand.u32 (!%p4189_p10), %v4257_v5, %v5318_v8  ;;  %v631_v16 = vand.u32 (!%p4189_p10), %v5318_v8, %v316_v11  ;;  %v1378_v17 = vld [vmem:[%s5306_s10 + $0x29] sm:$0xff] (!%p4189_p10)  ;;  %v1380_v21 = vld [vmem:[%s5306_s10 + $0x39] sm:$0xff] (!%p4189_p10)  ;;  %vm2832_vm4 = vcmask (!%p4189_p10), 523264  }
  0x1f   : > { %v4274_v18 = vld [vmem:[%s6334_s1 + $0xa] sm:$0x3] (!%p4189_p10)  ;;  %4507 = vmatprep.mubr.msk.bf16.mxu1 (!%p4189_p10), %vm366_vm3, %v348_v9  ;;  %v5339_v22 = vpack.c.bf16 (!%p4189_p10), %v1378_v17, %v1377_v12  ;;  %4643 = vmatprep.mubr.msk.bf16.mxu0 (!%p4189_p10), %vm366_vm3, %v1406_v15  ;;  %v5343_v23 = vpack.c.bf16 (!%p4189_p10), %v1380_v21, %v1379_v20  ;;  %v4291_v24 = vld [vmem:[%s6334_s1 + $0xc] sm:$0x3] (!%p4189_p10)  ;;  %v1381_v25 = vld [vmem:[%s5306_s10 + $0x41] sm:$0xff] (!%p4189_p10) }
  0x20   : > { %v1764_v19 = vand.u32 (!%p4189_p10), %v4274_v18, %v5318_v8  ;;  %4505 = vmatprep.subr.bf16.mxu1 (!%p4189_p10), %v420_v13  ;;  %4641 = vmatprep.subr.bf16.mxu0 (!%p4189_p10), %v5327_v14  ;;  %v1382_v26 = vld [vmem:[%s5306_s10 + $0x49] sm:$0xff] (!%p4189_p10)  ;;  %v2055_v27 = vand.u32 (!%p4189_p10), %v4291_v24, %v5318_v8  ;;  %v1383_v28 = vld [vmem:[%s5306_s10 + $0x51] sm:$0xff] (!%p4189_p10)  ;;  %v1384_v29 = vld [vmem:[%s5306_s10 + $0x59] sm:$0xff] (!%p4189_p10) }
  0x21   : > { %4506 = vmatpush3.bf16.msra.mxu1 (!%p4189_p10), %v420_v13  ;;  %4642 = vmatpush3.bf16.msra.mxu0 (!%p4189_p10), %v5327_v14  ;;  %v5360_v30 = vpack.c.bf16 (!%p4189_p10), %v1382_v26, %v1381_v25  ;;  %v5362_v31 = vpack.c.bf16 (!%p4189_p10), %v1384_v29, %v1383_v28  ;;  %v1385_v32 = vld [vmem:[%s5306_s10 + $0x61] sm:$0xff] (!%p4189_p10)  ;;  %v1386_v33 = vld [vmem:[%s5306_s10 + $0x69] sm:$0xff] (!%p4189_p10)  ;;  %v1387_v34 = vld [vmem:[%s5306_s10 + $0x71] sm:$0xff] (!%p4189_p10) }
  0x22   : > { %4539 = vmatprep.subr.bf16.mxu1 (!%p4189_p10), %v631_v16  ;;  %4675 = vmatprep.subr.bf16.mxu0 (!%p4189_p10), %v1764_v19  ;;  %v1388_v35 = vld [vmem:[%s5306_s10 + $0x79] sm:$0xff] (!%p4189_p10)  ;;  %v4223_v36 = vld [vmem:[%s6334_s1 + $0x4] sm:$0x3] (!%p4189_p10)  ;;  %v5382_v38 = vpack.c.bf16 (!%p4189_p10), %v1386_v33, %v1385_v32  ;;  %v1390_v41 = vld [vmem:[%s5306_s10 + $0x89] sm:$0xff] (!%p4189_p10) }
  0x23   : > { %v5380_v37 = vand.u32 %v4223_v36, %v5318_v8  ;;  %v5384_v39 = vpack.c.bf16 %v1388_v35, %v1387_v34  ;;  %v1389_v40 = vld [vmem:[%s5306_s10 + $0x81] sm:$0xff]  ;;  %v1666_v42 = vld [vmem:[%s5306_s10 + $0x12] sm:$0xff]  ;;  %v1669_v49 = vld [vmem:[%s5306_s10 + $0x2a] sm:$0xff] }
  0x24   : > { %4508 = vmatmul.mubr.msk.bf16.vlgmr.msra.gmra.mrb[0].mxu1 %vm366_vm3, %v1406_v15  ;;  %4644 = vmatmul.mubr.msk.bf16.vlgmr.msra.gmra.mrb[0].mxu0 %vm366_vm3, %v5339_v22  ;;  %v1667_v43 = vld [vmem:[%s5306_s10 + $0x1a] sm:$0xff]  ;;  %v5399_v44 = vpack.c.bf16 %v1390_v41, %v1389_v40  ;;  %v335_v46 = vld [vmem:[%s5306_s10 + $0x91] sm:$0xff]  ;;  %v1668_v48 = vld [vmem:[%s5306_s10 + $0x22] sm:$0xff] }
  0x25   : > { %4540 = vmatpush3.bf16.msra.mxu1 %v631_v16  ;;  %4676 = vmatpush3.bf16.msra.mxu0 %v1764_v19  ;;  %v5401_v45 = vpack.c.bf16 %v1667_v43, %v1666_v42  ;;  %v336_v47 = vld [vmem:[%s5306_s10 + $0x99] sm:$0xff]  ;;  %v337_v50 = vld [vmem:[%s5306_s10 + $0xa1] sm:$0xff]  ;;  %v338_v51 = vld [vmem:[%s5306_s10 + $0xa9] sm:$0xff]  ;;  %v5424_v56 = vpack.c.bf16 %v1669_v49, %v1668_v48 }
  0x26   : > { %4511 = vmatprep.mubr.msk.bf16.mxu1 %vm366_vm3, %v5339_v22  ;;  %4647 = vmatprep.mubr.msk.bf16.mxu0 %vm366_vm3, %v5343_v23  ;;  %v1670_v52 = vld [vmem:[%s5306_s10 + $0x32] sm:$0xff]  ;;  %v1671_v53 = vld [vmem:[%s5306_s10 + $0x3a] sm:$0xff]  ;;  %v4308_v54 = vld [vmem:[%s6334_s1 + $0xe] sm:$0x3]  ;;  %v5422_v55 = vpack.c.bf16 %v336_v47, %v335_v46  ;;  %v5426_v57 = vpack.c.bf16 %v338_v51, %v337_v50 }
  0x27   : > { %4709 = vmatprep.subr.bf16.mxu0 %v2055_v27  ;;  %4573 = vmatprep.subr.bf16.mxu1 %v5380_v37  ;;  %v5428_v58 = vpack.c.bf16 %v1671_v53, %v1670_v52  ;;  %v5431_v59 = vand.u32 %v4308_v54, %v5318_v8  ;;  %v339_v60 = vld [vmem:[%s5306_s10 + $0xb1] sm:$0xff]  ;;  %v340_v61 = vld [vmem:[%s5306_s10 + $0xb9] sm:$0xff]  ;;  %v1672_v62 = vld [vmem:[%s5306_s10 + $0x42] sm:$0xff] }
  0x28   : > { %v1673_v63 = vld [vmem:[%s5306_s10 + $0x4a] sm:$0xff]  ;;  %v341_v0 = vld [vmem:[%s5306_s10 + $0xc1] sm:$0xff]  ;;  %v1674_v2 = vld [vmem:[%s5306_s10 + $0x52] sm:$0xff]  ;;  %v5450_v4 = vpack.c.bf16 %v340_v61, %v339_v60 }
  0x29   : > { %v342_v1 = vld [vmem:[%s5306_s10 + $0xc9] sm:$0xff]  ;;  %v1675_v3 = vld [vmem:[%s5306_s10 + $0x5a] sm:$0xff]  ;;  %v5452_v5 = vpack.c.bf16 %v1673_v63, %v1672_v62  ;;  %v343_v9 = vld [vmem:[%s5306_s10 + $0xd1] sm:$0xff] }
  0x2a   : > { %v5454_v6 = vpack.c.bf16 %v342_v1, %v341_v0  ;;  %v5456_v7 = vpack.c.bf16 %v1675_v3, %v1674_v2  ;;  %v344_v10 = vld [vmem:[%s5306_s10 + $0xd9] sm:$0xff]  ;;  %v1676_v11 = vld [vmem:[%s5306_s10 + $0x62] sm:$0xff]  ;;  %v1677_v12 = vld [vmem:[%s5306_s10 + $0x6a] sm:$0xff] }
  0x2b   : > { %v345_v13 = vld [vmem:[%s5306_s10 + $0xe1] sm:$0xff]  ;;  %v346_v15 = vld [vmem:[%s5306_s10 + $0xe9] sm:$0xff]  ;;  %v1678_v16 = vld [vmem:[%s5306_s10 + $0x72] sm:$0xff]  ;;  %v5474_v18 = vpack.c.bf16 %v344_v10, %v343_v9  ;;  %v5476_v19 = vpack.c.bf16 %v1677_v12, %v1676_v11 }
  0x2c   : > { %4512 = vmatmul.mubr.msk.bf16.gmra.mrb[4].mxu1 %vm366_vm3, %v5343_v23  ;;  %4648 = vmatmul.mubr.msk.bf16.gmra.mrb[4].mxu0 %vm366_vm3, %v5360_v30  ;;  %v1679_v17 = vld [vmem:[%s5306_s10 + $0x7a] sm:$0xff]  ;;  %v5478_v20 = vpack.c.bf16 %v346_v15, %v345_v13  ;;  %v347_v24 = vld [vmem:[%s5306_s10 + $0xf1] sm:$0x1]  ;;  %v1680_v25 = vld [vmem:[%s5306_s10 + $0x82] sm:$0xff] }
  0x2d   : > { %4515 = vmatprep.mubr.msk.bf16.mxu1 %vm366_vm3, %v5360_v30  ;;  %4651 = vmatprep.mubr.msk.bf16.mxu0 %vm366_vm3, %v5362_v31  ;;  %v5480_v21 = vpack.c.bf16 %v1679_v17, %v1678_v16  ;;  %v1681_v26 = vld [vmem:[%s5306_s10 + $0x8a] sm:$0xff]  ;;  %v1682_v29 = vld [vmem:[%s5306_s10 + $0x92] sm:$0xff]  ;;  %v1683_v32 = vld [vmem:[%s5306_s10 + $0x9a] sm:$0xff]  ;;  %v363_v33 = vpack.c.bf16 %v347_v24, %v347_v24 }
  0x2e   : > { %v270_v28 = vld [vmem:[%s5306_s10 + $0x8] sm:$0xff]  ;;  %v5497_v34 = vpack.c.bf16 %v1681_v26, %v1680_v25  ;;  %v5499_v36 = vpack.c.bf16 %v1683_v32, %v1682_v29  ;;  %v271_v40 = vld [vmem:[%s5306_s10 + $0x10] sm:$0xff]  ;;  %v272_v41 = vld [vmem:[%s5306_s10 + $0x18] sm:$0xff] }
  0x2f   : > { %v1684_v42 = vld [vmem:[%s5306_s10 + $0xa2] sm:$0xff]  ;;  %v1685_v43 = vld [vmem:[%s5306_s10 + $0xaa] sm:$0xff]  ;;  %v1686_v48 = vld [vmem:[%s5306_s10 + $0xb2] sm:$0xff]  ;;  %v5518_v51 = vpack.c.bf16 %v272_v41, %v271_v40 }
  0x30   : > { %v273_v46 = vld [vmem:[%s5306_s10 + $0x20] sm:$0xff]  ;;  %v274_v47 = vld [vmem:[%s5306_s10 + $0x28] sm:$0xff]  ;;  %v5520_v52 = vpack.c.bf16 %v1685_v43, %v1684_v42  ;;  %v275_v61 = vld [vmem:[%s5306_s10 + $0x30] sm:$0xff] }
  0x31   : > { %v1687_v49 = vld [vmem:[%s5306_s10 + $0xba] sm:$0xff]  ;;  %v4240_v50 = vld [vmem:[%s6334_s1 + $0x6] sm:$0x3]  ;;  %v5522_v53 = vpack.c.bf16 %v274_v47, %v273_v46  ;;  %v1689_v0 = vld [vmem:[%s5306_s10 + $0xca] sm:$0xff] }
  0x32   : > { %v5524_v54 = vpack.c.bf16 %v1687_v49, %v1686_v48  ;;  %v5527_v60 = vand.u32 %v4240_v50, %v5318_v8  ;;  %v276_v62 = vld [vmem:[%s5306_s10 + $0x38] sm:$0xff]  ;;  %v1688_v63 = vld [vmem:[%s5306_s10 + $0xc2] sm:$0xff]  ;;  %v279_v13 = vld [vmem:[%s5306_s10 + $0x50] sm:$0xff] }
  0x33   : > { %v277_v1 = vld [vmem:[%s5306_s10 + $0x40] sm:$0xff]  ;;  %v278_v2 = vld [vmem:[%s5306_s10 + $0x48] sm:$0xff]  ;;  %v1690_v3 = vld [vmem:[%s5306_s10 + $0xd2] sm:$0xff]  ;;  %v5549_v10 = vpack.c.bf16 %v1689_v0, %v1688_v63 }
  0x34   : > { %4516 = vmatmul.mubr.msk.bf16.gmra.mrb[8].mxu1 %vm366_vm3, %v5362_v31  ;;  %4652 = vmatmul.mubr.msk.bf16.gmra.mrb[8].mxu0 %vm366_vm3, %v5382_v38  ;;  %v1691_v9 = vld [vmem:[%s5306_s10 + $0xda] sm:$0xff]  ;;  %v5551_v11 = vpack.c.bf16 %v278_v2, %v277_v1  ;;  %v1692_v16 = vld [vmem:[%s5306_s10 + $0xe2] sm:$0xff]  ;;  %v1693_v17 = vld [vmem:[%s5306_s10 + $0xea] sm:$0xff] }
  0x35   : > { %4519 = vmatprep.mubr.msk.bf16.mxu1 %vm366_vm3, %v5382_v38  ;;  %4655 = vmatprep.mubr.msk.bf16.mxu0 %vm366_vm3, %v5384_v39  ;;  %v5553_v12 = vpack.c.bf16 %v1691_v9, %v1690_v3  ;;  %v280_v15 = vld [vmem:[%s5306_s10 + $0x58] sm:$0xff]  ;;  %v281_v24 = vld [vmem:[%s5306_s10 + $0x60] sm:$0xff]  ;;  %v282_v25 = vld [vmem:[%s5306_s10 + $0x68] sm:$0xff]  ;;  %v5573_v29 = vpack.c.bf16 %v1693_v17, %v1692_v16 }
  0x36   : > { %v1694_v26 = vld [vmem:[%s5306_s10 + $0xf2] sm:$0xff]  ;;  %v5575_v32 = vpack.c.bf16 %v282_v25, %v281_v24  ;;  %v1696_v41 = vld [vmem:[%s5306_s10 + $0x102] sm:$0x1]  ;;  %v286_v43 = vld [vmem:[%s5306_s10 + $0x88] sm:$0xff] }
  0x37   : > { %v284_v40 = vld [vmem:[%s5306_s10 + $0x78] sm:$0xff]  ;;  %v285_v42 = vld [vmem:[%s5306_s10 + $0x80] sm:$0xff]  ;;  %v1712_v47 = vpack.c.bf16 %v1696_v41, %v1696_v41  ;;  %v287_v49 = vld [vmem:[%s5306_s10 + $0x90] sm:$0xff] }
  0x38   : > { %v5594_v48 = vpack.c.bf16 %v286_v43, %v285_v42  ;;  %v288_v50 = vld [vmem:[%s5306_s10 + $0x98] sm:$0xff]  ;;  %v4325_v63 = vld [vmem:[%s6334_s1 + $0x10] sm:$0x3]  ;;  %v297_v24 = vld [vmem:[%s5306_s10 + $0xe0] sm:$0xff] }
  0x39   : > { %v5610_v0 = vpack.c.bf16 %v288_v50, %v287_v49  ;;  %v5615_v2 = vand.u32 %v4325_v63, %v5318_v8  ;;  %v291_v3 = vld [vmem:[%s5306_s10 + $0xb0] sm:$0xff]  ;;  %v292_v9 = vld [vmem:[%s5306_s10 + $0xb8] sm:$0xff]  ;;  %v293_v8 = vld [vmem:[%s5306_s10 + $0xc0] sm:$0xff] }
  0x3a   : > { %v296_v17 = vld [vmem:[%s5306_s10 + $0xd8] sm:$0xff]  ;;  %v298_v25 = vld [vmem:[%s5306_s10 + $0xe8] sm:$0xff] }
  0x3b   : > { %v794_v41 = vld [vmem:[%s5306_s10 + $0xa] sm:$0xff] }
  0x3c   : > { %4520 = vmatmul.mubr.msk.bf16.gmra.mrb[12].mxu1 %vm366_vm3, %v5384_v39  ;;  %4656 = vmatmul.mubr.msk.bf16.gmra.mrb[12].mxu0 %vm366_vm3, %v5399_v44  ;;  %v1986_v49 = vld [vmem:[%s5306_s10 + $0x108] sm:$0xff] }
  0x3d   : > { %4523 = vmatprep.mubr.msk.bf16.mxu1 %vm366_vm3, %v5399_v44  ;;  %4677 = vmatprep.mubr.msk.bf16.mxu0 %vm366_vm3, %v5401_v45 }
  0x44   : > { %4524 = vmatmul.mubr.msk.bf16.gmra.mrb[16].mxu1 %vm366_vm3, %v5422_v55  ;;  %4678 = vmatmul.mubr.msk.bf16.vlgmr.msra.gmra.mrb[0].mxu0 %vm366_vm3, %v5424_v56 }
  0x45   : > { %4710 = vmatpush3.bf16.msra.mxu0 %v2055_v27  ;;  %4527 = vmatprep.mubr.msk.bf16.mxu1 %vm366_vm3, %v5426_v57  ;;  %v269_v27 = vld [vmem:[%s5306_s10] sm:$0xff] }
  0x46   : > { %4681 = vmatprep.mubr.msk.bf16.mxu0 %vm366_vm3, %v5428_v58  ;;  %4743 = vmatprep.subr.bf16.mxu0 %v5431_v59  ;;  %v300_v35 = vpack.c.bf16 %v270_v28, %v269_v27  ;;  %v1695_v27 = vld [vmem:[%s5306_s10 + $0xfa] sm:$0xff]  ;;  %v5571_v28 = vpack.c.bf16 %v280_v15, %v279_v13  ;;  %v294_v13 = vld [vmem:[%s5306_s10 + $0xc8] sm:$0xff]  ;;  %v5631_v15 = vpack.c.bf16 %v292_v9, %v291_v3 }
  0x47   : > { %v5633_v16 = vpack.c.bf16 %v294_v13, %v293_v8 }
  0x4c   : > { %4528 = vmatmul.mubr.msk.bf16.gmra.mrb[20].mxu1 %vm366_vm3, %v5450_v4  ;;  %4682 = vmatmul.mubr.msk.bf16.gmra.mrb[4].mxu0 %vm366_vm3, %v5452_v5 }
  0x4d   : > { %4531 = vmatprep.mubr.msk.bf16.mxu1 %vm366_vm3, %v5454_v6  ;;  %4685 = vmatprep.mubr.msk.bf16.mxu0 %vm366_vm3, %v5456_v7 }
  0x54   : > { %4532 = vmatmul.mubr.msk.bf16.gmra.mrb[24].mxu1 %vm366_vm3, %v5474_v18  ;;  %4686 = vmatmul.mubr.msk.bf16.gmra.mrb[8].mxu0 %vm366_vm3, %v5476_v19 }
  0x55   : > { %4535 = vmatprep.mubr.msk.bf16.mxu1 %vm366_vm3, %v5478_v20  ;;  %4689 = vmatprep.mubr.msk.bf16.mxu0 %vm366_vm3, %v5480_v21 }
  0x5c   : > { %4536 = vmatmul.mubr.msk.bf16.gmra.mrb[28].mxu1 %vm366_vm3, %v363_v33  ;;  %4690 = vmatmul.mubr.msk.bf16.gmra.mrb[12].mxu0 %vm366_vm3, %v5497_v34  ;;  %v5577_v33 = vpack.c.bf16 %v1695_v27, %v1694_v26  ;;  %v5649_v27 = vpack.c.bf16 %v298_v25, %v297_v24 }
  0x5d   : > { %4541 = vmatprep.mubr.msk.bf16.mxu1 %vm366_vm3, %v300_v35  ;;  %4693 = vmatprep.mubr.msk.bf16.mxu0 %vm366_vm3, %v5499_v36  ;;  %v283_v35 = vld [vmem:[%s5306_s10 + $0x70] sm:$0xff] }
  0x5e   : > { %v5592_v46 = vpack.c.bf16 %v284_v40, %v283_v35  ;;  %v299_v35 = vld [vmem:[%s5306_s10 + $0xf0] sm:$0x1]  ;;  %v793_v40 = vld [vmem:[%s5306_s10 + $0x2] sm:$0xff] }
  0x5f   : > { %v315_v42 = vpack.c.bf16 %v299_v35, %v299_v35  ;;  %v824_v43 = vpack.c.bf16 %v794_v41, %v793_v40 }
  0x64   : > { %4542 = vmatmul.mubr.msk.bf16.vlgmr.msra.gmra.mrb[0].mxu1 %vm366_vm3, %v5518_v51  ;;  %4694 = vmatmul.mubr.msk.bf16.gmra.mrb[16].mxu0 %vm366_vm3, %v5520_v52 }
  0x65   : > { %4574 = vmatpush3.bf16.msra.mxu1 %v5380_v37  ;;  %4545 = vmatprep.mubr.msk.bf16.mxu1 %vm366_vm3, %v5522_v53  ;;  %v5547_v37 = vpack.c.bf16 %v276_v62, %v275_v61  ;;  %v289_v61 = vld [vmem:[%s5306_s10 + $0xa0] sm:$0xff]  ;;  %v290_v62 = vld [vmem:[%s5306_s10 + $0xa8] sm:$0xff] }
  0x66   : > { %4697 = vmatprep.mubr.msk.bf16.mxu0 %vm366_vm3, %v5524_v54  ;;  %4607 = vmatprep.subr.bf16.mxu1 %v5527_v60  ;;  %v5612_v1 = vpack.c.bf16 %v290_v62, %v289_v61  ;;  %v1987_v62 = vld [vmem:[%s5306_s10 + $0x110] sm:$0x1] }
  0x67   : > { %v2003_v63 = vpack.c.bf16 %v1987_v62, %v1987_v62 }
  0x6c   : > { %4546 = vmatmul.mubr.msk.bf16.gmra.mrb[4].mxu1 %vm366_vm3, %v5547_v37  ;;  %4698 = vmatmul.mubr.msk.bf16.gmra.mrb[20].mxu0 %vm366_vm3, %v5549_v10 }
  0x6d   : > { %4549 = vmatprep.mubr.msk.bf16.mxu1 %vm366_vm3, %v5551_v11  ;;  %4701 = vmatprep.mubr.msk.bf16.mxu0 %vm366_vm3, %v5553_v12 }
  0x74   : > { %4550 = vmatmul.mubr.msk.bf16.gmra.mrb[8].mxu1 %vm366_vm3, %v5571_v28  ;;  %4702 = vmatmul.mubr.msk.bf16.gmra.mrb[24].mxu0 %vm366_vm3, %v5573_v29 }
  0x75   : > { %4553 = vmatprep.mubr.msk.bf16.mxu1 %vm366_vm3, %v5575_v32  ;;  %4705 = vmatprep.mubr.msk.bf16.mxu0 %vm366_vm3, %v5577_v33 }
  0x7c   : > { %4554 = vmatmul.mubr.msk.bf16.gmra.mrb[12].mxu1 %vm366_vm3, %v5592_v46  ;;  %4706 = vmatmul.mubr.msk.bf16.gmra.mrb[28].mxu0 %vm366_vm3, %v1712_v47  ;;  %v1985_v47 = vld [vmem:[%s5306_s10 + $0x100] sm:$0xff] }
  0x7d   : > { %4557 = vmatprep.mubr.msk.bf16.mxu1 %vm366_vm3, %v5594_v48  ;;  %4711 = vmatprep.mubr.msk.bf16.mxu0 %vm366_vm3, %v5522_v53  ;;  %v2002_v61 = vpack.c.bf16 %v1986_v49, %v1985_v47 }
  0x84   : > { %4558 = vmatmul.mubr.msk.bf16.gmra.mrb[16].mxu1 %vm366_vm3, %v5610_v0  ;;  %4712 = vmatmul.mubr.msk.bf16.vlgmr.msra.gmra.mrb[0].mxu0 %vm366_vm3, %v5547_v37 }
  0x85   : > { %4744 = vmatpush3.bf16.msra.mxu0 %v5431_v59  ;;  %4561 = vmatprep.mubr.msk.bf16.mxu1 %vm366_vm3, %v5612_v1  ;;  %v295_v59 = vld [vmem:[%s5306_s10 + $0xd0] sm:$0xff] }
  0x86   : > { %4715 = vmatprep.mubr.msk.bf16.mxu0 %vm366_vm3, %v5551_v11  ;;  %4777 = vmatprep.subr.bf16.mxu0 %v5615_v2  ;;  %v5647_v26 = vpack.c.bf16 %v296_v17, %v295_v59 }
  0x8c   : > { %4562 = vmatmul.mubr.msk.bf16.gmra.mrb[20].mxu1 %vm366_vm3, %v5631_v15  ;;  %4716 = vmatmul.mubr.msk.bf16.gmra.mrb[4].mxu0 %vm366_vm3, %v5571_v28 }
  0x8d   : > { %4565 = vmatprep.mubr.msk.bf16.mxu1 %vm366_vm3, %v5633_v16  ;;  %4719 = vmatprep.mubr.msk.bf16.mxu0 %vm366_vm3, %v5575_v32 }
  0x94   : > { %4566 = vmatmul.mubr.msk.bf16.gmra.mrb[24].mxu1 %vm366_vm3, %v5647_v26  ;;  %4720 = vmatmul.mubr.msk.bf16.gmra.mrb[8].mxu0 %vm366_vm3, %v5592_v46 }
  0x95   : > { %4569 = vmatprep.mubr.msk.bf16.mxu1 %vm366_vm3, %v5649_v27  ;;  %4723 = vmatprep.mubr.msk.bf16.mxu0 %vm366_vm3, %v5594_v48 }
  0x9c   : > { %4570 = vmatmul.mubr.msk.bf16.gmra.mrb[28].mxu1 %vm366_vm3, %v315_v42  ;;  %4724 = vmatmul.mubr.msk.bf16.gmra.mrb[12].mxu0 %vm366_vm3, %v5610_v0 }
  0x9d   : > { %4575 = vmatprep.mubr.msk.bf16.mxu1 %vm366_vm3, %v824_v43  ;;  %4727 = vmatprep.mubr.msk.bf16.mxu0 %vm366_vm3, %v5612_v1 }
  0xa4   : > { %4576 = vmatmul.mubr.msk.bf16.vlgmr.msra.gmra.mrb[0].mxu1 %vm366_vm3, %v5401_v45  ;;  %4728 = vmatmul.mubr.msk.bf16.gmra.mrb[16].mxu0 %vm366_vm3, %v5631_v15  ;;  %v1983_v45 = vld [vmem:[%s5306_s10 + $0xf0] sm:$0xff] }
  0xa5   : > { %4608 = vmatpush3.bf16.msra.mxu1 %v5527_v60  ;;  %4579 = vmatprep.mubr.msk.bf16.mxu1 %vm366_vm3, %v5424_v56  ;;  %v1984_v60 = vld [vmem:[%s5306_s10 + $0xf8] sm:$0xff] }
  0xa6   : > { %4731 = vmatprep.mubr.msk.bf16.mxu0 %vm366_vm3, %v5633_v16  ;;  %4853 = vmatprep.subr.bf16.mxu1 %v5327_v14  ;;  %v5690_v50 = vpack.c.bf16 %v1984_v60, %v1983_v45 }
  0xac   : > { %4580 = vmatmul.mubr.msk.bf16.gmra.mrb[4].mxu1 %vm366_vm3, %v5428_v58  ;;  %4732 = vmatmul.mubr.msk.bf16.gmra.mrb[20].mxu0 %vm366_vm3, %v5647_v26 }
  0xad   : > { %4583 = vmatprep.mubr.msk.bf16.mxu1 %vm366_vm3, %v5452_v5  ;;  %4735 = vmatprep.mubr.msk.bf16.mxu0 %vm366_vm3, %v5649_v27 }
  0xb4   : > { %4584 = vmatmul.mubr.msk.bf16.gmra.mrb[8].mxu1 %vm366_vm3, %v5456_v7  ;;  %4736 = vmatmul.mubr.msk.bf16.gmra.mrb[24].mxu0 %vm366_vm3, %v5690_v50 }
  0xb5   : > { %4587 = vmatprep.mubr.msk.bf16.mxu1 %vm366_vm3, %v5476_v19  ;;  %4739 = vmatprep.mubr.msk.bf16.mxu0 %vm366_vm3, %v2002_v61 }
  0xbc   : > { %4588 = vmatmul.mubr.msk.bf16.gmra.mrb[12].mxu1 %vm366_vm3, %v5480_v21  ;;  %4740 = vmatmul.mubr.msk.bf16.gmra.mrb[28].mxu0 %vm366_vm3, %v2003_v63 }
  0xbd   : > { %4591 = vmatprep.mubr.msk.bf16.mxu1 %vm366_vm3, %v5497_v34  ;;  %4745 = vmatprep.mubr.msk.bf16.mxu0 %vm366_vm3, %v5339_v22  ;;  %v823_v22 = vld [vmem:[%s5306_s10 + $0xf2] sm:$0x1] }
  0xc4   : > { %4592 = vmatmul.mubr.msk.bf16.gmra.mrb[16].mxu1 %vm366_vm3, %v5499_v36  ;;  %4746 = vmatmul.mubr.msk.bf16.vlgmr.msra.gmra.mrb[0].mxu0 %vm366_vm3, %v5343_v23  ;;  %v839_v23 = vpack.c.bf16 %v823_v22, %v823_v22 }
  0xc5   : > { %4778 = vmatpush3.bf16.msra.mxu0 %v5615_v2  ;;  %4595 = vmatprep.mubr.msk.bf16.mxu1 %vm366_vm3, %v5520_v52 }
  0xc6   : > { %4749 = vmatprep.mubr.msk.bf16.mxu0 %vm366_vm3, %v5360_v30  ;;  %v2275_v30 = vld [vmem:[%s5306_s10 + $0xf9] sm:$0xff] }
  0xcc   : > { %4596 = vmatmul.mubr.msk.bf16.gmra.mrb[20].mxu1 %vm366_vm3, %v5524_v54  ;;  %4750 = vmatmul.mubr.msk.bf16.gmra.mrb[4].mxu0 %vm366_vm3, %v5362_v31  ;;  %v2276_v31 = vld [vmem:[%s5306_s10 + $0x101] sm:$0xff] }
  0xcd   : > { %4599 = vmatprep.mubr.msk.bf16.mxu1 %vm366_vm3, %v5549_v10  ;;  %4753 = vmatprep.mubr.msk.bf16.mxu0 %vm366_vm3, %v5382_v38  ;;  %v2277_v38 = vld [vmem:[%s5306_s10 + $0x109] sm:$0xff] }
  0xd4   : > { %4600 = vmatmul.mubr.msk.bf16.gmra.mrb[24].mxu1 %vm366_vm3, %v5553_v12  ;;  %4754 = vmatmul.mubr.msk.bf16.gmra.mrb[8].mxu0 %vm366_vm3, %v5384_v39 }
  0xd5   : > { %4603 = vmatprep.mubr.msk.bf16.mxu1 %vm366_vm3, %v5573_v29  ;;  %4757 = vmatprep.mubr.msk.bf16.mxu0 %vm366_vm3, %v5399_v44  ;;  %v2293_v44 = vpack.c.bf16 %v2277_v38, %v2276_v31 }
  0xdc   : > { %4604 = vmatmul.mubr.msk.bf16.gmra.mrb[28].mxu1 %vm366_vm3, %v839_v23  ;;  %4758 = vmatmul.mubr.msk.bf16.gmra.mrb[12].mxu0 %vm366_vm3, %v5422_v55 }
  0xdd   : > { %4609 = vmatprep.mubr.msk.bf16.mxu1 %vm366_vm3, %v5518_v51  ;;  %4761 = vmatprep.mubr.msk.bf16.mxu0 %vm366_vm3, %v5426_v57  ;;  %v2278_v51 = vld [vmem:[%s5306_s10 + $0x111] sm:$0x1] }
  0xe4   : > { %4610 = vmatmul.mubr.msk.bf16.vlgmr.msra.gmra.mrb[0].mxu1 %vm366_vm3, %v5522_v53  ;;  %4762 = vmatmul.mubr.msk.bf16.gmra.mrb[16].mxu0 %vm366_vm3, %v5450_v4  ;;  %v2294_v53 = vpack.c.bf16 %v2278_v51, %v2278_v51 }
  0xe5   : > { %4854 = vmatpush3.bf16.msra.mxu1 %v5327_v14  ;;  %4613 = vmatprep.mubr.msk.bf16.mxu1 %vm366_vm3, %v5547_v37  ;;  %v2274_v14 = vld [vmem:[%s5306_s10 + $0xf1] sm:$0xff] }
  0xe6   : > { %4765 = vmatprep.mubr.msk.bf16.mxu0 %vm366_vm3, %v5454_v6  ;;  %v2292_v39 = vpack.c.bf16 %v2275_v30, %v2274_v14 }
  0xec   : > { %4614 = vmatmul.mubr.msk.bf16.gmra.mrb[4].mxu1 %vm366_vm3, %v5551_v11  ;;  %4766 = vmatmul.mubr.msk.bf16.gmra.mrb[20].mxu0 %vm366_vm3, %v5474_v18 }
  0xed   : > { %4617 = vmatprep.mubr.msk.bf16.mxu1 %vm366_vm3, %v5571_v28  ;;  %4769 = vmatprep.mubr.msk.bf16.mxu0 %vm366_vm3, %v5478_v20 }
  0xf4   : > { %4618 = vmatmul.mubr.msk.bf16.gmra.mrb[8].mxu1 %vm366_vm3, %v5575_v32  ;;  %4770 = vmatmul.mubr.msk.bf16.gmra.mrb[24].mxu0 %vm366_vm3, %v2292_v39 }
  0xf5   : > { %4621 = vmatprep.mubr.msk.bf16.mxu1 %vm366_vm3, %v5592_v46  ;;  %4773 = vmatprep.mubr.msk.bf16.mxu0 %vm366_vm3, %v2293_v44 }
  0xfc   : > { %4622 = vmatmul.mubr.msk.bf16.gmra.mrb[12].mxu1 %vm366_vm3, %v5594_v48  ;;  %4774 = vmatmul.mubr.msk.bf16.gmra.mrb[28].mxu0 %vm366_vm3, %v2294_v53 }
  0xfd   : > { %4625 = vmatprep.mubr.msk.bf16.mxu1 %vm366_vm3, %v5610_v0  ;;  %4779 = vmatprep.mubr.msk.bf16.mxu0 %vm366_vm3, %v5424_v56  ;;  %v1114_v56 = vld [vmem:[%s5306_s10 + $0x100] sm:$0x1] }
 0x104   : > { %4626 = vmatmul.mubr.msk.bf16.gmra.mrb[16].mxu1 %vm366_vm3, %v5612_v1  ;;  %4780 = vmatmul.mubr.msk.bf16.vlgmr.msra.gmra.mrb[0].mxu0 %vm366_vm3, %v5428_v58  ;;  %v1130_v58 = vpack.c.bf16 %v1114_v56, %v1114_v56 }
 0x105   : > { %4629 = vmatprep.mubr.msk.bf16.mxu1 %vm366_vm3, %v5631_v15  ;;  %4783 = vmatprep.mubr.msk.bf16.mxu0 %vm366_vm3, %v5452_v5 }
 0x10c   : > { %4630 = vmatmul.mubr.msk.bf16.gmra.mrb[20].mxu1 %vm366_vm3, %v5633_v16  ;;  %4784 = vmatmul.mubr.msk.bf16.gmra.mrb[4].mxu0 %vm366_vm3, %v5456_v7 }
 0x10d   : > { %4633 = vmatprep.mubr.msk.bf16.mxu1 %vm366_vm3, %v5647_v26  ;;  %4787 = vmatprep.mubr.msk.bf16.mxu0 %vm366_vm3, %v5476_v19 }
 0x114   : > { %4634 = vmatmul.mubr.msk.bf16.gmra.mrb[24].mxu1 %vm366_vm3, %v5649_v27  ;;  %4788 = vmatmul.mubr.msk.bf16.gmra.mrb[8].mxu0 %vm366_vm3, %v5480_v21 }
 0x115   : > { %4637 = vmatprep.mubr.msk.bf16.mxu1 %vm366_vm3, %v5690_v50  ;;  %4791 = vmatprep.mubr.msk.bf16.mxu0 %vm366_vm3, %v5497_v34 }
 0x11c   : > { %4638 = vmatmul.mubr.msk.bf16.gmra.mrb[28].mxu1 %vm366_vm3, %v1130_v58  ;;  %4792 = vmatmul.mubr.msk.bf16.gmra.mrb[12].mxu0 %vm366_vm3, %v5499_v36 }
 0x11d   : > { %4659 = vmatprep.mubr.msk.bf16.mxu1 %vm366_vm3, %v5422_v55  ;;  %4795 = vmatprep.mubr.msk.bf16.mxu0 %vm366_vm3, %v5520_v52  ;;  %v2567_v55 = vld [vmem:[%s5306_s10 + $0x102] sm:$0xff] }
 0x124   : > { %4660 = vmatmul.mubr.msk.bf16.vlgmr.msra.gmra.mrb[16].mxu1 %vm366_vm3, %v5426_v57  ;;  %4796 = vmatmul.mubr.msk.bf16.gmra.mrb[16].mxu0 %vm366_vm3, %v5524_v54  ;;  %v2568_v57 = vld [vmem:[%s5306_s10 + $0x10a] sm:$0xff] }
 0x125   : > { %4663 = vmatprep.mubr.msk.bf16.mxu1 %vm366_vm3, %v5450_v4  ;;  %4799 = vmatprep.mubr.msk.bf16.mxu0 %vm366_vm3, %v5549_v10  ;;  %v2584_v5 = vpack.c.bf16 %v2568_v57, %v2567_v55  ;;  %v1405_v4 = vld [vmem:[%s5306_s10 + $0x101] sm:$0x1] }
 0x126   : > { %v1421_v7 = vpack.c.bf16 %v1405_v4, %v1405_v4 }
 0x12c   : > { %4664 = vmatmul.mubr.msk.bf16.gmra.mrb[20].mxu1 %vm366_vm3, %v5454_v6  ;;  %4800 = vmatmul.mubr.msk.bf16.gmra.mrb[20].mxu0 %vm366_vm3, %v5553_v12  ;;  %v2569_v6 = vld [vmem:[%s5306_s10 + $0x112] sm:$0x1]  ;;  %s2830_s10 = smul.u32 248, %s5207_s18 }
 0x12d   : > { %4667 = vmatprep.mubr.msk.bf16.mxu1 %vm366_vm3, %v5474_v18  ;;  %4803 = vmatprep.mubr.msk.bf16.mxu0 %vm366_vm3, %v5573_v29  ;;  %v2585_v18 = vpack.c.bf16 %v2569_v6, %v2569_v6  ;;  %v2865_v29 = vlaneseq }
 0x12e   : > { %s5862_s13 = scalar_lea.vmem [#allocation2], %s2830_s10 }
 0x12f   : > { %v5847_v32 = vshrl.u32 %v2865_v29, 7 }
 0x131   : > { %v2869_v1 = vadd.s32 24, %v5847_v32  ;;  %v2867_v2 = vadd.s32 8, %v5847_v32  ;;  %v2873_v3 = vadd.s32 56, %v5847_v32  ;;  %v2871_v9 = vadd.s32 40, %v5847_v32 }
 0x132   : > { %v2877_v41 = vadd.s32 88, %v5847_v32  ;;  %v2875_v42 = vadd.s32 72, %v5847_v32 }
 0x133   : > { %v2922_v8 = vand.u32 15, %v2869_v1  ;;  %v2908_v13 = vand.u32 15, %v2867_v2  ;;  %v2950_v25 = vand.u32 15, %v2873_v3  ;;  %v2936_v26 = vand.u32 15, %v2871_v9 }
 0x134   : > { %4668 = vmatmul.mubr.msk.bf16.gmra.mrb[24].mxu1 %vm366_vm3, %v5478_v20  ;;  %4804 = vmatmul.mubr.msk.bf16.gmra.mrb[24].mxu0 %vm366_vm3, %v5577_v33  ;;  %v2978_v30 = vand.u32 15, %v2877_v41  ;;  %v2964_v31 = vand.u32 15, %v2875_v42  ;;  %v5922_v41 = vadd.s32 136, %v5847_v32 }
 0x135   : > { %4671 = vmatprep.mubr.msk.bf16.mxu1 %vm366_vm3, %v2292_v39  ;;  %4807 = vmatprep.mubr.msk.bf16.mxu0 %vm366_vm3, %v2584_v5  ;;  %vm3272_vm5 = vcmp.lt.s32.totalorder %v2922_v8, 14  ;;  %vm3270_vm6 = vcmp.lt.s32.totalorder %v2908_v13, 14  ;;  %vm5874_vm7 = vcmp.lt.s32.totalorder %v2950_v25, 14  ;;  %vm5878_vm8 = vcmp.lt.s32.totalorder %v2936_v26, 14 }
 0x136   : > { %v2881_v5 = vadd.s32 120, %v5847_v32  ;;  %vm5901_vm9 = vcmp.lt.s32.totalorder %v2978_v30, 14  ;;  %vm5906_vm10 = vcmp.lt.s32.totalorder %v2964_v31, 14 }
 0x13c   : > { %4672 = vmatmul.mubr.msk.bf16.gmra.mrb[28].mxu1 %vm366_vm3, %v1421_v7  ;;  %4808 = vmatmul.mubr.msk.bf16.gmra.mrb[28].mxu0 %vm366_vm3, %v2585_v18  ;;  %vm2863_vm3 = vcmask 516096  }
 0x1b7   : > { %v4611_v19 = vpop.f32.mrb[0].mxu1 }
 0x1b8   : > { %v1218_v21 = vpop.f32.mrb[1].mxu1 }
 0x1b9   : > { %v4612_v34 = vpop.f32.mrb[2].mxu1 }
 0x1ba   : > { %v1221_v36 = vpop.f32.mrb[3].mxu1 }
 0x1bf   : > { %v4615_v20 = vpop.f32.mrb[4].mxu1 }
 0x1c0   : > { %v1234_v52 = vpop.f32.mrb[5].mxu1 }
 0x1c1   : > { %v5835_v54 = vpop.f32.mrb[6].mxu1 }
 0x1c2   : > { %v5837_v37 = vpop.f32.mrb[7].mxu1 }
 0x1c7   : > { %v5839_v10 = vpop.f32.mrb[8].mxu1 }
 0x1c8   : > { %v5841_v11 = vpop.f32.mrb[9].mxu1 }
 0x1c9   : > { %v5843_v12 = vpop.f32.mrb[10].mxu1 }
 0x1ca   : > { %v5845_v28 = vpop.f32.mrb[11].mxu1 }
 0x1cf   : > { %v5849_v33 = vpop.f32.mrb[12].mxu1 }
 0x1d0   : > { %v5851_v46 = vpop.f32.mrb[13].mxu1 }
 0x1d1   : > { %v5853_v48 = vpop.f32.mrb[14].mxu1 }
 0x1d2   : > { %v5855_v0 = vpop.f32.mrb[15].mxu1 }
 0x1d7   : > { %v4781_v15 = vpop.f32.mrb[0].mxu0 }
 0x1d8   : > { %v4855_v16 = vadd.f32 %v4781_v15, %v4611_v19  ;;  %v2673_v59 = vpop.f32.mrb[1].mxu0  ;;  %v2879_v19 = vadd.s32 104, %v5847_v32  ;;  %v3006_v15 = vand.u32 15, %v2881_v5 }
 0x1d9   : > { %v4856_v17 = vadd.f32 %v2673_v59, %v1218_v21  ;;  %v4782_v24 = vpop.f32.mrb[2].mxu0 }
 0x1da   : > { %2835 = vst.msk [vmem:[%s5862_s13 + $0x10] sm:$0xff] %vm2832_vm4, %v4855_v16  ;;  %v4857_v27 = vadd.f32 %v4782_v24, %v4612_v34  ;;  %v2676_v35 = vpop.f32.mrb[3].mxu0  ;;  %v3528_v50 = vmul.f32 %v4855_v16, %v4855_v16  ;;  %v3459_v22 = vsel %vm2832_vm4, %v4855_v16, 0.0  ;;  %v2992_v25 = vand.u32 15, %v2879_v19 }
 0x1db   : > { %2833 = vst.msk [vmem:[%s5862_s13] sm:$0xff] %vm2832_vm4, %v4856_v17  ;;  %v4858_v40 = vadd.f32 %v2676_v35, %v1221_v36  ;;  %v3526_v43 = vmul.f32 %v4856_v17, %v4856_v17  ;;  %v3456_v61 = vsel %vm2832_vm4, %v4856_v17, 0.0  ;;  %vm5936_vm11 = vcmp.lt.s32.totalorder %v3006_v15, 14 }
 0x1dc   : > { %2836 = vst.msk [vmem:[%s5862_s13 + $0x18] sm:$0xff] %vm2832_vm4, %v4857_v27  ;;  %v3427_v45 = vsel %vm3272_vm5, %v4857_v27, 0.0  ;;  %v3560_v4 = vsel %vm2832_vm4, %v3528_v50, 0.0  ;;  %vm5948_vm12 = vcmp.lt.s32.totalorder %v2992_v25, 14 }
 0x1dd   : > { %2834 = vst.msk [vmem:[%s5862_s13 + $0x8] sm:$0xff] %vm2832_vm4, %v4858_v40  ;;  %v3425_v60 = vsel %vm3270_vm6, %v4858_v40, 0.0  ;;  %v3557_v38 = vsel %vm2832_vm4, %v3526_v43, 0.0  ;;  %v3529_v39 = vmul.f32 %v3427_v45, %v3427_v45  ;;  %v3461_v6 = vsel %vm2832_vm4, %v3427_v45, 0.0 }
 0x1de   : > { %v3457_v62 = vsel %vm2832_vm4, %v3425_v60, 0.0  ;;  %v3527_v63 = vmul.f32 %v3425_v60, %v3425_v60  ;;  %v5919_v40 = vadd.s32 152, %v5847_v32 }
 0x1df   : > { %v3458_v23 = vadd.f32 %v3457_v62, %v3456_v61  ;;  %v4785_v14 = vpop.f32.mrb[4].mxu0 }
 0x1e0   : > { %v3558_v44 = vsel %vm2832_vm4, %v3527_v63, 0.0  ;;  %v4859_v51 = vadd.f32 %v4785_v14, %v4615_v20  ;;  %v2689_v53 = vpop.f32.mrb[5].mxu0  ;;  %v3034_v5 = vand.u32 15, %v5919_v40 }
 0x1e1   : > { %v3460_v56 = vadd.f32 %v3459_v22, %v3458_v23  ;;  %v3559_v58 = vadd.f32 %v3558_v44, %v3557_v38  ;;  %v4860_v55 = vadd.f32 %v2689_v53, %v1234_v52  ;;  %v4786_v57 = vpop.f32.mrb[6].mxu0  ;;  %v3562_v52 = vsel %vm2832_vm4, %v3529_v39, 0.0 }
 0x1e2   : > { %2839 = vst.msk [vmem:[%s5862_s13 + $0x30] sm:$0xff] %vm2832_vm4, %v4859_v51  ;;  %v4861_v7 = vadd.f32 %v4786_v57, %v5835_v54  ;;  %v2692_v18 = vpop.f32.mrb[7].mxu0  ;;  %v3532_v8 = vmul.f32 %v4859_v51, %v4859_v51  ;;  %v3467_v42 = vsel %vm2832_vm4, %v4859_v51, 0.0  ;;  %vm5982_vm13 = vcmp.lt.s32.totalorder %v3034_v5, 14 }
 0x1e3   : > { %v3561_v21 = vadd.f32 %v3560_v4, %v3559_v58  ;;  %2837 = vst.msk [vmem:[%s5862_s13 + $0x20] sm:$0xff] %vm2832_vm4, %v4860_v55  ;;  %v3462_v34 = vadd.f32 %v3461_v6, %v3460_v56  ;;  %v3463_v36 = vsel %vm2832_vm4, %v4860_v55, 0.0  ;;  %v3530_v20 = vmul.f32 %v4860_v55, %v4860_v55 }
 0x1e4   : > { %2840 = vst.msk [vmem:[%s5862_s13 + $0x38] sm:$0xff] %vm2832_vm4, %v4861_v7  ;;  %v4862_v29 = vadd.f32 %v2692_v18, %v5837_v37  ;;  %v3431_v13 = vsel %vm5874_vm7, %v4861_v7, 0.0  ;;  %v3568_v49 = vsel %vm2832_vm4, %v3532_v8, 0.0  ;;  %v3020_v4 = vand.u32 15, %v5922_v41 }
 0x1e5   : > { %v3464_v54 = vadd.f32 %v3463_v36, %v3462_v34  ;;  %v3563_v2 = vadd.f32 %v3562_v52, %v3561_v21  ;;  %v3564_v3 = vsel %vm2832_vm4, %v3530_v20, 0.0  ;;  %v3533_v43 = vmul.f32 %v3431_v13, %v3431_v13 }
 0x1e6   : > { %2838 = vst.msk [vmem:[%s5862_s13 + $0x28] sm:$0xff] %vm2832_vm4, %v4862_v29  ;;  %v3429_v37 = vsel %vm5878_vm8, %v4862_v29, 0.0  ;;  %v5959_v21 = vadd.s32 184, %v5847_v32  ;;  %vm5989_vm14 = vcmp.lt.s32.totalorder %v3020_v4, 14 }
 0x1e7   : > { %v3565_v16 = vadd.f32 %v3564_v3, %v3563_v2  ;;  %v3465_v59 = vsel %vm2832_vm4, %v3429_v37, 0.0  ;;  %v3531_v17 = vmul.f32 %v3429_v37, %v3429_v37  ;;  %v4789_v24 = vpop.f32.mrb[8].mxu0  ;;  %v3570_v38 = vsel %vm2832_vm4, %v3533_v43, 0.0 }
 0x1e8   : > { %v3466_v26 = vadd.f32 %v3465_v59, %v3464_v54  ;;  %v4863_v27 = vadd.f32 %v4789_v24, %v5839_v10  ;;  %v2705_v35 = vpop.f32.mrb[9].mxu0  ;;  %v3469_v10 = vsel %vm2832_vm4, %v3431_v13, 0.0 }
 0x1e9   : > { %v3566_v45 = vsel %vm2832_vm4, %v3531_v17, 0.0  ;;  %v4864_v60 = vadd.f32 %v2705_v35, %v5841_v11  ;;  %v4790_v47 = vpop.f32.mrb[10].mxu0 }
 0x1ea   : > { %v3468_v50 = vadd.f32 %v3467_v42, %v3466_v26  ;;  %v3567_v61 = vadd.f32 %v3566_v45, %v3565_v16  ;;  %2843 = vst.msk [vmem:[%s5862_s13 + $0x50] sm:$0xff] %vm2832_vm4, %v4863_v27  ;;  %v2708_v62 = vpop.f32.mrb[11].mxu0  ;;  %v4865_v23 = vadd.f32 %v4790_v47, %v5843_v12  ;;  %v3475_v34 = vsel %vm2832_vm4, %v4863_v27, 0.0 }
 0x1eb   : > { %2841 = vst.msk [vmem:[%s5862_s13 + $0x40] sm:$0xff] %vm2832_vm4, %v4864_v60  ;;  %v3471_v63 = vsel %vm2832_vm4, %v4864_v60, 0.0  ;;  %v3534_v22 = vmul.f32 %v4864_v60, %v4864_v60  ;;  %v4866_v11 = vadd.f32 %v2708_v62, %v5845_v28  ;;  %v3536_v28 = vmul.f32 %v4863_v27, %v4863_v27 }
 0x1ec   : > { %v3569_v14 = vadd.f32 %v3568_v49, %v3567_v61  ;;  %v3470_v30 = vadd.f32 %v3469_v10, %v3468_v50  ;;  %2844 = vst.msk [vmem:[%s5862_s13 + $0x58] sm:$0xff] %vm2832_vm4, %v4865_v23  ;;  %v3435_v56 = vsel %vm5901_vm9, %v4865_v23, 0.0  ;;  %v2887_v16 = vadd.s32 168, %v5847_v32 }
 0x1ed   : > { %v3572_v39 = vsel %vm2832_vm4, %v3534_v22, 0.0  ;;  %2842 = vst.msk [vmem:[%s5862_s13 + $0x48] sm:$0xff] %vm2832_vm4, %v4866_v11  ;;  %v3433_v44 = vsel %vm5906_vm10, %v4866_v11, 0.0  ;;  %v3537_v36 = vmul.f32 %v3435_v56, %v3435_v56  ;;  %v3576_v1 = vsel %vm2832_vm4, %v3536_v28, 0.0 }
 0x1ee   : > { %v3472_v51 = vadd.f32 %v3471_v63, %v3470_v30  ;;  %v3571_v53 = vadd.f32 %v3570_v38, %v3569_v14  ;;  %v3473_v58 = vsel %vm2832_vm4, %v3433_v44, 0.0  ;;  %v3535_v55 = vmul.f32 %v3433_v44, %v3433_v44 }
 0x1ef   : > { %v4793_v57 = vpop.f32.mrb[12].mxu0  ;;  %v3477_v54 = vsel %vm2832_vm4, %v3435_v56, 0.0  ;;  %v3578_v59 = vsel %vm2832_vm4, %v3537_v36, 0.0  ;;  %v3062_v45 = vand.u32 15, %v5959_v21  ;;  %v3048_v61 = vand.u32 15, %v2887_v16 }
 0x1f0   : > { %v3573_v6 = vadd.f32 %v3572_v39, %v3571_v53  ;;  %v3474_v7 = vadd.f32 %v3473_v58, %v3472_v51  ;;  %v4867_v18 = vadd.f32 %v4793_v57, %v5849_v33  ;;  %v2721_v19 = vpop.f32.mrb[13].mxu0  ;;  %v3574_v20 = vsel %vm2832_vm4, %v3535_v55, 0.0 }
 0x1f1   : > { %v4868_v52 = vadd.f32 %v2721_v19, %v5851_v46  ;;  %v4794_v29 = vpop.f32.mrb[14].mxu0  ;;  %v2893_v57 = vadd.s32 216, %v5847_v32  ;;  %vm6012_vm15 = vcmp.lt.s32.totalorder %v3062_v45, 14  ;;  %vm6019_vm0 = vcmp.lt.s32.totalorder %v3048_v61, 14 }
 0x1f2   : > { %v3476_v2 = vadd.f32 %v3475_v34, %v3474_v7  ;;  %v3575_v33 = vadd.f32 %v3574_v20, %v3573_v6  ;;  %2847 = vst.msk [vmem:[%s5862_s13 + $0x70] sm:$0xff] %vm2832_vm4, %v4867_v18  ;;  %v2724_v3 = vpop.f32.mrb[15].mxu0  ;;  %v4869_v13 = vadd.f32 %v4794_v29, %v5853_v48  ;;  %v3540_v48 = vmul.f32 %v4867_v18, %v4867_v18 }
 0x1f3   : > { %2845 = vst.msk [vmem:[%s5862_s13 + $0x60] sm:$0xff] %vm2832_vm4, %v4868_v52  ;;  %v3479_v9 = vsel %vm2832_vm4, %v4868_v52, 0.0  ;;  %v3538_v8 = vmul.f32 %v4868_v52, %v4868_v52  ;;  %v4870_v46 = vadd.f32 %v2724_v3, %v5855_v0  ;;  %v3483_v62 = vsel %vm2832_vm4, %v4867_v18, 0.0 }
 0x1f4   : > { %v3577_v37 = vadd.f32 %v3576_v1, %v3575_v33  ;;  %v3478_v15 = vadd.f32 %v3477_v54, %v3476_v2  ;;  %2848 = vst.msk [vmem:[%s5862_s13 + $0x78] sm:$0xff] %vm2832_vm4, %v4869_v13  ;;  %v3439_v27 = vsel %vm5936_vm11, %v4869_v13, 0.0  ;;  %v3584_v30 = vsel %vm2832_vm4, %v3540_v48, 0.0 }
 0x1f5   : > { %v3580_v17 = vsel %vm2832_vm4, %v3538_v8, 0.0  ;;  %2846 = vst.msk [vmem:[%s5862_s13 + $0x68] sm:$0xff] %vm2832_vm4, %v4870_v46  ;;  %v3437_v24 = vsel %vm5948_vm12, %v4870_v46, 0.0  ;;  %v3541_v63 = vmul.f32 %v3439_v27, %v3439_v27  ;;  %v3485_v31 = vsel %vm2832_vm4, %v3439_v27, 0.0 }
 0x1f6   : > { %v3480_v0 = vadd.f32 %v3479_v9, %v3478_v15  ;;  %v3579_v26 = vadd.f32 %v3578_v59, %v3577_v37  ;;  %v3481_v35 = vsel %vm2832_vm4, %v3437_v24, 0.0  ;;  %v3539_v40 = vmul.f32 %v3437_v24, %v3437_v24 }
 0x1f7   : > { %v4661_v41 = vpop.f32.mrb[16].mxu1  ;;  %v4797_v42 = vpop.f32.mrb[16].mxu0  ;;  %v3586_v5 = vsel %vm2832_vm4, %v3541_v63, 0.0  ;;  %v2891_v54 = vadd.s32 200, %v5847_v32  ;;  %v3090_v13 = vand.u32 15, %v2893_v57 }
 0x1f8   : > { %v3581_v60 = vadd.f32 %v3580_v17, %v3579_v26  ;;  %v3482_v47 = vadd.f32 %v3481_v35, %v3480_v0  ;;  %v4871_v49 = vadd.f32 %v4797_v42, %v4661_v41  ;;  %v1573_v10 = vpop.f32.mrb[17].mxu1  ;;  %v2737_v50 = vpop.f32.mrb[17].mxu0  ;;  %v3582_v22 = vsel %vm2832_vm4, %v3539_v40, 0.0 }
 0x1f9   : > { %v4872_v23 = vadd.f32 %v2737_v50, %v1573_v10  ;;  %v4662_v11 = vpop.f32.mrb[18].mxu1  ;;  %v4798_v14 = vpop.f32.mrb[18].mxu0  ;;  %v3076_v45 = vand.u32 15, %v2891_v54  ;;  %vm6044_vm1 = vcmp.lt.s32.totalorder %v3090_v13, 14 }
 0x1fa   : > { %v3484_v38 = vadd.f32 %v3483_v62, %v3482_v47  ;;  %v3583_v39 = vadd.f32 %v3582_v22, %v3581_v60  ;;  %2851 = vst.msk [vmem:[%s5862_s13 + $0x90] sm:$0xff] %vm2832_vm4, %v4871_v49  ;;  %v1576_v44 = vpop.f32.mrb[19].mxu1  ;;  %v2740_v12 = vpop.f32.mrb[19].mxu0  ;;  %v4873_v53 = vadd.f32 %v4798_v14, %v4662_v11  ;;  %v3544_v18 = vmul.f32 %v4871_v49, %v4871_v49 }
 0x1fb   : > { %2849 = vst.msk [vmem:[%s5862_s13 + $0x80] sm:$0xff] %vm2832_vm4, %v4872_v23  ;;  %v3487_v28 = vsel %vm2832_vm4, %v4872_v23, 0.0  ;;  %v3542_v51 = vmul.f32 %v4872_v23, %v4872_v23  ;;  %v4874_v56 = vadd.f32 %v2740_v12, %v1576_v44  ;;  %v3491_v46 = vsel %vm2832_vm4, %v4871_v49, 0.0  ;;  %v3525_v12 = vld [vmem:[#allocation4] sm:$0x1] }
 0x1fc   : > { %v3585_v58 = vadd.f32 %v3584_v30, %v3583_v39  ;;  %v3486_v55 = vadd.f32 %v3485_v31, %v3484_v38  ;;  %2852 = vst.msk [vmem:[%s5862_s13 + $0x98] sm:$0xff] %vm2832_vm4, %v4873_v53  ;;  %v3443_v34 = vsel %vm5982_vm13, %v4873_v53, 0.0  ;;  %v3592_v24 = vsel %vm2832_vm4, %v3544_v18, 0.0 }
 0x1fd   : > { %v3588_v4 = vsel %vm2832_vm4, %v3542_v51, 0.0  ;;  %2850 = vst.msk [vmem:[%s5862_s13 + $0x88] sm:$0xff] %vm2832_vm4, %v4874_v56  ;;  %v3441_v6 = vsel %vm5989_vm14, %v4874_v56, 0.0  ;;  %v3545_v37 = vmul.f32 %v3443_v34, %v3443_v34  ;;  %v3493_v32 = vsel %vm2832_vm4, %v3443_v34, 0.0 }
 0x1fe   : > { %v3488_v19 = vadd.f32 %v3487_v28, %v3486_v55  ;;  %v3587_v21 = vadd.f32 %v3586_v5, %v3585_v58  ;;  %v3489_v36 = vsel %vm2832_vm4, %v3441_v6, 0.0  ;;  %v3543_v20 = vmul.f32 %v3441_v6, %v3441_v6 }
 0x1ff   : > { %v4665_v52 = vpop.f32.mrb[20].mxu1  ;;  %v4801_v29 = vpop.f32.mrb[20].mxu0  ;;  %v3594_v60 = vsel %vm2832_vm4, %v3545_v37, 0.0  ;;  %vm6048_vm2 = vcmp.lt.s32.totalorder %v3076_v45, 14 }
 0x200   : > { %v3589_v2 = vadd.f32 %v3588_v4, %v3587_v21  ;;  %v3490_v33 = vadd.f32 %v3489_v36, %v3488_v19  ;;  %v4875_v3 = vadd.f32 %v4801_v29, %v4665_v52  ;;  %v1589_v9 = vpop.f32.mrb[21].mxu1  ;;  %v2753_v8 = vpop.f32.mrb[21].mxu0  ;;  %v3590_v15 = vsel %vm2832_vm4, %v3543_v20, 0.0 }
 0x201   : > { %v4876_v16 = vadd.f32 %v2753_v8, %v1589_v9  ;;  %v4666_v59 = vpop.f32.mrb[22].mxu1  ;;  %v4802_v17 = vpop.f32.mrb[22].mxu0 }
 0x202   : > { %v3492_v25 = vadd.f32 %v3491_v46, %v3490_v33  ;;  %v3591_v48 = vadd.f32 %v3590_v15, %v3589_v2  ;;  %2855 = vst.msk [vmem:[%s5862_s13 + $0xb0] sm:$0xff] %vm2832_vm4, %v4875_v3  ;;  %v1592_v0 = vpop.f32.mrb[23].mxu1  ;;  %v2756_v26 = vpop.f32.mrb[23].mxu0  ;;  %v4877_v40 = vadd.f32 %v4802_v17, %v4666_v59  ;;  %v3548_v10 = vmul.f32 %v4875_v3, %v4875_v3 }
 0x203   : > { %2853 = vst.msk [vmem:[%s5862_s13 + $0xa0] sm:$0xff] %vm2832_vm4, %v4876_v16  ;;  %v3495_v27 = vsel %vm2832_vm4, %v4876_v16, 0.0  ;;  %v3546_v35 = vmul.f32 %v4876_v16, %v4876_v16  ;;  %v4878_v41 = vadd.f32 %v2756_v26, %v1592_v0  ;;  %v3499_v28 = vsel %vm2832_vm4, %v4875_v3, 0.0 }
 0x204   : > { %v3593_v42 = vadd.f32 %v3592_v24, %v3591_v48  ;;  %v3494_v43 = vadd.f32 %v3493_v32, %v3492_v25  ;;  %2856 = vst.msk [vmem:[%s5862_s13 + $0xb8] sm:$0xff] %vm2832_vm4, %v4877_v40  ;;  %v3447_v62 = vsel %vm6012_vm15, %v4877_v40, 0.0  ;;  %v3600_v57 = vsel %vm2832_vm4, %v3548_v10, 0.0 }
 0x205   : > { %v3596_v47 = vsel %vm2832_vm4, %v3546_v35, 0.0  ;;  %2854 = vst.msk [vmem:[%s5862_s13 + $0xa8] sm:$0xff] %vm2832_vm4, %v4878_v41  ;;  %v3445_v49 = vsel %vm6019_vm0, %v4878_v41, 0.0  ;;  %v3549_v51 = vmul.f32 %v3447_v62, %v3447_v62  ;;  %v3501_v5 = vsel %vm2832_vm4, %v3447_v62, 0.0 }
 0x206   : > { %v3496_v50 = vadd.f32 %v3495_v27, %v3494_v43  ;;  %v3595_v61 = vadd.f32 %v3594_v60, %v3593_v42  ;;  %v3497_v63 = vsel %vm2832_vm4, %v3445_v49, 0.0  ;;  %v3547_v22 = vmul.f32 %v3445_v49, %v3445_v49 }
 0x207   : > { %v4669_v23 = vpop.f32.mrb[24].mxu1  ;;  %v4805_v11 = vpop.f32.mrb[24].mxu0  ;;  %v3602_v29 = vsel %vm2832_vm4, %v3549_v51, 0.0 }
 0x208   : > { %v3597_v30 = vadd.f32 %v3596_v47, %v3595_v61  ;;  %v3498_v31 = vadd.f32 %v3497_v63, %v3496_v50  ;;  %v4879_v38 = vadd.f32 %v4805_v11, %v4669_v23  ;;  %v1605_v39 = vpop.f32.mrb[25].mxu1  ;;  %v2769_v44 = vpop.f32.mrb[25].mxu0  ;;  %v3598_v53 = vsel %vm2832_vm4, %v3547_v22, 0.0 }
 0x209   : > { %v4880_v56 = vadd.f32 %v2769_v44, %v1605_v39  ;;  %v4670_v58 = vpop.f32.mrb[26].mxu1  ;;  %v4806_v55 = vpop.f32.mrb[26].mxu0 }
 0x20a   : > { %v3500_v4 = vadd.f32 %v3499_v28, %v3498_v31  ;;  %v3599_v6 = vadd.f32 %v3598_v53, %v3597_v30  ;;  %2859 = vst.msk [vmem:[%s5862_s13 + $0xd0] sm:$0xff] %vm2832_vm4, %v4879_v38  ;;  %v1608_v7 = vpop.f32.mrb[27].mxu1  ;;  %v2772_v18 = vpop.f32.mrb[27].mxu0  ;;  %v4881_v34 = vadd.f32 %v4806_v55, %v4670_v58  ;;  %v3552_v9 = vmul.f32 %v4879_v38, %v4879_v38 }
 0x20b   : > { %2857 = vst.msk [vmem:[%s5862_s13 + $0xc0] sm:$0xff] %vm2832_vm4, %v4880_v56  ;;  %v3503_v19 = vsel %vm2832_vm4, %v4880_v56, 0.0  ;;  %v3550_v21 = vmul.f32 %v4880_v56, %v4880_v56  ;;  %v4882_v36 = vadd.f32 %v2772_v18, %v1608_v7  ;;  %v3507_v32 = vsel %vm2832_vm4, %v4879_v38, 0.0  ;;  %v3455_v38 = vld [vmem:[#allocation3] sm:$0x1] }
 0x20c   : > { %v3601_v20 = vadd.f32 %v3600_v57, %v3599_v6  ;;  %v3502_v52 = vadd.f32 %v3501_v5, %v3500_v4  ;;  %2860 = vst.msk [vmem:[%s5862_s13 + $0xd8] sm:$0xff] %vm2832_vm4, %v4881_v34  ;;  %v3451_v3 = vsel %vm6044_vm1, %v4881_v34, 0.0  ;;  %v3608_v43 = vsel %vm2832_vm4, %v3552_v9, 0.0 }
 0x20d   : > { %v3604_v1 = vsel %vm2832_vm4, %v3550_v21, 0.0  ;;  %2858 = vst.msk [vmem:[%s5862_s13 + $0xc8] sm:$0xff] %vm2832_vm4, %v4882_v36  ;;  %v3449_v54 = vsel %vm6048_vm2, %v4882_v36, 0.0  ;;  %v3553_v25 = vmul.f32 %v3451_v3, %v3451_v3  ;;  %v3509_v45 = vsel %vm2832_vm4, %v3451_v3, 0.0 }
 0x20e   : > { %v3504_v2 = vadd.f32 %v3503_v19, %v3502_v52  ;;  %v3603_v33 = vadd.f32 %v3602_v29, %v3601_v20  ;;  %v3505_v8 = vsel %vm2832_vm4, %v3449_v54, 0.0  ;;  %v3551_v13 = vmul.f32 %v3449_v54, %v3449_v54 }
 0x20f   : > { %v4673_v46 = vpop.f32.mrb[28].mxu1  ;;  %v4809_v37 = vpop.f32.mrb[28].mxu0  ;;  %v3610_v10 = vsel %vm2832_vm4, %v3553_v25, 0.0 }
 0x210   : > { %v3605_v15 = vadd.f32 %v3604_v1, %v3603_v33  ;;  %v3506_v16 = vadd.f32 %v3505_v8, %v3504_v2  ;;  %v4883_v59 = vadd.f32 %v4809_v37, %v4673_v46  ;;  %v1621_v17 = vpop.f32.mrb[29].mxu1  ;;  %v2785_v24 = vpop.f32.mrb[29].mxu0  ;;  %v3606_v48 = vsel %vm2832_vm4, %v3551_v13, 0.0 }
 0x211   : > { %v4884_v0 = vadd.f32 %v2785_v24, %v1621_v17  ;;  %v4674_v26 = vpop.f32.mrb[30].mxu1  ;;  %v4810_v27 = vpop.f32.mrb[30].mxu0 }
 0x212   : > { %v3508_v35 = vadd.f32 %v3507_v32, %v3506_v16  ;;  %v3607_v40 = vadd.f32 %v3606_v48, %v3605_v15  ;;  %2864 = vst.msk [vmem:[%s5862_s13 + $0xf0] sm:$0x1] %vm2863_vm3, %v4883_v59  ;;  %v1624_v41 = vpop.f32.mrb[31].mxu1  ;;  %v2788_v42 = vpop.f32.mrb[31].mxu0 }
 0x213   : > { %2861 = vst.msk [vmem:[%s5862_s13 + $0xe0] sm:$0xff] %vm2832_vm4, %v4884_v0  ;;  %v4885_v60 = vadd.f32 %v2788_v42, %v1624_v41 }
 0x214   : > { %v3510_v47 = vadd.f32 %v3509_v45, %v3508_v35  ;;  %v3609_v49 = vadd.f32 %v3608_v43, %v3607_v40 }
 0x215   : > { %2862 = vst.msk [vmem:[%s5862_s13 + $0xe8] sm:$0xff] %vm2832_vm4, %v4885_v60 }
 0x216   : > { %v3517_v50 = vrot.slane %v3510_v47, 4  ;;  %v3611_v61 = vadd.f32 %v3610_v10, %v3609_v49 }
 0x218   : > { %v3518_v62 = vadd.f32 %v3517_v50, %v3510_v47  ;;  %v3618_v63 = vrot.slane %v3611_v61, 4 }
 0x21a   : > { %v3519_v22 = vrot.slane %v3518_v62, 2  ;;  %v3619_v23 = vadd.f32 %v3618_v63, %v3611_v61 }
 0x21c   : > { %v3520_v11 = vadd.f32 %v3519_v22, %v3518_v62  ;;  %v3620_v14 = vrot.slane %v3619_v23, 2 }
 0x21e   : > { %v3521_v30 = vrot.slane %v3520_v11, 1  ;;  %v3621_v31 = vadd.f32 %v3620_v14, %v3619_v23 }
 0x220   : > { %v3522_v39 = vadd.f32 %v3521_v30, %v3520_v11  ;;  %v3622_v44 = vrot.slane %v3621_v31, 1 }
 0x222   : > { %v3523_v28 = vadd.f32 %v3522_v39, %v3455_v38  ;;  %v3623_v51 = vadd.f32 %v3622_v44, %v3621_v31 }
 0x224   : > { %3524 = vst.msk [vmem:[#allocation3] sm:$0x1] %vm2863_vm3, %v3523_v28  ;;  %v3624_v53 = vadd.f32 %v3623_v51, %v3525_v12 }
 0x226   : > { %3625 = vst.msk [vmem:[#allocation4] sm:$0x1] %vm2863_vm3, %v3624_v53 }
 0x227 PF: > { %p4342_p11 = scmp.ne.s32.totalorder %s5211_s19, 1 }
 0x228   : > { %v5227_v55 = vmov (!%p4342_p11), 0.0|0.0   ;;  %v3964_v4 = vld [vmem:[%s6337_s4 + $0x8] sm:$0xff] (!%p4342_p11)  ;;  %vm3977_vm4 = vcmask (!%p4342_p11), 785408   ;;  %v3678_v21 = vlaneseq (!%p4342_p11)  ;;  %s3644_s17 = smul.u32 (!%p4342_p11), 248, %s5207_s18  ;;  %v3639_v20 = vld [vmem:[%s6335_s2] sm:$0x1] (!%p4342_p11) }
 0x229   : > { %3629 = sbr.rel (%p4342_p11) target bundleno = 879 (0x36f), region = 52  ;;  %4811 = vmatprep.subr.bf16.mxu0 (!%p4342_p11), %v5227_v55  ;;  %5110 = vmatprep.subr.bf16.mxu1 (!%p4342_p11), %v5227_v55  ;;  %v3972_v34 = vld [vmem:[%s6337_s4 + $0x48] sm:$0xff] (!%p4342_p11)  ;;  %v3641_v54 = vld [vmem:[%s6336_s3] sm:$0x1] (!%p4342_p11)  ;;  %vm3811_vm5 = vcmask (!%p4342_p11), 1046528   ;;  %vm4099_vm6 = vcmask (!%p4342_p11), 523264  }
 0x22a   : > { %4343 = vmatprep.mubr.msk.f32.mxu0 (!%p4342_p11), %vm3977_vm4, %v3964_v4  ;;  %4347 = vmatprep.mubr.msk.f32.mxu1 (!%p4342_p11), %vm3977_vm4, %v3972_v34  ;;  %v3679_v36 = vshrl.u32 (!%p4342_p11), %v3678_v21, 7  ;;  %s6103_s29 = scalar_lea.vmem (!%p4342_p11), [#allocation2], %s3644_s17  ;;  %vm4106_vm7 = vcmask (!%p4342_p11), 516096  }
 0x22b   : > { %v3630_v56 = vld [vmem:[#allocation3] sm:$0x1] (!%p4342_p11)  ;;  %v3646_v2 = vld [vmem:[%s6103_s29] sm:$0xff] (!%p4342_p11)  ;;  %v3647_v33 = vld [vmem:[%s6103_s29 + $0x8] sm:$0xff] (!%p4342_p11) }
 0x22c   : > { %v3631_v57 = vmul.f32 (!%p4342_p11), 0.0025510204, %v3630_v56  ;;  %v3680_v52 = vsub.s32 (!%p4342_p11), 0, %v3679_v36  ;;  %v3648_v3 = vld [vmem:[%s6103_s29 + $0x10] sm:$0xff] (!%p4342_p11)  ;;  %v3649_v9 = vld [vmem:[%s6103_s29 + $0x18] sm:$0xff] (!%p4342_p11)  ;;  %v3650_v8 = vld [vmem:[%s6103_s29 + $0x20] sm:$0xff] (!%p4342_p11) }
 0x22d   : > { %v3632_v58 = vld [vmem:[#allocation4] sm:$0x1] (!%p4342_p11)  ;;  %v3651_v37 = vld [vmem:[%s6103_s29 + $0x28] sm:$0xff] (!%p4342_p11)  ;;  %v3653_v16 = vld [vmem:[%s6103_s29 + $0x38] sm:$0xff] (!%p4342_p11) }
 0x22e   : > { %v3633_v5 = vmul.f32 (!%p4342_p11), 0.0025510204, %v3632_v58  ;;  %v3634_v6 = vmul.f32 (!%p4342_p11), %v3631_v57, %v3631_v57  ;;  %v3652_v15 = vld [vmem:[%s6103_s29 + $0x30] sm:$0xff] (!%p4342_p11)  ;;  %v3654_v59 = vld [vmem:[%s6103_s29 + $0x40] sm:$0xff] (!%p4342_p11)  ;;  %v3655_v17 = vld [vmem:[%s6103_s29 + $0x48] sm:$0xff] (!%p4342_p11) }
 0x22f   : > { %v3656_v24 = vld [vmem:[%s6103_s29 + $0x50] sm:$0xff] (!%p4342_p11)  ;;  %v3657_v26 = vld [vmem:[%s6103_s29 + $0x58] sm:$0xff] (!%p4342_p11)  ;;  %v3658_v27 = vld [vmem:[%s6103_s29 + $0x60] sm:$0xff] (!%p4342_p11) }
 0x230   : > { %v3635_v7 = vsub.f32 %v3633_v5, %v3634_v6  ;;  %v3659_v35 = vld [vmem:[%s6103_s29 + $0x68] sm:$0xff] }
 0x232   : > { %v3636_v18 = vmax.f32 %v3635_v7, 0.0 }
 0x234   : > { %v3637_v19 = vadd.f32 1e-05, %v3636_v18 }
 0x236   : > { %5183 = vrsqrt.f32 %v3637_v19 }
 0x240   : > { %v5184_v29 = vpop.eup %5183 }
 0x241   : > { %v3640_v1 = vmul.f32 %v5184_v29, %v3639_v20 }
 0x243   : > { %v3642_v13 = vmul.f32 %v3640_v1, %v3631_v57  ;;  %v6110_v46 = vrot.slane %v3640_v1, %v3680_v52 }
 0x245   : > { %v3643_v32 = vsub.f32 %v3641_v54, %v3642_v13  ;;  %v3683_v25 = vmul.f32 %v6110_v46, %v3646_v2  ;;  %v3684_v48 = vmul.f32 %v6110_v46, %v3647_v33  ;;  %v3685_v0 = vmul.f32 %v6110_v46, %v3648_v3 }
 0x246   : > { %v3686_v40 = vmul.f32 %v6110_v46, %v3649_v9  ;;  %v3687_v41 = vmul.f32 %v6110_v46, %v3650_v8  ;;  %v3688_v42 = vmul.f32 %v6110_v46, %v3651_v37  ;;  %v3689_v43 = vmul.f32 %v6110_v46, %v3652_v15 }
 0x247   : > { %v6128_v45 = vrot.slane %v3643_v32, %v3680_v52  ;;  %v3690_v60 = vmul.f32 %v6110_v46, %v3653_v16  ;;  %v3691_v47 = vmul.f32 %v6110_v46, %v3654_v59  ;;  %v3692_v49 = vmul.f32 %v6110_v46, %v3655_v17 }
 0x248   : > { %v3693_v10 = vmul.f32 %v6110_v46, %v3656_v24  ;;  %v3694_v50 = vmul.f32 %v6110_v46, %v3657_v26  ;;  %v3695_v61 = vmul.f32 %v6110_v46, %v3658_v27  ;;  %v6137_v62 = vmul.f32 %v6110_v46, %v3659_v35  ;;  %v3660_v27 = vld [vmem:[%s6103_s29 + $0x70] sm:$0xff] }
 0x249   : > { %v3720_v63 = vadd.f32 %v6128_v45, %v3683_v25  ;;  %v3721_v22 = vadd.f32 %v6128_v45, %v3684_v48  ;;  %v3722_v23 = vadd.f32 %v6128_v45, %v3685_v0  ;;  %v3723_v11 = vadd.f32 %v6128_v45, %v3686_v40 }
 0x24a   : > { %v3724_v14 = vadd.f32 %v6128_v45, %v3687_v41  ;;  %v3725_v30 = vadd.f32 %v6128_v45, %v3688_v42  ;;  %v3726_v31 = vadd.f32 %v6128_v45, %v3689_v43  ;;  %v3727_v38 = vadd.f32 %v6128_v45, %v3690_v60  ;;  %v3661_v43 = vld [vmem:[%s6103_s29 + $0x78] sm:$0xff] }
 0x24b   : > { %v3751_v39 = vmax.f32 %v3720_v63, 0.0  ;;  %v3752_v44 = vmax.f32 %v3721_v22, 0.0  ;;  %v3753_v12 = vmax.f32 %v3722_v23, 0.0  ;;  %v3754_v28 = vmax.f32 %v3723_v11, 0.0 }
 0x24c   : > { %v3755_v51 = vmax.f32 %v3724_v14, 0.0  ;;  %v3756_v53 = vmax.f32 %v3725_v30, 0.0  ;;  %v3757_v56 = vmax.f32 %v3726_v31, 0.0  ;;  %v3728_v58 = vadd.f32 %v6128_v45, %v3691_v47 }
 0x24d   : > { %v3812_v57 = vrot.slane %v3751_v39, 1  ;;  %v3813_v5 = vrot.slane %v3752_v44, 1  ;;  %v3815_v4 = vrot.slane %v3753_v12, 1  ;;  %v3817_v6 = vrot.slane %v3754_v28, 1 }
 0x24e   : > { %v3819_v7 = vrot.slane %v3755_v51, 1  ;;  %v3821_v18 = vrot.slane %v3756_v53, 1  ;;  %v3823_v19 = vrot.slane %v3757_v56, 1  ;;  %v3758_v21 = vmax.f32 %v3727_v38, 0.0  ;;  %v3662_v38 = vld [vmem:[%s6103_s29 + $0x80] sm:$0xff] }
 0x24f   : > { %v3814_v34 = vsel %vm3811_vm5, %v3812_v57, %v3813_v5  ;;  %v3816_v36 = vsel %vm3811_vm5, %v3813_v5, %v3815_v4  ;;  %v3818_v20 = vsel %vm3811_vm5, %v3815_v4, %v3817_v6  ;;  %v3759_v52 = vmax.f32 %v3728_v58, 0.0 }
 0x250   : > { %v3820_v29 = vsel %vm3811_vm5, %v3817_v6, %v3819_v7  ;;  %v3897_v1 = vmax.f32 %v3751_v39, %v3814_v34  ;;  %v3898_v54 = vmax.f32 %v3752_v44, %v3816_v36  ;;  %v3899_v2 = vmax.f32 %v3753_v12, %v3818_v20 }
 0x251   : > { %v3900_v33 = vmax.f32 %v3754_v28, %v3820_v29  ;;  %v3822_v3 = vsel %vm3811_vm5, %v3819_v7, %v3821_v18  ;;  %v3824_v9 = vsel %vm3811_vm5, %v3821_v18, %v3823_v19  ;;  %v3825_v8 = vrot.slane %v3758_v21, 1 }
 0x252   : > { %v3935_v13 = vmax.f32 %v3897_v1, %v3899_v2  ;;  %v3901_v37 = vmax.f32 %v3755_v51, %v3822_v3  ;;  %v3902_v15 = vmax.f32 %v3756_v53, %v3824_v9  ;;  %v3827_v16 = vrot.slane %v3759_v52, 1  ;;  %v3663_v1 = vld [vmem:[%s6103_s29 + $0x88] sm:$0xff] }
 0x253   : > { %v3936_v59 = vmax.f32 %v3898_v54, %v3900_v33  ;;  %v3826_v17 = vsel %vm3811_vm5, %v3823_v19, %v3825_v8  ;;  %v3729_v24 = vadd.f32 %v6128_v45, %v3692_v49  ;;  %v3730_v32 = vadd.f32 %v6128_v45, %v3693_v10  ;;  %v3664_v54 = vld [vmem:[%s6103_s29 + $0x90] sm:$0xff] }
 0x254   : > { %v3937_v25 = vmax.f32 %v3899_v2, %v3901_v37  ;;  %v3938_v48 = vmax.f32 %v3900_v33, %v3902_v15  ;;  %v3828_v0 = vsel %vm3811_vm5, %v3825_v8, %v3827_v16  ;;  %v3903_v26 = vmax.f32 %v3757_v56, %v3826_v17  ;;  %v3665_v2 = vld [vmem:[%s6103_s29 + $0x98] sm:$0xff] }
 0x255   : > { %v4812_v35 = vpack.c.bf16 %v3936_v59, %v3935_v13  ;;  %v3904_v40 = vmax.f32 %v3758_v21, %v3828_v0  ;;  %v3760_v41 = vmax.f32 %v3729_v24, 0.0  ;;  %v3761_v42 = vmax.f32 %v3730_v32, 0.0 }
 0x256   : > { %v4815_v60 = vpack.c.bf16 %v3938_v48, %v3937_v25  ;;  %v3939_v47 = vmax.f32 %v3901_v37, %v3903_v26  ;;  %v3731_v63 = vadd.f32 %v6128_v45, %v3694_v50  ;;  %v3732_v49 = vadd.f32 %v6128_v45, %v3695_v61 }
 0x257   : > { %4813 = vmatpush1.bf16.msra.mxu0 %v4812_v35  ;;  %5124 = vmatpush1.bf16.msra.mxu1 %v4812_v35  ;;  %v3940_v10 = vmax.f32 %v3902_v15, %v3904_v40  ;;  %v3829_v22 = vrot.slane %v3760_v41, 1  ;;  %v3831_v23 = vrot.slane %v3761_v42, 1  ;;  %v3697_v11 = vmul.f32 %v6110_v46, %v3660_v27 }
 0x258   : > { %4814 = vmatprep.subr.bf16.mxu0 %v5227_v55  ;;  %5111 = vmatprep.subr.bf16.mxu1 %v5227_v55  ;;  %v3762_v14 = vmax.f32 %v3731_v63, 0.0  ;;  %v3763_v30 = vmax.f32 %v3732_v49, 0.0  ;;  %v3733_v31 = vadd.f32 %v6128_v45, %v6137_v62  ;;  %v3698_v50 = vmul.f32 %v6110_v46, %v3661_v43 }
 0x259   : > { %v4818_v61 = vpack.c.bf16 %v3940_v10, %v3939_v47  ;;  %v3830_v39 = vsel %vm3811_vm5, %v3827_v16, %v3829_v22  ;;  %v3832_v44 = vsel %vm3811_vm5, %v3829_v22, %v3831_v23  ;;  %v3734_v12 = vadd.f32 %v6128_v45, %v3697_v11 }
 0x25a   : > { %v3905_v28 = vmax.f32 %v3759_v52, %v3830_v39  ;;  %v3906_v51 = vmax.f32 %v3760_v41, %v3832_v44  ;;  %v3833_v53 = vrot.slane %v3762_v14, 1  ;;  %v3835_v56 = vrot.slane %v3763_v30, 1  ;;  %v3667_v41 = vld [vmem:[%s6103_s29 + $0xa8] sm:$0xff] }
 0x25b   : > { %4816 = vmatpush1.bf16.msra.mxu0 %v4815_v60  ;;  %5125 = vmatpush1.bf16.msra.mxu1 %v4815_v60  ;;  %v3764_v58 = vmax.f32 %v3733_v31, 0.0  ;;  %v3765_v57 = vmax.f32 %v3734_v12, 0.0  ;;  %v3699_v62 = vmul.f32 %v6110_v46, %v3662_v38  ;;  %v3735_v5 = vadd.f32 %v6128_v45, %v3698_v50 }
 0x25c   : > { %4817 = vmatprep.subr.bf16.mxu0 %v5227_v55  ;;  %5112 = vmatprep.subr.bf16.mxu1 %v5227_v55  ;;  %v3941_v4 = vmax.f32 %v3903_v26, %v3905_v28  ;;  %v3942_v6 = vmax.f32 %v3904_v40, %v3906_v51  ;;  %v3834_v7 = vsel %vm3811_vm5, %v3831_v23, %v3833_v53  ;;  %v3666_v26 = vld [vmem:[%s6103_s29 + $0xa0] sm:$0xff]  ;;  %v3669_v23 = vld [vmem:[%s6103_s29 + $0xb8] sm:$0xff] }
 0x25d   : > { %v3836_v18 = vsel %vm3811_vm5, %v3833_v53, %v3835_v56  ;;  %v3907_v19 = vmax.f32 %v3761_v42, %v3834_v7  ;;  %v3837_v21 = vrot.slane %v3764_v58, 1  ;;  %v3839_v34 = vrot.slane %v3765_v57, 1  ;;  %v3668_v42 = vld [vmem:[%s6103_s29 + $0xb0] sm:$0xff] }
 0x25e   : > { %v4821_v36 = vpack.c.bf16 %v3942_v6, %v3941_v4  ;;  %v3908_v20 = vmax.f32 %v3762_v14, %v3836_v18  ;;  %v6179_v52 = vadd.f32 %v6128_v45, %v3699_v62  ;;  %v3766_v29 = vmax.f32 %v3735_v5, 0.0 }
 0x25f   : > { %4819 = vmatpush1.bf16.msra.mxu0 %v4818_v61  ;;  %5126 = vmatpush1.bf16.msra.mxu1 %v4818_v61  ;;  %v3943_v33 = vmax.f32 %v3905_v28, %v3907_v19  ;;  %v3838_v3 = vsel %vm3811_vm5, %v3835_v56, %v3837_v21  ;;  %v3840_v9 = vsel %vm3811_vm5, %v3837_v21, %v3839_v34 }
 0x260   : > { %4820 = vmatprep.subr.bf16.mxu0 %v5227_v55  ;;  %5113 = vmatprep.subr.bf16.mxu1 %v5227_v55  ;;  %v3944_v8 = vmax.f32 %v3906_v51, %v3908_v20  ;;  %v3909_v13 = vmax.f32 %v3763_v30, %v3838_v3  ;;  %v3910_v37 = vmax.f32 %v3764_v58, %v3840_v9  ;;  %v3767_v15 = vmax.f32 %v6179_v52, 0.0  ;;  %v3670_v51 = vld [vmem:[%s6103_s29 + $0xc0] sm:$0xff]  ;;  %v3671_v3 = vld [vmem:[%s6103_s29 + $0xc8] sm:$0xff] }
 0x261   : > { %v3841_v16 = vrot.slane %v3766_v29, 1  ;;  %v3700_v59 = vmul.f32 %v6110_v46, %v3663_v1  ;;  %v3701_v17 = vmul.f32 %v6110_v46, %v3664_v54  ;;  %v3702_v24 = vmul.f32 %v6110_v46, %v3665_v2 }
 0x262   : > { %v4824_v32 = vpack.c.bf16 %v3944_v8, %v3943_v33  ;;  %v3945_v25 = vmax.f32 %v3907_v19, %v3909_v13  ;;  %v3946_v48 = vmax.f32 %v3908_v20, %v3910_v37  ;;  %v3843_v0 = vrot.slane %v3767_v15, 1 }
 0x263   : > { %4822 = vmatpush1.bf16.msra.mxu0 %v4821_v36  ;;  %5127 = vmatpush1.bf16.msra.mxu1 %v4821_v36  ;;  %v3842_v27 = vsel %vm3811_vm5, %v3839_v34, %v3841_v16  ;;  %v3737_v35 = vadd.f32 %v6128_v45, %v3700_v59  ;;  %v3738_v40 = vadd.f32 %v6128_v45, %v3701_v17 }
 0x264   : > { %4823 = vmatprep.subr.bf16.mxu0 %v5227_v55  ;;  %5114 = vmatprep.subr.bf16.mxu1 %v5227_v55  ;;  %v4827_v43 = vpack.c.bf16 %v3946_v48, %v3945_v25  ;;  %v3844_v60 = vsel %vm3811_vm5, %v3841_v16, %v3843_v0  ;;  %v3911_v47 = vmax.f32 %v3765_v57, %v3842_v27  ;;  %v3673_v16 = vld [vmem:[%s6103_s29 + $0xd8] sm:$0xff] }
 0x265   : > { %v3912_v63 = vmax.f32 %v3766_v29, %v3844_v60  ;;  %v3768_v49 = vmax.f32 %v3737_v35, 0.0  ;;  %v3769_v10 = vmax.f32 %v3738_v40, 0.0  ;;  %v3703_v22 = vmul.f32 %v6110_v46, %v3666_v26 }
 0x266   : > { %v3947_v11 = vmax.f32 %v3909_v13, %v3911_v47  ;;  %v3739_v14 = vadd.f32 %v6128_v45, %v3702_v24  ;;  %v3704_v30 = vmul.f32 %v6110_v46, %v3667_v41  ;;  %v3705_v31 = vmul.f32 %v6110_v46, %v3668_v42  ;;  %v3674_v41 = vld [vmem:[%s6103_s29 + $0xe0] sm:$0xff] }
 0x267   : > { %4825 = vmatpush1.bf16.msra.mxu0 %v4824_v32  ;;  %5128 = vmatpush1.bf16.msra.mxu1 %v4824_v32  ;;  %v3948_v38 = vmax.f32 %v3910_v37, %v3912_v63  ;;  %v3845_v50 = vrot.slane %v3768_v49, 1  ;;  %v3847_v61 = vrot.slane %v3769_v10, 1  ;;  %v3740_v39 = vadd.f32 %v6128_v45, %v3703_v22 }
 0x268   : > { %4826 = vmatprep.subr.bf16.mxu0 %v5227_v55  ;;  %5115 = vmatprep.subr.bf16.mxu1 %v5227_v55  ;;  %v3770_v44 = vmax.f32 %v3739_v14, 0.0  ;;  %v3741_v12 = vadd.f32 %v6128_v45, %v3704_v30  ;;  %v3742_v28 = vadd.f32 %v6128_v45, %v3705_v31  ;;  %v3706_v53 = vmul.f32 %v6110_v46, %v3669_v23 }
 0x269   : > { %v4830_v56 = vpack.c.bf16 %v3948_v38, %v3947_v11  ;;  %v3846_v58 = vsel %vm3811_vm5, %v3843_v0, %v3845_v50  ;;  %v3848_v57 = vsel %vm3811_vm5, %v3845_v50, %v3847_v61  ;;  %v3771_v62 = vmax.f32 %v3740_v39, 0.0  ;;  %v3676_v11 = vld [vmem:[%s6103_s29 + $0xf0] sm:$0x1] }
 0x26a   : > { %v3913_v5 = vmax.f32 %v3767_v15, %v3846_v58  ;;  %v3914_v4 = vmax.f32 %v3768_v49, %v3848_v57  ;;  %v3849_v6 = vrot.slane %v3770_v44, 1  ;;  %v3772_v7 = vmax.f32 %v3741_v12, 0.0  ;;  %v3672_v15 = vld [vmem:[%s6103_s29 + $0xd0] sm:$0xff]  ;;  %v3675_v49 = vld [vmem:[%s6103_s29 + $0xe8] sm:$0xff] }
 0x26b   : > { %4828 = vmatpush1.bf16.msra.mxu0 %v4827_v43  ;;  %5129 = vmatpush1.bf16.msra.mxu1 %v4827_v43  ;;  %v3851_v18 = vrot.slane %v3771_v62, 1  ;;  %v3773_v19 = vmax.f32 %v3742_v28, 0.0  ;;  %v3707_v21 = vmul.f32 %v6110_v46, %v3670_v51  ;;  %v3743_v34 = vadd.f32 %v6128_v45, %v3706_v53 }
 0x26c   : > { %4829 = vmatprep.subr.bf16.mxu0 %v5227_v55  ;;  %5116 = vmatprep.subr.bf16.mxu1 %v5227_v55  ;;  %v3949_v36 = vmax.f32 %v3911_v47, %v3913_v5  ;;  %v3950_v20 = vmax.f32 %v3912_v63, %v3914_v4  ;;  %v3850_v52 = vsel %vm3811_vm5, %v3847_v61, %v3849_v6  ;;  %v3853_v29 = vrot.slane %v3772_v7, 1 }
 0x26d   : > { %v3852_v1 = vsel %vm3811_vm5, %v3849_v6, %v3851_v18  ;;  %v3915_v54 = vmax.f32 %v3769_v10, %v3850_v52  ;;  %v3855_v2 = vrot.slane %v3773_v19, 1  ;;  %v3744_v33 = vadd.f32 %v6128_v45, %v3707_v21 }
 0x26e   : > { %v4833_v9 = vpack.c.bf16 %v3950_v20, %v3949_v36  ;;  %v3916_v8 = vmax.f32 %v3770_v44, %v3852_v1  ;;  %v3854_v13 = vsel %vm3811_vm5, %v3851_v18, %v3853_v29  ;;  %v3774_v37 = vmax.f32 %v3743_v34, 0.0 }
 0x26f   : > { %4831 = vmatpush1.bf16.msra.mxu0 %v4830_v56  ;;  %5130 = vmatpush1.bf16.msra.mxu1 %v4830_v56  ;;  %v3951_v59 = vmax.f32 %v3913_v5, %v3915_v54  ;;  %v3856_v17 = vsel %vm3811_vm5, %v3853_v29, %v3855_v2  ;;  %v3917_v24 = vmax.f32 %v3771_v62, %v3854_v13  ;;  %v3775_v32 = vmax.f32 %v3744_v33, 0.0 }
 0x270   : > { %4832 = vmatprep.subr.bf16.mxu0 %v5227_v55  ;;  %5117 = vmatprep.subr.bf16.mxu1 %v5227_v55  ;;  %v3952_v25 = vmax.f32 %v3914_v4, %v3916_v8  ;;  %v3918_v48 = vmax.f32 %v3772_v7, %v3856_v17  ;;  %v3857_v0 = vrot.slane %v3774_v37, 1  ;;  %v3708_v26 = vmul.f32 %v6110_v46, %v3671_v3 }
 0x271   : > { %v3953_v27 = vmax.f32 %v3915_v54, %v3917_v24  ;;  %v3859_v35 = vrot.slane %v3775_v32, 1  ;;  %v3709_v40 = vmul.f32 %v6110_v46, %v3672_v15  ;;  %v3710_v42 = vmul.f32 %v6110_v46, %v3673_v16 }
 0x272   : > { %v4836_v43 = vpack.c.bf16 %v3952_v25, %v3951_v59  ;;  %v3954_v60 = vmax.f32 %v3916_v8, %v3918_v48  ;;  %v3858_v47 = vsel %vm3811_vm5, %v3855_v2, %v3857_v0  ;;  %v3745_v63 = vadd.f32 %v6128_v45, %v3708_v26  ;;  %v3963_v25 = vld [vmem:[%s6337_s4] sm:$0xff]  ;;  %v3974_v26 = vld [vmem:[%s6337_s4 + $0x58] sm:$0xff] }
 0x273   : > { %4834 = vmatpush1.bf16.msra.mxu0 %v4833_v9  ;;  %5131 = vmatpush1.bf16.msra.mxu1 %v4833_v9  ;;  %v3860_v10 = vsel %vm3811_vm5, %v3857_v0, %v3859_v35  ;;  %v3919_v22 = vmax.f32 %v3773_v19, %v3858_v47  ;;  %v3746_v23 = vadd.f32 %v6128_v45, %v3709_v40  ;;  %v3966_v0 = vld [vmem:[%s6337_s4 + $0x18] sm:$0xff]  ;;  %v3976_v40 = vld [vmem:[%s6337_s4 + $0x68] sm:$0x1] }
 0x274   : > { %4835 = vmatprep.subr.bf16.mxu0 %v5227_v55  ;;  %5118 = vmatprep.subr.bf16.mxu1 %v5227_v55  ;;  %v3920_v14 = vmax.f32 %v3774_v37, %v3860_v10  ;;  %v3776_v30 = vmax.f32 %v3745_v63, 0.0  ;;  %v3711_v31 = vmul.f32 %v6110_v46, %v3674_v41  ;;  %v4839_v38 = vpack.c.bf16 %v3954_v60, %v3953_v27  ;;  %v3973_v27 = vld [vmem:[%s6337_s4 + $0x50] sm:$0xff]  ;;  %v3967_v41 = vld [vmem:[%s6337_s4 + $0x20] sm:$0xff] }
 0x275   : > { %v3777_v50 = vmax.f32 %v3746_v23, 0.0  ;;  %v3747_v61 = vadd.f32 %v6128_v45, %v3710_v42  ;;  %v3712_v39 = vmul.f32 %v6110_v46, %v3675_v49  ;;  %v3955_v44 = vmax.f32 %v3917_v24, %v3919_v22  ;;  %v3975_v42 = vld [vmem:[%s6337_s4 + $0x60] sm:$0x1]  ;;  %v3969_v60 = vld [vmem:[%s6337_s4 + $0x30] sm:$0xff] }
 0x276   : > { %v3861_v12 = vrot.slane %v3776_v30, 1  ;;  %v3748_v28 = vadd.f32 %v6128_v45, %v3711_v31  ;;  %v3713_v51 = vmul.f32 %v6110_v46, %v3676_v11  ;;  %v3956_v53 = vmax.f32 %v3918_v48, %v3920_v14  ;;  %v3971_v48 = vld [vmem:[%s6337_s4 + $0x40] sm:$0xff] }
 0x277   : > { %4837 = vmatpush1.bf16.msra.mxu0 %v4836_v43  ;;  %5132 = vmatpush1.bf16.msra.mxu1 %v4836_v43  ;;  %v3863_v56 = vrot.slane %v3777_v50, 1  ;;  %v3778_v58 = vmax.f32 %v3747_v61, 0.0  ;;  %v3749_v57 = vadd.f32 %v6128_v45, %v3712_v39  ;;  %v3970_v43 = vld [vmem:[%s6337_s4 + $0x38] sm:$0xff] }
 0x278   : > { %4838 = vmatprep.subr.bf16.mxu0 %v5227_v55  ;;  %5119 = vmatprep.subr.bf16.mxu1 %v5227_v55  ;;  %v3862_v62 = vsel %vm3811_vm5, %v3859_v35, %v3861_v12  ;;  %v3779_v5 = vmax.f32 %v3748_v28, 0.0  ;;  %v3750_v4 = vadd.f32 %v6128_v45, %v3713_v51  ;;  %v4842_v36 = vpack.c.bf16 %v3956_v53, %v3955_v44  ;;  %v3968_v35 = vld [vmem:[%s6337_s4 + $0x28] sm:$0xff] }
 0x279   : > { %v3864_v6 = vsel %vm3811_vm5, %v3861_v12, %v3863_v56  ;;  %v3921_v7 = vmax.f32 %v3775_v32, %v3862_v62  ;;  %v3865_v46 = vrot.slane %v3778_v58, 1  ;;  %v3780_v18 = vmax.f32 %v3749_v57, 0.0 }
 0x27a   : > { %v3922_v19 = vmax.f32 %v3776_v30, %v3864_v6  ;;  %v3867_v21 = vrot.slane %v3779_v5, 1  ;;  %v3781_v34 = vmax.f32 %v3750_v4, 0.0 }
 0x27b   : > { %4840 = vmatpush1.bf16.msra.mxu0 %v4839_v38  ;;  %5133 = vmatpush1.bf16.msra.mxu1 %v4839_v38  ;;  %v3957_v20 = vmax.f32 %v3919_v22, %v3921_v7  ;;  %v3866_v52 = vsel %vm3811_vm5, %v3863_v56, %v3865_v46  ;;  %v3927_v29 = vrot.slane %v3780_v18, 1 }
 0x27c   : > { %4841 = vmatprep.subr.bf16.mxu0 %v5227_v55  ;;  %5120 = vmatprep.subr.bf16.mxu1 %v5227_v55  ;;  %v3958_v45 = vmax.f32 %v3920_v14, %v3922_v19  ;;  %v3868_v1 = vsel %vm3811_vm5, %v3865_v46, %v3867_v21  ;;  %v3923_v54 = vmax.f32 %v3777_v50, %v3866_v52  ;;  %v3929_v2 = vrot.slane %v3781_v34, 1 }
 0x27d   : > { %v3924_v33 = vmax.f32 %v3778_v58, %v3868_v1  ;;  %v3928_v3 = vsel %vm3811_vm5, %v3867_v21, %v3927_v29 }
 0x27e   : > { %v4845_v9 = vpack.c.bf16 %v3958_v45, %v3957_v20  ;;  %v3959_v8 = vmax.f32 %v3921_v7, %v3923_v54  ;;  %v3930_v13 = vsel %vm3811_vm5, %v3927_v29, %v3929_v2  ;;  %v3933_v15 = vmax.f32 %v3779_v5, %v3928_v3 }
 0x27f   : > { %4843 = vmatpush1.bf16.msra.mxu0 %v4842_v36  ;;  %5134 = vmatpush1.bf16.msra.mxu1 %v4842_v36  ;;  %v3960_v37 = vmax.f32 %v3922_v19, %v3924_v33  ;;  %v3934_v16 = vmax.f32 %v3780_v18, %v3930_v13 }
 0x280   : > { %4844 = vmatprep.subr.bf16.mxu0 %v5227_v55  ;;  %5121 = vmatprep.subr.bf16.mxu1 %v5227_v55  ;;  %v3961_v17 = vmax.f32 %v3923_v54, %v3933_v15 }
 0x281   : > { %v4848_v59 = vpack.c.bf16 %v3960_v37, %v3959_v8  ;;  %v3962_v24 = vmax.f32 %v3924_v33, %v3934_v16 }
 0x283   : > { %4846 = vmatpush1.bf16.msra.mxu0 %v4845_v9  ;;  %5135 = vmatpush1.bf16.msra.mxu1 %v4845_v9  ;;  %v4851_v32 = vpack.c.bf16 %v3962_v24, %v3961_v17 }
 0x284   : > { %4847 = vmatprep.subr.bf16.mxu0 %v5227_v55  ;;  %5122 = vmatprep.subr.bf16.mxu1 %v5227_v55 }
 0x287   : > { %4849 = vmatpush1.bf16.msra.mxu0 %v4848_v59  ;;  %5136 = vmatpush1.bf16.msra.mxu1 %v4848_v59 }
 0x288   : > { %4850 = vmatprep.subr.bf16.mxu0 %v5227_v55  ;;  %5123 = vmatprep.subr.bf16.mxu1 %v5227_v55  ;;  %v3965_v55 = vld [vmem:[%s6337_s4 + $0x10] sm:$0xff] }
 0x28b   : > { %4852 = vmatpush1.bf16.msra.mxu0 %v4851_v32  ;;  %5137 = vmatpush1.bf16.msra.mxu1 %v4851_v32 }
 0x28e   : > { %4064 = vmatmul.mubr.f32.vlgmr.msra.gmra.mrb[0].mxu0 %v3963_v25  ;;  %4084 = vmatmul.mubr.f32.vlgmr.msra.gmra.mrb[0].mxu1 %v3971_v48 }
 0x28f   : > { %4344 = vmatprep.mubr.msk.f32.mxu0 %vm3977_vm4, %v3966_v0  ;;  %4348 = vmatprep.mubr.msk.f32.mxu1 %vm3977_vm4, %v3974_v26 }
 0x292   : > { %4069 = vmatmul.mubr.f32.gmra.mrb[2].mxu0 %v3965_v55  ;;  %4089 = vmatmul.mubr.f32.gmra.mrb[2].mxu1 %v3973_v27 }
 0x293   : > { %4345 = vmatprep.mubr.msk.f32.mxu0 %vm3977_vm4, %v3968_v35  ;;  %4349 = vmatprep.mubr.msk.f32.mxu1 %vm3977_vm4, %v3976_v40 }
 0x296   : > { %4074 = vmatmul.mubr.f32.gmra.mrb[4].mxu0 %v3967_v41  ;;  %4094 = vmatmul.mubr.f32.gmra.mrb[4].mxu1 %v3975_v42 }
 0x297   : > { %4346 = vmatprep.mubr.msk.f32.mxu0 %vm3977_vm4, %v3970_v43 }
 0x29a   : > { %4079 = vmatmul.mubr.f32.gmra.mrb[6].mxu0 %v3969_v60 }
 0x361   : > { %v4065_v47 = vpop.f32.mrb[0].mxu0  ;;  %v4085_v63 = vpop.f32.mrb[0].mxu1 }
 0x362   : > { %4100 = vst.msk [vmem:[%s5301_s7] sm:$0xff] %vm4099_vm6, %v4065_v47  ;;  %v4067_v49 = vpop.f32.mrb[1].mxu0  ;;  %4104 = vst.msk [vmem:[%s5301_s7 + $0x20] sm:$0xff] %vm4099_vm6, %v4085_v63  ;;  %v4087_v10 = vpop.f32.mrb[1].mxu1 }
 0x365   : > { %v4070_v22 = vpop.f32.mrb[2].mxu0  ;;  %v4090_v23 = vpop.f32.mrb[2].mxu1 }
 0x366   : > { %4101 = vst.msk [vmem:[%s5301_s7 + $0x8] sm:$0xff] %vm4099_vm6, %v4070_v22  ;;  %v4072_v11 = vpop.f32.mrb[3].mxu0  ;;  %4105 = vst.msk [vmem:[%s5301_s7 + $0x28] sm:$0xff] %vm4099_vm6, %v4090_v23  ;;  %v4092_v14 = vpop.f32.mrb[3].mxu1 }
 0x369   : > { %v4075_v30 = vpop.f32.mrb[4].mxu0  ;;  %v4095_v31 = vpop.f32.mrb[4].mxu1 }
 0x36a   : > { %4102 = vst.msk [vmem:[%s5301_s7 + $0x10] sm:$0xff] %vm4099_vm6, %v4075_v30  ;;  %v4077_v38 = vpop.f32.mrb[5].mxu0  ;;  %v4097_v50 = vpop.f32.mrb[5].mxu1 }
 0x36b   : > { %4107 = vst.msk [vmem:[%s5301_s7 + $0x30] sm:$0x1] %vm4106_vm7, %v4095_v31 }
 0x36d   : > { %v4080_v61 = vpop.f32.mrb[6].mxu0 }
 0x36e   : > { %4103 = vst.msk [vmem:[%s5301_s7 + $0x18] sm:$0xff] %vm4099_vm6, %v4080_v61  ;;  %v4082_v39 = vpop.f32.mrb[7].mxu0 }
 0x36f PF: > { %s15_s22 = sadd.s32 1, %s5223_s22   ;;  %s6363_s18 = smov %s5215_s20 }
 0x370   : > { %p12_p12 = scmp.ge.s32.totalorder %s15_s22, 6   ;;  %s6364_s19 = smov %s5219_s21 }
 0x371   : > { %s6365_s20 = smov %s6368_s23  ;;  %s6366_s21 = smov %s6372_s24 }
 0x372   :  { %14 = sbr.rel (!%p12_p12) target bundleno = 3 (0x3), region = 92 }

</bundles_post_ra>
